<compile_context>
chip_gen: v7x
topology: tpu7x:2x2x1
jax: 0.10.0
libtpu: 0.0.40
codegen_flags: <defaults>
</compile_context>

<pallas_src>
import functools

import jax
import jax.numpy as jnp
import numpy as np
from jax.experimental import pallas as pl
from jax.experimental.pallas import tpu as pltpu

_TWO_PI = 2.0 * np.pi


def _fourier_kernel(x_ref, b_ref, o_ref, *, c, m):
    x = x_ref[...].astype(jnp.float32)                            # [TB, C]
    b = b_ref[...].astype(jnp.float32)                            # [C, M]
    # K = C gives ~2-3% MXU utilization, but the vector-extended slot is idle
    # in this kernel, so the matmul is effectively free here (do NOT move it
    # onto the VPU, which carries the sin/cos polynomials).
    res = _TWO_PI * jnp.dot(x, b, preferred_element_type=jnp.float32)  # [TB, M]
    # TODO(synk): if v7x bundle dumps show the two transcendentals dominating
    # and Mosaic not CSE-ing the range reduction, hand-roll a shared-argument
    # sincos (one range reduction feeding both polynomials).
    s = jnp.sin(res)
    co = jnp.cos(res)

    if (m % 128 == 0) and (c <= m):
        # Lane-aligned store path.
        #   target: out[:, 0:c]=x, out[:, c:c+m]=sin, out[:, c+m:c+2m]=cos
        # roll right by c:  r*[:, j] = src[:, (j - c) % m]
        rs = pltpu.roll(s, shift=c, axis=1)
        rc = pltpu.roll(co, shift=c, axis=1)
        # Dense, 128-aligned bulk stores (cols 0:c and m:m+c fixed up below).
        o_ref[:, 0:m] = rs.astype(o_ref.dtype)
        o_ref[:, m:2 * m] = rc.astype(o_ref.dtype)
        # Fix-ups: width-c masked stores, all at 128-aligned offsets (no rotate).
        o_ref[:, 0:c] = x.astype(o_ref.dtype)                          # x
        o_ref[:, m:m + c] = rs[:, 0:c].astype(o_ref.dtype)             # sin[:, m-c:m]
        o_ref[:, 2 * m:2 * m + c] = rc[:, 0:c].astype(o_ref.dtype)     # cos[:, m-c:m]
    else:
        # Fallback for configs the aligned path does not cover: plain
        # (possibly lane-unaligned) per-segment stores.
        o_ref[:, 0:c] = x.astype(o_ref.dtype)
        o_ref[:, c:c + m] = s.astype(o_ref.dtype)
        o_ref[:, c + m:c + 2 * m] = co.astype(o_ref.dtype)


def _pick_block_batch(batch, target, min_steps=4):
    """Batch tile: multiple of 8 (sublane rule), capped so the grid has at
    least `min_steps` steps (pipelining + megacore).  Prefers a divisor of
    `batch` close below the cap (no ragged last tile); otherwise the ragged
    tail is handled by the cdiv grid + masked writeback."""
    if batch <= 8:
        return batch
    cap = max(8, ((batch // min_steps) // 8) * 8)
    tb = max(8, (min(target, cap, batch) // 8) * 8)
    cand = tb
    while cand >= 8 and (tb - cand) <= 256:
        if batch % cand == 0:
            return cand
        cand -= 8
    return tb


def fourier_feature_transform(x, B, *, block_batch=2048):
    """x: [batch, C], B: [C, M] -> [batch, C + 2*M]
    = concat([x, sin(2*pi*x@B), cos(2*pi*x@B)], axis=1)."""
    batch, c = x.shape
    c2, m = B.shape
    assert c == c2, f"Expected input to have {c2} channels (got {c} channels)"
    out_dim = c + 2 * m

    tb = _pick_block_batch(batch, block_batch)
    grid = (pl.cdiv(batch, tb),)

    kernel = functools.partial(_fourier_kernel, c=c, m=m)

    cost = pl.CostEstimate(
        flops=2 * batch * c * m,
        transcendentals=2 * batch * m,
        bytes_accessed=4 * (batch * c + c * m + batch * out_dim),
    )

    return pl.pallas_call(
        kernel,
        out_shape=jax.ShapeDtypeStruct((batch, out_dim), x.dtype),
        grid=grid,
        in_specs=[
            pl.BlockSpec((tb, c), lambda i: (i, 0)),   # batch tile of x
            pl.BlockSpec((c, m), lambda i: (0, 0)),    # B resident in VMEM
        ],
        out_specs=pl.BlockSpec((tb, out_dim), lambda i: (i, 0)),
        compiler_params=pltpu.CompilerParams(
            dimension_semantics=("parallel",),          # shard batch grid across TCs
            vmem_limit_bytes=48 * 1024 * 1024,          # < v7x 64 MiB/TC, >> usage at tb=2048
        ),
        cost_estimate=cost,
    )(x, B.astype(jnp.float32))


def make_B(key, num_input_channels, mapping_size, scale):
    """Deterministic replica of the module's __init__:
    B = randn(C, M) * scale, rows sorted by their L2 norm."""
    B = jax.random.normal(key, (num_input_channels, mapping_size), jnp.float32) * scale
    norms = jnp.linalg.norm(B, axis=1)
    order = jnp.argsort(norms)
    return B[order]


def reference(x, B):
    res = _TWO_PI * jnp.matmul(x, B, precision=jax.lax.Precision.HIGHEST)
    return jnp.concatenate([x, jnp.sin(res), jnp.cos(res)], axis=1)


if __name__ == "__main__":
    num_input_channels = 4
    mapping_size = 256
    scale = 10.0
    batch = 512

    key = jax.random.PRNGKey(0)
    kB, kx, kx2 = jax.random.split(key, 3)

    B = make_B(kB, num_input_channels, mapping_size, scale)
    x = jax.random.normal(kx, (batch, num_input_channels), jnp.float32)

    # Default block_batch -> tb=128, grid=(4,): pipelined, multi-step.
    out = jax.block_until_ready(fourier_feature_transform(x, B))
    ref = reference(x, B)
    assert out.shape == (batch, num_input_channels + 2 * mapping_size)

    out_np = np.asarray(out)
    ref_np = np.asarray(ref)
    # x passthrough must be exact.
    np.testing.assert_allclose(out_np[:, :num_input_channels],
                               ref_np[:, :num_input_channels], rtol=0, atol=0)
    # f32 sin/cos of O(100-1000) arguments amplifies few-ulp matmul rounding
    # differences (MXU vs HIGHEST-precision XLA matmul) to ~1e-4 abs.
    np.testing.assert_allclose(out_np[:, num_input_channels:],
                               ref_np[:, num_input_channels:], rtol=1e-3, atol=2e-3)

    # Ragged batch (not a multiple of the tile): exercises the cdiv grid and
    # the masked last-block writeback path.
    x2 = jax.random.normal(kx2, (100, num_input_channels), jnp.float32)
    out2 = jax.block_until_ready(fourier_feature_transform(x2, B))
    ref2 = reference(x2, B)
    np.testing.assert_allclose(np.asarray(out2), np.asarray(ref2), rtol=1e-3, atol=2e-3)

    print("KERNEL_OK")
</pallas_src>

<mosaic_0001>
module attributes {stable_mosaic.version = 11 : i64} {
  func.func @_fourier_kernel(%arg0: i32, %arg1: memref<128x4xf32, #tpu.memory_space<vmem>>, %arg2: memref<4x256xf32, #tpu.memory_space<vmem>>, %arg3: memref<128x516xf32, #tpu.memory_space<vmem>>) attributes {dimension_semantics = [#tpu.dimension_semantics<parallel>], iteration_bounds = array<i64: 4>, scalar_prefetch = 0 : i64, scratch_operands = 0 : i64, tpu.core_type = #tpu.core_type<tc>, window_params = [{transform_indices = @transform_0, window_bounds = array<i64: 128, 4>}, {pipeline_mode = #tpu.pipeline_mode<synchronous>, transform_indices = @transform_1, window_bounds = array<i64: 4, 256>}, {transform_indices = @transform_2, window_bounds = array<i64: 128, 516>}]} {
    %c0 = arith.constant 0 : index
    %c0_0 = arith.constant 0 : index
    %0 = vector.load %arg1[%c0, %c0_0] : memref<128x4xf32, #tpu.memory_space<vmem>>, vector<128x4xf32>
    %c0_1 = arith.constant 0 : index
    %c0_2 = arith.constant 0 : index
    %1 = vector.load %arg2[%c0_1, %c0_2] : memref<4x256xf32, #tpu.memory_space<vmem>>, vector<4x256xf32>
    %cst = arith.constant dense<0.000000e+00> : vector<128x256xf32>
    %2 = tpu.matmul %0, %1, %cst {dimension_numbers = #tpu.dot_dimension_numbers<[1], [0], [0], [1], [0, 0, 1, 1], [], []>} : vector<128x4xf32>, vector<4x256xf32>, vector<128x256xf32> -> vector<128x256xf32>
    %cst_3 = arith.constant 6.28318548 : f32
    %3 = vector.broadcast %cst_3 : f32 to vector<128x256xf32>
    %4 = arith.mulf %3, %2 : vector<128x256xf32>
    %5 = math.sin %4 : vector<128x256xf32>
    %6 = math.cos %4 : vector<128x256xf32>
    %c4_i32 = arith.constant 4 : i32
    %7 = tpu.dynamic_rotate %5 by %c4_i32 dim 1 : vector<128x256xf32>, i32 -> vector<128x256xf32>
    %c4_i32_4 = arith.constant 4 : i32
    %8 = tpu.dynamic_rotate %6 by %c4_i32_4 dim 1 : vector<128x256xf32>, i32 -> vector<128x256xf32>
    %c0_5 = arith.constant 0 : index
    %c0_6 = arith.constant 0 : index
    %9 = vector.load %arg3[%c0_5, %c0_6] : memref<128x516xf32, #tpu.memory_space<vmem>>, vector<128x256xf32>
    tpu.vector_store %arg3[%c0_5, %c0_6], %7 {strides = array<i32>} : memref<128x516xf32, #tpu.memory_space<vmem>>, vector<128x256xf32>,
    %c0_7 = arith.constant 0 : index
    %c256 = arith.constant 256 : index
    %10 = vector.load %arg3[%c0_7, %c256] : memref<128x516xf32, #tpu.memory_space<vmem>>, vector<128x256xf32>
    tpu.vector_store %arg3[%c0_7, %c256], %8 {strides = array<i32>} : memref<128x516xf32, #tpu.memory_space<vmem>>, vector<128x256xf32>,
    %c0_8 = arith.constant 0 : index
    %c0_9 = arith.constant 0 : index
    %11 = vector.load %arg3[%c0_8, %c0_9] : memref<128x516xf32, #tpu.memory_space<vmem>>, vector<128x4xf32>
    tpu.vector_store %arg3[%c0_8, %c0_9], %0 {strides = array<i32>} : memref<128x516xf32, #tpu.memory_space<vmem>>, vector<128x4xf32>,
    %12 = vector.extract_strided_slice %7 {offsets = [0, 0], sizes = [128, 4], strides = [1, 1]} : vector<128x256xf32> to vector<128x4xf32>
    %c0_10 = arith.constant 0 : index
    %c256_11 = arith.constant 256 : index
    %13 = vector.load %arg3[%c0_10, %c256_11] : memref<128x516xf32, #tpu.memory_space<vmem>>, vector<128x4xf32>
    tpu.vector_store %arg3[%c0_10, %c256_11], %12 {strides = array<i32>} : memref<128x516xf32, #tpu.memory_space<vmem>>, vector<128x4xf32>,
    %14 = vector.extract_strided_slice %8 {offsets = [0, 0], sizes = [128, 4], strides = [1, 1]} : vector<128x256xf32> to vector<128x4xf32>
    %c0_12 = arith.constant 0 : index
    %c512 = arith.constant 512 : index
    %15 = vector.load %arg3[%c0_12, %c512] : memref<128x516xf32, #tpu.memory_space<vmem>>, vector<128x4xf32>
    tpu.vector_store %arg3[%c0_12, %c512], %14 {strides = array<i32>} : memref<128x516xf32, #tpu.memory_space<vmem>>, vector<128x4xf32>,
    return
  }
  func.func @transform_0(%arg0: i32) -> (i32, i32) {
    %c0_i32 = arith.constant 0 : i32
    %c0_i32_0 = arith.constant 0 : i32
    return %arg0, %c0_i32 : i32, i32
  }
  func.func @transform_1(%arg0: i32) -> (i32, i32) {
    %c0_i32 = arith.constant 0 : i32
    %c0_i32_0 = arith.constant 0 : i32
    %c0_i32_1 = arith.constant 0 : i32
    return %c0_i32, %c0_i32_0 : i32, i32
  }
  func.func @transform_2(%arg0: i32) -> (i32, i32) {
    %c0_i32 = arith.constant 0 : i32
    %c0_i32_0 = arith.constant 0 : i32
    return %arg0, %c0_i32 : i32, i32
  }
}

</mosaic_0001>

<bundles_post_ra>
// kernel: tpu_custom_call.1
= control target key start
LH: loop header
LB: loop body
LE: loop exit
PB: predicated region body
PF: predicated region fallthrough
CT: control target
= control target key end

     0   :  { %7 = vsyncpa [#allocation3], 0  ;;  %s8067_s9 = smov 0   ;;  %s12315_s0 = inlined_call_operand.vmem [shape: f32[512,4], index: 0, kind: input, shape index: {}]   ;;  %s12316_s1 = inlined_call_operand.hbm [shape: f32[4,256], index: 1, kind: input, shape index: {}]   ;;  %s12317_s2 = inlined_call_operand.vmem [shape: f32[512,516], index: 2, kind: output, shape index: {}]  }
   0x1 LB: > { %s7429_s10 = sadd.s32 4294967295, %s8041_s9   ;;  %p7431_p0 = scmp.ge.s32.totalorder %s8041_s9, 1  ;;  %s8041_s9 = sphi %s8067_s9, %s13_s9  }
   0x2   : > { %p91_p1 = scmp.lt.s32.totalorder %s8041_s9, 5  ;;  %p8081_p3 = scmp.eq.s32.totalorder %s7429_s10, 0 }
   0x3   : > { %s8043_s13 = smov [#allocation2]   ;;  %s8003_s18 = scalar_lea.hbm %s12316_s1, 128 }
   0x4   : > { %p8075_p2 = pnand %p7431_p0, %p91_p1  ;;  %s104_s14 = sshll.u32 %s8043_s13, 4  ;;  %s105_s14 = int_to_ptr.vmem [resolvable:$true] %s104_s14 }
   0x5   : > { %s12531_s12 = scalar_select %p8081_p3, 1, 0 }
   0x6   : > { %s12530_s11 = scalar_select %p8075_p2, 1, 0 }
   0x7   : > { %p7851_p4 = pneg %p8075_p2  ;;  %p8004_p6 = scmp.ne.s32.totalorder %s12316_s1, %s8003_s18 }
   0x8   : > { %p8010_p10 = scmp.lt.u32.totalorder %s8003_s18, %s12316_s1 }
   0x9   : > { %p8089_p5 = pnand %p8081_p3, %p7851_p4 }
   0xb   : > { %p8005_p7 = pneg %p8089_p5 }
   0xd   : > { %p8006_p8 = pnand %p8005_p7, %p8004_p6 }
   0xf   : > { %p8007_p9 = pneg %p8006_p8 }
  0x11   : > { %p8012_p11 = pnand %p8010_p10, %p8007_p9 }
  0x13   : > { %8015 = shalt.err (!%p8012_p11)
}
  0x14   : > { %s8016_s23 = scalar_lea.vmem %s105_s14, 128  ;;  %p8024_p1 = scmp.lt.s32.totalorder %s105_s14, %s105_s14 }
  0x15   : > { %p8017_p12 = scmp.ne.s32.totalorder %s105_s14, %s8016_s23  ;;  %p8025_p4 = scmp.lt.s32.totalorder %s8016_s23, %s8016_s23 }
  0x17   : > { %p8019_p13 = pnand %p8017_p12, %p8005_p7  ;;  %p8026_p3 = por %p8025_p4, %p8024_p1 }
  0x19   : > { %p8020_p0 = pneg %p8019_p13 }
  0x1b   : > { %p8027_p2 = pnand %p8026_p3, %p8020_p0 }
  0x1d   : > { %8030 = shalt.err (!%p8027_p2)
}
  0x1e   : > { %7854 = dma.hbm_to_vmem [thread:$0]  (!%p8089_p5), %s12316_s1, 128, %s105_s14, [#allocation3]  }
  0x1f   : > { %p12533_p6 = scmp.ne.s32.totalorder %s12530_s11, 0 }
  0x21   : > { %126 = sbr.rel (%p12533_p6) target bundleno = 1271 (0x4f7), region = 28 }
  0x28   : > { %p12534_p8 = scmp.ne.s32.totalorder %s12531_s12, 0 }
  0x2a   : > { %8036 = dma.done.wait (%p12534_p8), [#allocation3], 128  }
  0x2b   : > { %8038 = vsyncadd (%p12534_p8), [#allocation3], 4294967168  ;;  %s7436_s26 = sshll.u32 %s7429_s10, 4  ;;  %v8044_v0 = vmov 0.0   ;;  %v178_v1 = vld [vmem:[#allocation2] sm:$0xff]  ;;  %vm230_vm0 = vcmask 1043456  }
  0x2c   : > { %299 = vmatprep.mubr.f32.mxu0 %v8044_v0  ;;  %347 = vmatprep.mubr.f32.mxu1 %v8044_v0  ;;  %p150_p2 = scmp.lt.s32.totalorder %s7436_s26, 63  ;;  %v180_v2 = vcombine.high %v178_v1, %v178_v1  ;;  %vm12425_vm1 = vcmask 31744   ;;  %v12329_v58 = vmov 683565275   ;;  %v12327_v60 = vmov 2475754826  }
  0x2d   : > { %v12332_v63 = vmov 2131351028   ;;  %s8051_s3 = smov 4  }
  0x2e   : > { %s12976_s26 = smov (!%p150_p2, %s7436_s26), 63  ;;  %7440 = vmatprep.subr.msk.mxu0 %vm230_vm0, %v180_v2  ;;  %7716 = vmatprep.subr.msk.mxu1 %vm230_vm0, %v180_v2  ;;  %v12335_v2 = vmov 2102212464  }
  0x2f   : > { %s7437_s27 = sshll.u32 %s12976_s26, 3  ;;  %7441 = vmatpush1.msk.msra.mxu0 %vm230_vm0, %v178_v1  ;;  %7717 = vmatpush1.msk.msra.mxu1 %vm230_vm0, %v178_v1  ;;  %s7718_s4 = smul.u32 40, %s12976_s26 }
  0x30   : > { %s8123_s30 = scalar_lea.vmem %s12315_s0, %s7437_s27 }
  0x31   : > { %v8126_v3 = vld [vmem:[%s8123_s30] sm:$0xff]  ;;  %v8136_v5 = vld [vmem:[%s8123_s30 + $0x8] sm:$0xff]  ;;  %v8146_v7 = vld [vmem:[%s8123_s30 + $0x10] sm:$0xff]  ;;  %s11938_s7 = scalar_lea.vmem %s12317_s2, %s7718_s4 }
  0x32   : > { %12535 = vst [vmem:[#allocation5_spill] sm:$0xff] %v8126_v3  ;;  %v8129_v4 = vld [vmem:[%s8123_s30 + $0x40] sm:$0xff]  ;;  %7442 = vmatmul.mubr.msk.f32.vlgmr.msra.gmra.mrb[0].mxu0 %vm12425_vm1, %v8126_v3  ;;  %12537 = vst [vmem:[#allocation7_spill] sm:$0xff] %v8136_v5  ;;  %v8139_v6 = vld [vmem:[%s8123_s30 + $0x48] sm:$0xff] }
  0x33   : > { %12536 = vst [vmem:[#allocation6_spill] sm:$0xff] %v8129_v4  ;;  %7450 = vmatmul.mubr.msk.f32.vlgmr.msra.gmra.mrb[0].mxu1 %vm12425_vm1, %v8129_v4  ;;  %305 = vmatprep.mubr.f32.mxu0 %v8044_v0  ;;  %12538 = vst [vmem:[#allocation8_spill] sm:$0xff] %v8139_v6  ;;  %v8149_v8 = vld [vmem:[%s8123_s30 + $0x50] sm:$0xff]  ;;  %v8156_v9 = vld [vmem:[%s8123_s30 + $0x18] sm:$0xff] }
  0x34   : > { %353 = vmatprep.mubr.f32.mxu1 %v8044_v0  ;;  %12539 = vst [vmem:[#allocation9_spill] sm:$0xff] %v8146_v7  ;;  %12540 = vst [vmem:[#allocation10_spill] sm:$0xff] %v8149_v8  ;;  %v8159_v10 = vld [vmem:[%s8123_s30 + $0x58] sm:$0xff]  ;;  %v8166_v11 = vld [vmem:[%s8123_s30 + $0x20] sm:$0xff] }
  0x35   : > { %12541 = vst [vmem:[#allocation11_spill] sm:$0xff] %v8156_v9  ;;  %12542 = vst [vmem:[#allocation12_spill] sm:$0xff] %v8159_v10  ;;  %v8169_v12 = vld [vmem:[%s8123_s30 + $0x60] sm:$0xff]  ;;  %v8176_v13 = vld [vmem:[%s8123_s30 + $0x28] sm:$0xff] }
  0x36   : > { %7443 = vmatmul.mubr.msk.f32.gmra.mrb[2].mxu0 %vm12425_vm1, %v8136_v5  ;;  %12543 = vst [vmem:[#allocation13_spill] sm:$0xff] %v8166_v11  ;;  %12544 = vst [vmem:[#allocation14_spill] sm:$0xff] %v8169_v12  ;;  %v8179_v14 = vld [vmem:[%s8123_s30 + $0x68] sm:$0xff]  ;;  %v8186_v15 = vld [vmem:[%s8123_s30 + $0x30] sm:$0xff] }
  0x37   : > { %7451 = vmatmul.mubr.msk.f32.gmra.mrb[2].mxu1 %vm12425_vm1, %v8139_v6  ;;  %311 = vmatprep.mubr.f32.mxu0 %v8044_v0  ;;  %12545 = vst [vmem:[#allocation15_spill] sm:$0xff] %v8176_v13  ;;  %12546 = vst [vmem:[#allocation16_spill] sm:$0xff] %v8179_v14  ;;  %v8189_v16 = vld [vmem:[%s8123_s30 + $0x70] sm:$0xff]  ;;  %v8196_v17 = vld [vmem:[%s8123_s30 + $0x38] sm:$0xff] }
  0x38   : > { %359 = vmatprep.mubr.f32.mxu1 %v8044_v0  ;;  %12547 = vst [vmem:[#allocation17_spill] sm:$0xff] %v8186_v15  ;;  %12548 = vst [vmem:[#allocation18_spill] sm:$0xff] %v8189_v16  ;;  %v8199_v18 = vld [vmem:[%s8123_s30 + $0x78] sm:$0xff] }
  0x39   : > { %12549 = vst [vmem:[#allocation19_spill] sm:$0xff] %v8196_v17  ;;  %12550 = vst [vmem:[#allocation20_spill] sm:$0xff] %v8199_v18 }
  0x3a   : > { %7444 = vmatmul.mubr.msk.f32.gmra.mrb[4].mxu0 %vm12425_vm1, %v8146_v7 }
  0x3b   : > { %7452 = vmatmul.mubr.msk.f32.gmra.mrb[4].mxu1 %vm12425_vm1, %v8149_v8  ;;  %317 = vmatprep.mubr.f32.mxu0 %v8044_v0 }
  0x3c   : > { %365 = vmatprep.mubr.f32.mxu1 %v8044_v0 }
  0x3e   : > { %7445 = vmatmul.mubr.msk.f32.gmra.mrb[6].mxu0 %vm12425_vm1, %v8156_v9 }
  0x3f   : > { %7453 = vmatmul.mubr.msk.f32.gmra.mrb[6].mxu1 %vm12425_vm1, %v8159_v10  ;;  %323 = vmatprep.mubr.f32.mxu0 %v8044_v0 }
  0x40   : > { %371 = vmatprep.mubr.f32.mxu1 %v8044_v0 }
  0x42   : > { %7446 = vmatmul.mubr.msk.f32.gmra.mrb[8].mxu0 %vm12425_vm1, %v8166_v11 }
  0x43   : > { %7454 = vmatmul.mubr.msk.f32.gmra.mrb[8].mxu1 %vm12425_vm1, %v8169_v12  ;;  %329 = vmatprep.mubr.f32.mxu0 %v8044_v0 }
  0x44   : > { %377 = vmatprep.mubr.f32.mxu1 %v8044_v0 }
  0x46   : > { %7447 = vmatmul.mubr.msk.f32.gmra.mrb[10].mxu0 %vm12425_vm1, %v8176_v13 }
  0x47   : > { %7455 = vmatmul.mubr.msk.f32.gmra.mrb[10].mxu1 %vm12425_vm1, %v8179_v14  ;;  %335 = vmatprep.mubr.f32.mxu0 %v8044_v0 }
  0x48   : > { %383 = vmatprep.mubr.f32.mxu1 %v8044_v0 }
  0x4a   : > { %7448 = vmatmul.mubr.msk.f32.gmra.mrb[12].mxu0 %vm12425_vm1, %v8186_v15 }
  0x4b   : > { %7456 = vmatmul.mubr.msk.f32.gmra.mrb[12].mxu1 %vm12425_vm1, %v8189_v16  ;;  %341 = vmatprep.mubr.f32.mxu0 %v8044_v0 }
  0x4c   : > { %389 = vmatprep.mubr.f32.mxu1 %v8044_v0 }
  0x4e   : > { %7449 = vmatmul.mubr.msk.f32.gmra.mrb[14].mxu0 %vm12425_vm1, %v8196_v17 }
  0x4f   : > { %7457 = vmatmul.mubr.msk.f32.gmra.mrb[14].mxu1 %vm12425_vm1, %v8199_v18 }
 0x105   : > { %v8205_v19 = vpop.f32.mrb[0].mxu0 }
 0x106   : > { %v349_v20 = vpop.f32.mrb[0].mxu1  ;;  %v303_v22 = vpop.f32.mrb[1].mxu0 }
 0x107   : > { %v8207_v21 = vmul.f32 6.2831855, %v349_v20  ;;  %v351_v23 = vpop.f32.mrb[1].mxu1  ;;  %v8209_v24 = vmul.f32 6.2831855, %v303_v22 }
 0x108   : > { %v8215_v29 = vmul.f32 6.2831855, %v351_v23  ;;  %v12325_v23 = vmov 920167782  }
 0x109   : > { %12551 = vst [vmem:[#allocation21_spill] sm:$0xff] %v8207_v21  ;;  %12552 = vst [vmem:[#allocation22_spill] sm:$0xff] %v8209_v24  ;;  %v12322_v25 = vand.u32 2147483647, %v8207_v21  ;;  %v2095_v26 = vand.u32 2139095040, %v8207_v21  ;;  %v535_v28 = vand.u32 2139095040, %v8209_v24 }
 0x10a   : > { %v12321_v27 = vand.u32 2147483647, %v8209_v24  ;;  %12553 = vst [vmem:[#allocation23_spill] sm:$0xff] %v8215_v29  ;;  %v307_v31 = vpop.f32.mrb[2].mxu0  ;;  %v8219_v35 = vpop.f32.mrb[2].mxu1  ;;  %v2199_v37 = vand.u32 2139095040, %v8215_v29 }
 0x10b   : > { %v2096_v30 = vshrl.u32 %v2095_v26, 23  ;;  %v536_v32 = vshrl.u32 %v535_v28, 23  ;;  %v2099_v34 = vand.u32 8388607, %v12322_v25  ;;  %v8224_v38 = vpop.f32.mrb[3].mxu0  ;;  %v8226_v39 = vpop.f32.mrb[3].mxu1 }
 0x10c   : > { %v539_v36 = vand.u32 8388607, %v12321_v27  ;;  %v2200_v48 = vshrl.u32 %v2199_v37, 23  ;;  %v8235_v52 = vmul.f32 6.2831855, %v307_v31 }
 0x10d   : > { %v7522_v33 = vadd.s32 4294967169, %v2096_v30  ;;  %v7462_v41 = vadd.s32 4294967169, %v536_v32  ;;  %v8228_v42 = vpop.f32.mrb[4].mxu0  ;;  %v2100_v45 = vor.u32 8388608, %v2099_v34  ;;  %v12323_v30 = vmov 1326507024  }
 0x10e   : > { %v8230_v43 = vpop.f32.mrb[4].mxu1  ;;  %v8232_v44 = vpop.f32.mrb[5].mxu0  ;;  %v540_v47 = vor.u32 8388608, %v539_v36  ;;  %12554 = vst [vmem:[#allocation24_spill] sm:$0xff] %v8235_v52  ;;  %v7526_v56 = vadd.s32 4294967169, %v2200_v48 }
 0x10f   : > { %v2102_v40 = vadd.s32 1, %v7522_v33  ;;  %v542_v50 = vadd.s32 1, %v7462_v41  ;;  %v8237_v54 = vshll.u32 %v2100_v45, 8 }
 0x110   : > { %v8239_v55 = vshll.u32 %v540_v47, 8  ;;  %v2206_v41 = vadd.s32 1, %v7526_v56 }
 0x111   : > { %vm2103_vm2 = vcmp.gt.s32.totalorder %v2102_v40, 0  ;;  %vm543_vm3 = vcmp.gt.s32.totalorder %v542_v50, 0 }
 0x112   : > { %v2104_v46 = vsel %vm2103_vm2, %v2102_v40, 0  ;;  %vm2207_vm8 = vcmp.gt.s32.totalorder %v2206_v41, 0 }
 0x113   : > { %v2106_v49 = vand.u32 31, %v2104_v46  ;;  %v2105_v57 = vshrl.u32 %v2104_v46, 5  ;;  %v544_v46 = vsel %vm543_vm3, %v542_v50, 0 }
 0x115   : > { %v2107_v53 = vsub.s32 32, %v2106_v49  ;;  %v2109_v59 = vshll.u32 %v12329_v58, %v2106_v49  ;;  %v2112_v61 = vshll.u32 %v12327_v60, %v2106_v49  ;;  %v2115_v1 = vshll.u32 %v12332_v63, %v2106_v49 }
 0x116   : > { %v2118_v22 = vshll.u32 %v12335_v2, %v2106_v49  ;;  %v2121_v28 = vshll.u32 %v12325_v23, %v2106_v49  ;;  %vm2124_vm4 = vcmp.lt.s32.totalorder %v2105_v57, 1  ;;  %vm2126_vm5 = vcmp.lt.s32.totalorder %v2105_v57, 3 }
 0x117   : > { %v2110_v62 = vshrl.u32 %v12327_v60, %v2107_v53  ;;  %v2113_v0 = vshrl.u32 %v12332_v63, %v2107_v53  ;;  %v2116_v20 = vshrl.u32 %v12335_v2, %v2107_v53  ;;  %v2119_v26 = vshrl.u32 %v12325_v23, %v2107_v53 }
 0x118   : > { %v2122_v31 = vshrl.u32 %v12323_v30, %v2107_v53  ;;  %v2108_v32 = vshrl.u32 %v12329_v58, %v2107_v53  ;;  %vm2127_vm6 = vcmp.lt.s32.totalorder %v2105_v57, 4  ;;  %vm2125_vm7 = vcmp.lt.s32.totalorder %v2105_v57, 2 }
 0x119   : > { %v2111_v33 = vor.u32 %v2110_v62, %v2109_v59  ;;  %v2114_v34 = vor.u32 %v2113_v0, %v2112_v61  ;;  %v2117_v36 = vor.u32 %v2116_v20, %v2115_v1  ;;  %v2120_v37 = vor.u32 %v2119_v26, %v2118_v22 }
 0x11a   : > { %v2123_v40 = vor.u32 %v2122_v31, %v2121_v28  ;;  %v545_v62 = vshrl.u32 %v544_v46, 5  ;;  %v546_v0 = vand.u32 31, %v544_v46 }
 0x11b   : > { %v2128_v45 = vsel %vm2124_vm4, %v2108_v32, %v2111_v33  ;;  %v2129_v47 = vsel %vm2127_vm6, %v2117_v36, 2102212464  ;;  %v2132_v48 = vsel %vm2124_vm4, %v2111_v33, %v2114_v34  ;;  %v2133_v49 = vsel %vm2127_vm6, %v2120_v37, 920167782 }
 0x11c   : > { %v2136_v27 = vsel %vm2124_vm4, %v2114_v34, %v2117_v36  ;;  %v2130_v25 = vsel %vm2126_vm5, %v2114_v34, %v2129_v47  ;;  %v2134_v51 = vsel %vm2126_vm5, %v2117_v36, %v2133_v49  ;;  %v2137_v53 = vsel %vm2127_vm6, %v2123_v40, 1326507024 }
 0x11d   : > { %v2135_v59 = vsel %vm2125_vm7, %v2132_v48, %v2134_v51  ;;  %v2138_v61 = vsel %vm2126_vm5, %v2120_v37, %v2137_v53  ;;  %v2131_v1 = vsel %vm2125_vm7, %v2128_v45, %v2130_v25  ;;  %v547_v57 = vsub.s32 32, %v546_v0 }
 0x11e   : > { %v2139_v56 = vsel %vm2125_vm7, %v2136_v27, %v2138_v61  ;;  %v8254_v20 = vmul.u32.u64.low %v8237_v54, %v2135_v59  ;;  %v8255_v22 = vmul.u32.u64.high %v8237_v54, %v2135_v59, %v8254_v20  ;;  %v549_v28 = vshll.u32 %v12329_v58, %v546_v0  ;;  %v8267_v27 = vpop.f32.mrb[5].mxu1 }
 0x11f   : > { %v8259_v50 = vmul.u32.u64.low %v8237_v54, %v2139_v56  ;;  %v8260_v26 = vmul.u32.u64.high %v8237_v54, %v2139_v56, %v8259_v50  ;;  %v552_v51 = vshll.u32 %v12327_v60, %v546_v0  ;;  %v555_v31 = vshll.u32 %v12332_v63, %v546_v0  ;;  %v8389_v5 = vpop.f32.mrb[6].mxu1 }
 0x120   : > { %v558_v32 = vshll.u32 %v12335_v2, %v546_v0  ;;  %v561_v25 = vshll.u32 %v12325_v23, %v546_v0  ;;  %v2147_v33 = vmul.u32 %v8237_v54, %v2131_v1  ;;  %v550_v34 = vshrl.u32 %v12327_v60, %v547_v57 }
 0x121   : > { %v553_v36 = vshrl.u32 %v12332_v63, %v547_v57  ;;  %v556_v37 = vshrl.u32 %v12335_v2, %v547_v57  ;;  %v2150_v40 = vadd.s32 1, %v8255_v22  ;;  %v548_v45 = vshrl.u32 %v12329_v58, %v547_v57 }
 0x122   : > { %v559_v46 = vshrl.u32 %v12325_v23, %v547_v57  ;;  %v562_v47 = vshrl.u32 %v12323_v30, %v547_v57  ;;  %vm2149_vm9 = vc.u32 %v8260_v26, %v8254_v20  ;;  %v551_v48 = vor.u32 %v550_v34, %v549_v28 }
 0x123   : > { %v554_v49 = vor.u32 %v553_v36, %v552_v51  ;;  %vm564_vm10 = vcmp.lt.s32.totalorder %v545_v62, 1  ;;  %v2151_v54 = vsel %vm2149_vm9, %v2150_v40, %v8255_v22  ;;  %v557_v53 = vor.u32 %v556_v37, %v555_v31 }
 0x124   : > { %v560_v59 = vor.u32 %v559_v46, %v558_v32  ;;  %v563_v61 = vor.u32 %v562_v47, %v561_v25  ;;  %v2152_v0 = vadd.s32 %v2151_v54, %v2147_v33  ;;  %vm565_vm11 = vcmp.lt.s32.totalorder %v545_v62, 2 }
 0x125   : > { %vm566_vm12 = vcmp.lt.s32.totalorder %v545_v62, 3  ;;  %vm567_vm13 = vcmp.lt.s32.totalorder %v545_v62, 4  ;;  %v568_v1 = vsel %vm564_vm10, %v548_v45, %v551_v48  ;;  %v572_v50 = vsel %vm564_vm10, %v551_v48, %v554_v49 }
 0x126   : > { %v569_v56 = vsel %vm567_vm13, %v557_v53, 2102212464  ;;  %v573_v57 = vsel %vm567_vm13, %v560_v59, 920167782  ;;  %v2153_v30 = vadd.s32 536870912, %v2152_v0  ;;  %v576_v51 = vsel %vm564_vm10, %v554_v49, %v557_v53 }
 0x127   : > { %v570_v23 = vsel %vm566_vm12, %v554_v49, %v569_v56  ;;  %v574_v28 = vsel %vm566_vm12, %v557_v53, %v573_v57  ;;  %v577_v32 = vsel %vm567_vm13, %v563_v61, 1326507024  ;;  %v2208_v25 = vsel %vm2207_vm8, %v2206_v41, 0 }
 0x128   : > { %v571_v22 = vsel %vm565_vm11, %v568_v1, %v570_v23  ;;  %v575_v31 = vsel %vm565_vm11, %v572_v50, %v574_v28  ;;  %v8286_v33 = vshrl.u32 %v2153_v30, 30  ;;  %v578_v34 = vsel %vm566_vm12, %v560_v59, %v577_v32 }
 0x129   : > { %v8289_v36 = vmul.u32.u64.low %v8239_v55, %v575_v31  ;;  %v8290_v37 = vmul.u32.u64.high %v8239_v55, %v575_v31, %v8289_v36  ;;  %v579_v40 = vsel %vm565_vm11, %v576_v51, %v578_v34  ;;  %v2210_v45 = vand.u32 31, %v2208_v25 }
 0x12a   : > { %12555 = vst [vmem:[#allocation25_spill] sm:$0xff] %v8286_v33  ;;  %v8295_v46 = vmul.u32.u64.low %v8239_v55, %v579_v40  ;;  %v8296_v47 = vmul.u32.u64.high %v8239_v55, %v579_v40, %v8295_v46  ;;  %v587_v23 = vmul.u32 %v8239_v55, %v571_v22  ;;  %v12556_v48 = vand.u32 2147483647, %v8215_v29 }
 0x12b   : > { %v2211_v30 = vsub.s32 32, %v2210_v45  ;;  %v639_v49 = vand.u32 2139095040, %v8235_v52  ;;  %v2155_v54 = vshll.u32 %v8286_v33, 30  ;;  %v590_v53 = vadd.s32 1, %v8290_v37 }
 0x12c   : > { %v2203_v41 = vand.u32 8388607, %v12556_v48  ;;  %v8304_v59 = vshrl.u32 %v2208_v25, 5  ;;  %v2213_v62 = vshll.u32 %v12329_v58, %v2210_v45  ;;  %v2216_v1 = vshll.u32 %v12327_v60, %v2210_v45 }
 0x12d   : > { %v2214_v61 = vshrl.u32 %v12327_v60, %v2211_v30  ;;  %v2217_v55 = vshrl.u32 %v12332_v63, %v2211_v30  ;;  %v2220_v56 = vshrl.u32 %v12335_v2, %v2211_v30  ;;  %vm589_vm14 = vc.u32 %v8296_v47, %v8289_v36 }
 0x12e   : > { %v2219_v50 = vshll.u32 %v12332_v63, %v2210_v45  ;;  %v2222_v57 = vshll.u32 %v12335_v2, %v2210_v45  ;;  %v12557_v28 = vmov 920167782   ;;  %v591_v22 = vsel %vm589_vm14, %v590_v53, %v8290_v37 }
 0x12f   : > { %v2223_v51 = vshrl.u32 %v12557_v28, %v2211_v30  ;;  %v2215_v31 = vor.u32 %v2214_v61, %v2213_v62  ;;  %v2218_v32 = vor.u32 %v2217_v55, %v2216_v1  ;;  %v2225_v25 = vshll.u32 %v12557_v28, %v2210_v45 }
 0x130   : > { %v592_v34 = vadd.s32 %v591_v22, %v587_v23  ;;  %v2221_v40 = vor.u32 %v2220_v56, %v2219_v50  ;;  %v12558_v48 = vmov 1326507024   ;;  %v8320_v58 = vmul.f32 6.2831855, %v8205_v19 }
 0x131   : > { %v2224_v46 = vor.u32 %v2223_v51, %v2222_v57  ;;  %v2226_v60 = vshrl.u32 %v12558_v48, %v2211_v30  ;;  %v2204_v18 = vor.u32 8388608, %v2203_v41  ;;  %v640_v63 = vshrl.u32 %v639_v49, 23 }
 0x132   : > { %12559 = vst [vmem:[#allocation26_spill] sm:$0xff] %v8320_v58  ;;  %v593_v17 = vadd.s32 536870912, %v592_v34  ;;  %vm2228_vm15 = vcmp.lt.s32.totalorder %v8304_v59, 1  ;;  %vm2231_vm0 = vcmp.lt.s32.totalorder %v8304_v59, 4  ;;  %v8324_v37 = vsub.s32 %v2152_v0, %v2155_v54 }
 0x133   : > { %v2227_v2 = vor.u32 %v2226_v60, %v2225_v25  ;;  %vm2230_vm2 = vcmp.lt.s32.totalorder %v8304_v59, 3  ;;  %v2236_v45 = vsel %vm2228_vm15, %v2215_v31, %v2218_v32  ;;  %v2237_v23 = vsel %vm2231_vm0, %v2224_v46, 920167782 }
 0x134   : > { %v8331_v19 = vshrl.u32 %v593_v17, 30  ;;  %vm2229_vm3 = vcmp.lt.s32.totalorder %v8304_v59, 2  ;;  %v2238_v60 = vsel %vm2230_vm2, %v2221_v40, %v2237_v23  ;;  %v2240_v41 = vsel %vm2228_vm15, %v2218_v32, %v2221_v40 }
 0x135   : > { %v2239_v0 = vsel %vm2229_vm3, %v2236_v45, %v2238_v60  ;;  %v2241_v49 = vsel %vm2231_vm0, %v2227_v2, 1326507024  ;;  %v2244_v54 = vshll.u32 %v2204_v18, 8  ;;  %v7466_v53 = vadd.s32 4294967169, %v640_v63  ;;  %v8356_v63 = vpop.f32.mrb[6].mxu0 }
 0x136   : > { %12560 = vst [vmem:[#allocation27_spill] sm:$0xff] %v8331_v19  ;;  %v431_v62 = vand.u32 2139095040, %v8320_v58  ;;  %v2242_v17 = vsel %vm2230_vm2, %v2224_v46, %v2241_v49  ;;  %v2158_v61 = vsub.s32 0, %v8324_v37  ;;  %v595_v50 = vshll.u32 %v8331_v19, 30  ;;  %v8489_v6 = vpop.f32.mrb[7].mxu0 }
 0x137   : > { %v2243_v1 = vsel %vm2229_vm3, %v2240_v41, %v2242_v17  ;;  %v8348_v55 = vmul.u32.u64.low %v2244_v54, %v2239_v0  ;;  %v8349_v56 = vmul.u32.u64.high %v2244_v54, %v2239_v0, %v8348_v55  ;;  %v646_v18 = vadd.s32 1, %v7466_v53 }
 0x138   : > { %v8353_v57 = vmul.u32.u64.low %v2244_v54, %v2243_v1  ;;  %v8354_v2 = vmul.u32.u64.high %v2244_v54, %v2243_v1, %v8353_v57  ;;  %v432_v51 = vshrl.u32 %v431_v62, 23  ;;  %v2233_v22 = vsel %vm2231_vm0, %v2221_v40, 2102212464 }
 0x139   : > { %v7523_v25 = vmin.u32 %v2158_v61, %v8324_v37  ;;  %v12561_v46 = vmov 683565275   ;;  %vm647_vm4 = vcmp.gt.s32.totalorder %v646_v18, 0  ;;  %v8362_v23 = vsub.s32 %v592_v34, %v595_v50 }
 0x13a   : > { %v2212_v45 = vshrl.u32 %v12561_v46, %v2211_v30  ;;  %v648_v60 = vsel %vm647_vm4, %v646_v18, 0  ;;  %v2234_v0 = vsel %vm2230_vm2, %v2218_v32, %v2233_v22  ;;  %v7458_v53 = vadd.s32 4294967169, %v432_v51 }
 0x13b   : > { %v650_v49 = vand.u32 31, %v648_v60  ;;  %v12344_v62 = vand.u32 2147483647, %v8235_v52  ;;  %v2160_v17 = vclz %v7523_v25  ;;  %v2254_v40 = vadd.s32 1, %v8349_v56 }
 0x13c   : > { %v2232_v41 = vsel %vm2228_vm15, %v2212_v45, %v2215_v31  ;;  %v598_v30 = vsub.s32 0, %v8362_v23  ;;  %vm2253_vm5 = vc.u32 %v8354_v2, %v8348_v55  ;;  %v12562_v1 = vmov 2475754826  }
 0x13d   : > { %v651_v61 = vsub.s32 32, %v650_v49  ;;  %v2235_v34 = vsel %vm2229_vm3, %v2232_v41, %v2234_v0  ;;  %v653_v31 = vshll.u32 %v12561_v46, %v650_v49  ;;  %v656_v50 = vshll.u32 %v12562_v1, %v650_v49 }
 0x13e   : > { %v12563_v57 = vmov 2131351028   ;;  %v438_v51 = vadd.s32 1, %v7458_v53  ;;  %v643_v22 = vand.u32 8388607, %v12344_v62  ;;  %v7524_v41 = vadd.s32 4294967294, %v2160_v17 }
 0x13f   : > { %v654_v32 = vshrl.u32 %v12562_v1, %v651_v61  ;;  %v657_v18 = vshrl.u32 %v12563_v57, %v651_v61  ;;  %v12564_v25 = vmov 2102212464   ;;  %v663_v59 = vshrl.u32 %v12557_v28, %v651_v61 }
 0x140   : > { %v662_v45 = vshll.u32 %v12564_v25, %v650_v49  ;;  %v2255_v0 = vsel %vm2253_vm5, %v2254_v40, %v8349_v56  ;;  %v659_v16 = vshll.u32 %v12563_v57, %v650_v49  ;;  %v660_v15 = vshrl.u32 %v12564_v25, %v651_v61 }
 0x141   : > { %v7463_v14 = vmin.u32 %v598_v30, %v8362_v23  ;;  %v2251_v13 = vmul.u32 %v2244_v54, %v2235_v34  ;;  %v649_v12 = vshrl.u32 %v648_v60, 5  ;;  %v655_v11 = vor.u32 %v654_v32, %v653_v31 }
 0x142   : > { %v658_v53 = vor.u32 %v657_v18, %v656_v50  ;;  %v665_v10 = vshll.u32 %v12557_v28, %v650_v49  ;;  %vm439_vm6 = vcmp.gt.s32.totalorder %v438_v51, 0  ;;  %v664_v9 = vor.u32 %v663_v59, %v662_v45 }
 0x143   : > { %v2256_v62 = vadd.s32 %v2255_v0, %v2251_v13  ;;  %v666_v8 = vshrl.u32 %v12558_v48, %v651_v61  ;;  %vm7525_vm7 = vcmp.lt.s32.totalorder %v7524_v41, 0  ;;  %v644_v17 = vor.u32 8388608, %v643_v22 }
 0x144   : > { %v661_v56 = vor.u32 %v660_v15, %v659_v16  ;;  %v600_v40 = vclz %v7463_v14  ;;  %vm668_vm8 = vcmp.lt.s32.totalorder %v649_v12, 1  ;;  %v440_v30 = vsel %vm439_vm6, %v438_v51, 0 }
 0x145   : > { %v667_v7 = vor.u32 %v666_v8, %v665_v10  ;;  %vm671_vm9 = vcmp.lt.s32.totalorder %v649_v12, 4  ;;  %v676_v54 = vsel %vm668_vm8, %v655_v11, %v658_v53  ;;  %v2163_v60 = vsel %vm7525_vm7, 0, %v7524_v41 }
 0x146   : > { %v2257_v34 = vadd.s32 536870912, %v2256_v62  ;;  %vm670_vm10 = vcmp.lt.s32.totalorder %v649_v12, 3  ;;  %v677_v13 = vsel %vm671_vm9, %v664_v9, 920167782  ;;  %vm669_vm11 = vcmp.lt.s32.totalorder %v649_v12, 2 }
 0x147   : > { %v678_v49 = vsel %vm670_vm10, %v661_v56, %v677_v13  ;;  %v680_v31 = vsel %vm668_vm8, %v658_v53, %v661_v56  ;;  %v684_v15 = vshll.u32 %v644_v17, 8  ;;  %v7464_v14 = vadd.s32 4294967294, %v600_v40 }
 0x148   : > { %v679_v8 = vsel %vm669_vm11, %v676_v54, %v678_v49  ;;  %v681_v10 = vsel %vm671_vm9, %v667_v7, 1326507024  ;;  %v8398_v16 = vmul.f32 6.2831855, %v8224_v38  ;;  %v652_v32 = vshrl.u32 %v12561_v46, %v651_v61 }
 0x149   : > { %v682_v50 = vsel %vm670_vm10, %v664_v9, %v681_v10  ;;  %v8402_v18 = vmul.u32.u64.low %v684_v15, %v679_v8  ;;  %v8403_v51 = vmul.u32.u64.high %v684_v15, %v679_v8, %v8402_v18  ;;  %v2168_v22 = vsub.s32 4294967266, %v2163_v60 }
 0x14a   : > { %12565 = vst [vmem:[#allocation28_spill] sm:$0xff] %v8398_v16  ;;  %v8406_v45 = vshrl.u32 %v2257_v34, 30  ;;  %v673_v59 = vsel %vm671_vm9, %v661_v56, 2102212464  ;;  %v683_v41 = vsel %vm669_vm11, %v680_v31, %v682_v50  ;;  %v743_v38 = vand.u32 2139095040, %v8398_v16 }
 0x14b   : > { %v8410_v0 = vmul.u32.u64.low %v684_v15, %v683_v41  ;;  %v8411_v7 = vmul.u32.u64.high %v684_v15, %v683_v41, %v8410_v0  ;;  %v8414_v17 = vand.u32 31, %v440_v30  ;;  %vm7465_vm12 = vcmp.lt.s32.totalorder %v7464_v14, 0 }
 0x14c   : > { %12566 = vst [vmem:[#allocation29_spill] sm:$0xff] %v8406_v45  ;;  %v672_v9 = vsel %vm668_vm8, %v652_v32, %v655_v11  ;;  %v674_v61 = vsel %vm670_vm10, %v658_v53, %v673_v59  ;;  %v2169_v40 = vadd.s32 127, %v2168_v22  ;;  %v2259_v54 = vshll.u32 %v8406_v45, 30 }
 0x14d   : > { %12567 = vst [vmem:[#allocation30_spill] sm:$0xff] %v8414_v17  ;;  %v694_v34 = vadd.s32 1, %v8403_v51  ;;  %v744_v56 = vshrl.u32 %v743_v38, 23  ;;  %v2164_v13 = vsub.s32 32, %v2163_v60  ;;  %v8420_v49 = vsel %vm7465_vm12, 0, %v7464_v14 }
 0x14e   : > { %v675_v31 = vsel %vm669_vm11, %v672_v9, %v674_v61  ;;  %vm693_vm13 = vc.u32 %v8411_v7, %v8402_v18  ;;  %v8426_v10 = vsub.s32 32, %v8414_v17  ;;  %v2148_v11 = vadd.s32 %v8254_v20, %v8260_v26 }
 0x14f   : > { %v7470_v8 = vadd.s32 4294967169, %v744_v56  ;;  %v2170_v53 = vshll.u32 %v2169_v40, 23  ;;  %v8430_v32 = vsub.s32 %v2256_v62, %v2259_v54  ;;  %v695_v50 = vsel %vm693_vm13, %v694_v34, %v8403_v51 }
 0x150   : > { %12568 = vst [vmem:[#allocation31_spill] sm:$0xff] %v8426_v10  ;;  %v608_v14 = vsub.s32 4294967266, %v8420_v49  ;;  %v691_v12 = vmul.u32 %v684_v15, %v675_v31  ;;  %v8435_v59 = vmul.f32 6.2831855, %v8226_v39  ;;  %v8437_v41 = vshrl.u32 %v440_v30, 5 }
 0x151   : > { %v750_v22 = vadd.s32 1, %v7470_v8  ;;  %v2166_v0 = vshrl.u32 %v2148_v11, %v2164_v13  ;;  %v8441_v38 = vshll.u32 %v12564_v25, %v8414_v17  ;;  %v8445_v20 = vshll.u32 %v12557_v28, %v8414_v17 }
 0x152   : > { %12569 = vst [vmem:[#allocation32_spill] sm:$0xff] %v8435_v59  ;;  %12570 = vst [vmem:[#allocation33_spill] sm:$0xff] %v8437_v41  ;;  %v8447_v26 = vadd.s32 %v695_v50, %v691_v12  ;;  %v8451_v15 = vshrl.u32 %v12557_v28, %v8426_v10  ;;  %v2165_v39 = vshll.u32 %v8324_v37, %v2163_v60  ;;  %v8454_v30 = vor.u32 4788187, %v2170_v53 }
 0x153   : > { %vm751_vm14 = vcmp.gt.s32.totalorder %v750_v22, 0  ;;  %v2262_v51 = vsub.s32 0, %v8430_v32  ;;  %v8459_v9 = vshrl.u32 %v12558_v48, %v8426_v10  ;;  %v609_v61 = vadd.s32 127, %v608_v14 }
 0x154   : > { %v752_v62 = vsel %vm751_vm14, %v750_v22, 0  ;;  %v2407_v54 = vand.u32 2139095040, %v8435_v59  ;;  %v2167_v34 = vor.u32 %v2166_v0, %v2165_v39  ;;  %v588_v56 = vadd.s32 %v8289_v36, %v8296_v47 }
 0x155   : > { %v754_v40 = vand.u32 31, %v752_v62  ;;  %v8465_v13 = vmul.f32 6.2831855, %v8219_v35  ;;  %v12354_v37 = vand.u32 2147483647, %v8398_v16  ;;  %v697_v60 = vadd.s32 536870912, %v8447_v26 }
 0x156   : > { %v2172_v53 = vand.u32 2147483647, %v8454_v30  ;;  %v604_v50 = vsub.s32 32, %v8420_v49  ;;  %v7527_v22 = vmin.u32 %v2262_v51, %v8430_v32  ;;  %v610_v35 = vshll.u32 %v609_v61, 23 }
 0x157   : > { %12571 = vst [vmem:[#allocation34_spill] sm:$0xff] %v8465_v13  ;;  %v8469_v31 = vsub.s32 32, %v754_v40  ;;  %v757_v8 = vshll.u32 %v12561_v46, %v754_v40  ;;  %v760_v11 = vshll.u32 %v12562_v1, %v754_v40  ;;  %v763_v36 = vshll.u32 %v12563_v57, %v754_v40 }
 0x158   : > { %v2408_v12 = vshrl.u32 %v2407_v54, 23  ;;  %v605_v0 = vshll.u32 %v8362_v23, %v8420_v49  ;;  %v747_v39 = vand.u32 8388607, %v12354_v37  ;;  %v8485_v30 = vshrl.u32 %v752_v62, 5 }
 0x159   : > { %v758_v47 = vshrl.u32 %v12562_v1, %v8469_v31  ;;  %v761_v14 = vshrl.u32 %v12563_v57, %v8469_v31  ;;  %v764_v51 = vshrl.u32 %v12564_v25, %v8469_v31  ;;  %v8491_v61 = vshrl.u32 %v697_v60, 30 }
 0x15a   : > { %v766_v54 = vshll.u32 %v12564_v25, %v754_v40  ;;  %v2264_v45 = vclz %v7527_v22  ;;  %v767_v49 = vshrl.u32 %v12557_v28, %v8469_v31  ;;  %v769_v62 = vshll.u32 %v12557_v28, %v754_v40 }
 0x15b   : > { %12572 = vst [vmem:[#allocation35_spill] sm:$0xff] %v8491_v61  ;;  %v8493_v4 = vor.u32 %v758_v47, %v757_v8  ;;  %v8495_v3 = vor.u32 %v761_v14, %v760_v11  ;;  %v765_v23 = vor.u32 %v764_v51, %v763_v36  ;;  %v606_v37 = vshrl.u32 %v588_v56, %v604_v50 }
 0x15c   : > { %v611_v19 = vor.u32 4788187, %v610_v35  ;;  %v770_v33 = vshrl.u32 %v12558_v48, %v8469_v31  ;;  %v7534_v60 = vadd.s32 4294967169, %v2408_v12  ;;  %v2303_v8 = vand.u32 2139095040, %v8465_v13 }
 0x15d   : > { %v748_v47 = vor.u32 8388608, %v747_v39  ;;  %v768_v11 = vor.u32 %v767_v49, %v766_v54  ;;  %vm772_vm15 = vcmp.lt.s32.totalorder %v8485_v30, 1  ;;  %v699_v22 = vshll.u32 %v8491_v61, 30 }
 0x15e   : > { %v771_v36 = vor.u32 %v770_v33, %v769_v62  ;;  %vm775_vm0 = vcmp.lt.s32.totalorder %v8485_v30, 4  ;;  %v780_v40 = vsel %vm772_vm15, %v8493_v4, %v8495_v3  ;;  %v7528_v56 = vadd.s32 4294967294, %v2264_v45 }
 0x15f   : > { %vm774_vm2 = vcmp.lt.s32.totalorder %v8485_v30, 3  ;;  %v781_v50 = vsel %vm775_vm0, %v768_v11, 920167782  ;;  %v784_v35 = vsel %vm772_vm15, %v8495_v3, %v765_v23  ;;  %vm773_vm3 = vcmp.lt.s32.totalorder %v8485_v30, 2 }
 0x160   : > { %v782_v33 = vsel %vm774_vm2, %v765_v23, %v781_v50  ;;  %v785_v14 = vsel %vm775_vm0, %v771_v36, 1326507024  ;;  %v2414_v12 = vadd.s32 1, %v7534_v60  ;;  %v2174_v39 = vcvt.s32.f32 %v2167_v34 }
 0x161   : > { %v607_v45 = vor.u32 %v606_v37, %v605_v0  ;;  %v783_v51 = vsel %vm773_vm3, %v780_v40, %v782_v33  ;;  %v786_v54 = vsel %vm774_vm2, %v768_v11, %v785_v14  ;;  %v8527_v49 = vsub.s32 %v8447_v26, %v699_v22 }
 0x162   : > { %v2304_v62 = vshrl.u32 %v2303_v8, 23  ;;  %v787_v61 = vsel %vm773_vm3, %v784_v35, %v786_v54  ;;  %v8531_v50 = vshll.u32 %v748_v47, 8  ;;  %v2175_v13 = vmul.f32 %v2174_v39, %v2172_v53 }
 0x163   : > { %v612_v36 = vand.u32 2147483647, %v611_v19  ;;  %vm7529_vm4 = vcmp.lt.s32.totalorder %v7528_v56, 0  ;;  %vm2415_vm5 = vcmp.gt.s32.totalorder %v2414_v12, 0  ;;  %v8535_v34 = vor.u32 %v8451_v15, %v8441_v38 }
 0x164   : > { %v8538_v37 = vmul.u32.u64.low %v8531_v50, %v783_v51  ;;  %v8539_v0 = vmul.u32.u64.high %v8531_v50, %v783_v51, %v8538_v37  ;;  %v2416_v26 = vsel %vm2415_vm5, %v2414_v12, 0  ;;  %v614_v60 = vcvt.s32.f32 %v607_v45 }
 0x165   : > { %12573 = vst [vmem:[#allocation36_spill] sm:$0xff] %v8535_v34  ;;  %v8543_v8 = vmul.u32.u64.low %v8531_v50, %v787_v61  ;;  %v8544_v11 = vmul.u32.u64.high %v8531_v50, %v787_v61, %v8543_v8  ;;  %v2418_v47 = vand.u32 31, %v2416_v26  ;;  %v459_v19 = vor.u32 %v8459_v9, %v8445_v20 }
 0x166   : > { %v2267_v53 = vsel %vm7529_vm4, 0, %v7528_v56  ;;  %v702_v22 = vsub.s32 0, %v8527_v49  ;;  %v7530_v38 = vadd.s32 4294967169, %v2304_v62  ;;  %v2176_v15 = vxor.u32 2147483648, %v2175_v13 }
 0x167   : > { %v8549_v40 = vmul.f32 %v614_v60, %v612_v36  ;;  %v756_v35 = vshrl.u32 %v12561_v46, %v8469_v31  ;;  %vm463_vm6 = vcmp.lt.s32.totalorder %v8437_v41, 4  ;;  %vm2094_vm7 = vcmp.lt.s32.totalorder %v8207_v21, 0 }
 0x168   : > { %v777_v61 = vsel %vm775_vm0, %v765_v23, 2102212464  ;;  %v8560_v20 = vsel %vm463_vm6, %v8535_v34, 920167782  ;;  %v2268_v9 = vsub.s32 32, %v2267_v53  ;;  %v2272_v56 = vsub.s32 4294967266, %v2267_v53 }
 0x169   : > { %12574 = vst [vmem:[#allocation37_spill] sm:$0xff] %v8560_v20  ;;  %v8562_v33 = vsub.s32 32, %v2418_v47  ;;  %v8566_v14 = vsel %vm463_vm6, %v459_v19, 1326507024  ;;  %v2252_v31 = vadd.s32 %v8348_v55, %v8354_v2  ;;  %v7467_v12 = vmin.u32 %v702_v22, %v8527_v49  ;;  %v8571_v23 = vpop.f32.mrb[7].mxu1 }
 0x16a   : > { %12575 = vst [vmem:[#allocation38_spill] sm:$0xff] %v8566_v14  ;;  %v2310_v39 = vadd.s32 1, %v7530_v38  ;;  %v8575_v45 = vsel %vm2094_vm7, %v2176_v15, %v2175_v13  ;;  %v776_v54 = vsel %vm772_vm15, %v756_v35, %v8493_v4  ;;  %v778_v62 = vsel %vm774_vm2, %v8495_v3, %v777_v61 }
 0x16b   : > { %12576 = vst [vmem:[#allocation39_spill] sm:$0xff] %v8575_v45  ;;  %v2269_v55 = vshll.u32 %v8430_v32, %v2267_v53  ;;  %v8587_v2 = vadd.s32 %v8402_v18, %v8411_v7  ;;  %v798_v36 = vadd.s32 1, %v8539_v0  ;;  %v12363_v13 = vand.u32 2147483647, %v8435_v59 }
 0x16c   : > { %v2270_v60 = vshrl.u32 %v2252_v31, %v2268_v9  ;;  %v2273_v8 = vadd.s32 127, %v2272_v56  ;;  %vm797_vm8 = vc.u32 %v8544_v11, %v8538_v37  ;;  %v2431_v4 = vshrl.u32 %v12557_v28, %v8562_v33 }
 0x16d   : > { %v704_v19 = vclz %v7467_v12  ;;  %vm2311_vm9 = vcmp.gt.s32.totalorder %v2310_v39, 0  ;;  %v779_v3 = vsel %vm773_vm3, %v776_v54, %v778_v62  ;;  %v2434_v18 = vshrl.u32 %v12558_v48, %v8562_v33 }
 0x16e   : > { %v8599_v7 = vshrl.u32 %v2416_v26, 5  ;;  %v2422_v32 = vshrl.u32 %v12562_v1, %v8562_v33  ;;  %v2430_v53 = vshll.u32 %v12564_v25, %v2418_v47  ;;  %v8605_v22 = vmul.f32 6.2831855, %v8228_v42 }
 0x16f   : > { %v799_v38 = vsel %vm797_vm8, %v798_v36, %v8539_v0  ;;  %v2425_v15 = vshrl.u32 %v12563_v57, %v8562_v33  ;;  %v2428_v30 = vshrl.u32 %v12564_v25, %v8562_v33  ;;  %v2433_v35 = vshll.u32 %v12557_v28, %v2418_v47 }
 0x170   : > { %12577 = vst [vmem:[#allocation40_spill] sm:$0xff] %v8605_v22  ;;  %v2312_v26 = vsel %vm2311_vm9, %v2310_v39, 0  ;;  %v795_v61 = vmul.u32 %v8531_v50, %v779_v3  ;;  %v2421_v9 = vshll.u32 %v12561_v46, %v2418_v47  ;;  %v2432_v56 = vor.u32 %v2431_v4, %v2430_v53 }
 0x171   : > { %v7468_v31 = vadd.s32 4294967294, %v704_v19  ;;  %v2424_v42 = vshll.u32 %v12562_v1, %v2418_v47  ;;  %v2427_v12 = vshll.u32 %v12563_v57, %v2418_v47  ;;  %v2435_v0 = vor.u32 %v2434_v18, %v2433_v35 }
 0x172   : > { %v2274_v54 = vshll.u32 %v2273_v8, 23  ;;  %v8617_v62 = vadd.s32 %v799_v38, %v795_v61  ;;  %v2411_v36 = vand.u32 8388607, %v12363_v13  ;;  %v2423_v51 = vor.u32 %v2422_v32, %v2421_v9 }
 0x173   : > { %v2426_v45 = vor.u32 %v2425_v15, %v2424_v42  ;;  %v2429_v39 = vor.u32 %v2428_v30, %v2427_v12  ;;  %vm2439_vm10 = vcmp.lt.s32.totalorder %v8599_v7, 4  ;;  %v847_v50 = vand.u32 2139095040, %v8605_v22 }
 0x174   : > { %v8623_v4 = vor.u32 %v2270_v60, %v2269_v55  ;;  %v8625_v19 = vshrl.u32 %v2312_v26, 5  ;;  %v8627_v3 = vand.u32 31, %v2312_v26  ;;  %v2445_v47 = vsel %vm2439_vm10, %v2432_v56, 920167782 }
 0x175   : > { %vm7469_vm11 = vcmp.lt.s32.totalorder %v7468_v31, 0  ;;  %v2449_v8 = vsel %vm2439_vm10, %v2435_v0, 1326507024  ;;  %v848_v18 = vshrl.u32 %v847_v50, 23  ;;  %v8634_v32 = vmul.f32 6.2831855, %v8230_v43 }
 0x176   : > { %12578 = vst [vmem:[#allocation41_spill] sm:$0xff] %v8625_v19  ;;  %12579 = vst [vmem:[#allocation42_spill] sm:$0xff] %v8627_v3  ;;  %v8636_v53 = vor.u32 4788187, %v2274_v54  ;;  %v801_v55 = vadd.s32 536870912, %v8617_v62  ;;  %vm2436_vm12 = vcmp.lt.s32.totalorder %v8599_v7, 1 }
 0x177   : > { %12580 = vst [vmem:[#allocation43_spill] sm:$0xff] %v8634_v32  ;;  %vm2438_vm13 = vcmp.lt.s32.totalorder %v8599_v7, 3  ;;  %v2412_v60 = vor.u32 8388608, %v2411_v36  ;;  %v2444_v38 = vsel %vm2436_vm12, %v2423_v51, %v2426_v45  ;;  %v7474_v30 = vadd.s32 4294967169, %v848_v18 }
 0x178   : > { %v2446_v15 = vsel %vm2438_vm13, %v2429_v39, %v2445_v47  ;;  %v8646_v43 = vsel %vm7469_vm11, 0, %v7468_v31  ;;  %v2448_v26 = vsel %vm2436_vm12, %v2426_v45, %v2429_v39  ;;  %v2450_v61 = vsel %vm2438_vm13, %v2432_v56, %v2449_v8 }
 0x179   : > { %vm2437_vm14 = vcmp.lt.s32.totalorder %v8599_v7, 2  ;;  %v2441_v9 = vsel %vm2439_vm10, %v2429_v39, 2102212464  ;;  %v854_v42 = vadd.s32 1, %v7474_v30  ;;  %v2511_v12 = vand.u32 2139095040, %v8634_v32 }
 0x17a   : > { %v8657_v0 = vsub.s32 32, %v8627_v3  ;;  %v8659_v54 = vshrl.u32 %v801_v55, 30  ;;  %v2420_v31 = vshrl.u32 %v12561_v46, %v8562_v33  ;;  %v2447_v36 = vsel %vm2437_vm14, %v2444_v38, %v2446_v15 }
 0x17b   : > { %v2451_v56 = vsel %vm2437_vm14, %v2448_v26, %v2450_v61  ;;  %v8667_v50 = vshll.u32 %v2412_v60, 8  ;;  %v12371_v39 = vand.u32 2147483647, %v8605_v22  ;;  %vm855_vm15 = vcmp.gt.s32.totalorder %v854_v42, 0 }
 0x17c   : > { %12581 = vst [vmem:[#allocation44_spill] sm:$0xff] %v8657_v0  ;;  %12582 = vst [vmem:[#allocation45_spill] sm:$0xff] %v8659_v54  ;;  %v708_v47 = vsub.s32 32, %v8646_v43  ;;  %v2440_v8 = vsel %vm2436_vm12, %v2420_v31, %v2423_v51  ;;  %v2442_v18 = vsel %vm2438_vm13, %v2426_v45, %v2441_v9  ;;  %v856_v33 = vsel %vm855_vm15, %v854_v42, 0  ;;  %v8686_v51 = vpop.f32.mrb[8].mxu0 }
 0x17d   : > { %v712_v55 = vsub.s32 4294967266, %v8646_v43  ;;  %v8677_v38 = vmul.u32.u64.low %v8667_v50, %v2447_v36  ;;  %v8678_v15 = vmul.u32.u64.high %v8667_v50, %v2447_v36, %v8677_v38  ;;  %v2512_v60 = vshrl.u32 %v2511_v12, 23  ;;  %12583 = vst [vmem:[#allocation46_spill] sm:$0xff] %v8686_v51 }
 0x17e   : > { %v803_v30 = vshll.u32 %v8659_v54, 30  ;;  %v8683_v26 = vmul.u32.u64.low %v8667_v50, %v2451_v56  ;;  %v8684_v61 = vmul.u32.u64.high %v8667_v50, %v2451_v56, %v8683_v26  ;;  %v858_v13 = vand.u32 31, %v856_v33 }
 0x17f   : > { %v8690_v45 = vshll.u32 %v12564_v25, %v8627_v3  ;;  %v8694_v9 = vshll.u32 %v12557_v28, %v8627_v3  ;;  %v2443_v42 = vsel %vm2437_vm14, %v2440_v8, %v2442_v18  ;;  %v851_v12 = vand.u32 8388607, %v12371_v39 }
 0x180   : > { %v8700_v31 = vshrl.u32 %v856_v33, 5  ;;  %v859_v36 = vsub.s32 32, %v858_v13  ;;  %v861_v56 = vshll.u32 %v12561_v46, %v858_v13  ;;  %v864_v26 = vshll.u32 %v12562_v1, %v858_v13 }
 0x181   : > { %v710_v35 = vshrl.u32 %v8587_v2, %v708_v47  ;;  %v867_v54 = vshll.u32 %v12563_v57, %v858_v13  ;;  %v870_v21 = vshll.u32 %v12564_v25, %v858_v13  ;;  %v7538_v3 = vadd.s32 4294967169, %v2512_v60 }
 0x182   : > { %v8707_v34 = vadd.s32 127, %v712_v55  ;;  %v8710_v7 = vsub.s32 %v8617_v62, %v803_v30  ;;  %v862_v8 = vshrl.u32 %v12562_v1, %v859_v36  ;;  %v865_v18 = vshrl.u32 %v12563_v57, %v859_v36 }
 0x183   : > { %v2459_v33 = vmul.u32 %v8667_v50, %v2443_v42  ;;  %v852_v39 = vor.u32 8388608, %v851_v12  ;;  %v868_v14 = vshrl.u32 %v12564_v25, %v859_v36  ;;  %v871_v2 = vshrl.u32 %v12557_v28, %v859_v36 }
 0x184   : > { %v863_v47 = vor.u32 %v862_v8, %v861_v56  ;;  %v866_v20 = vor.u32 %v865_v18, %v864_v26  ;;  %v873_v60 = vshll.u32 %v12557_v28, %v858_v13  ;;  %vm876_vm0 = vcmp.lt.s32.totalorder %v8700_v31, 1 }
 0x185   : > { %v869_v55 = vor.u32 %v868_v14, %v867_v54  ;;  %v872_v62 = vor.u32 %v871_v2, %v870_v21  ;;  %v874_v30 = vshrl.u32 %v12558_v48, %v859_v36  ;;  %v2518_v41 = vadd.s32 1, %v7538_v3 }
 0x186   : > { %vm2461_vm2 = vc.u32 %v8684_v61, %v8677_v38  ;;  %v2462_v50 = vadd.s32 1, %v8678_v15  ;;  %vm878_vm3 = vcmp.lt.s32.totalorder %v8700_v31, 3  ;;  %vm879_vm4 = vcmp.lt.s32.totalorder %v8700_v31, 4 }
 0x187   : > { %v875_v42 = vor.u32 %v874_v30, %v873_v60  ;;  %vm877_vm5 = vcmp.lt.s32.totalorder %v8700_v31, 2  ;;  %v884_v13 = vsel %vm876_vm0, %v863_v47, %v866_v20  ;;  %v8728_v14 = vshll.u32 %v852_v39, 8 }
 0x188   : > { %v806_v21 = vsub.s32 0, %v8710_v7  ;;  %v885_v3 = vsel %vm879_vm4, %v872_v62, 920167782  ;;  %v888_v54 = vsel %vm876_vm0, %v866_v20, %v869_v55  ;;  %v12374_v12 = vand.u32 2147483647, %v8634_v32 }
 0x189   : > { %v886_v56 = vsel %vm878_vm3, %v869_v55, %v885_v3  ;;  %v889_v26 = vsel %vm879_vm4, %v875_v42, 1326507024  ;;  %vm2519_vm8 = vcmp.gt.s32.totalorder %v2518_v41, 0  ;;  %v8741_v39 = vmul.f32 6.2831855, %v8232_v44 }
 0x18a   : > { %v2463_v8 = vsel %vm2461_vm2, %v2462_v50, %v8678_v15  ;;  %v860_v18 = vshrl.u32 %v12561_v46, %v859_v36  ;;  %v887_v2 = vsel %vm877_vm5, %v884_v13, %v886_v56  ;;  %v890_v60 = vsel %vm878_vm3, %v872_v62, %v889_v26 }
 0x18b   : > { %12584 = vst [vmem:[#allocation47_spill] sm:$0xff] %v8741_v39  ;;  %v881_v30 = vsel %vm879_vm4, %v869_v55, 2102212464  ;;  %v891_v44 = vsel %vm877_vm5, %v888_v54, %v890_v60  ;;  %v8757_v42 = vmul.u32.u64.low %v8728_v14, %v887_v2  ;;  %v8758_v3 = vmul.u32.u64.high %v8728_v14, %v887_v2, %v8757_v42 }
 0x18c   : > { %v7471_v15 = vmin.u32 %v806_v21, %v8710_v7  ;;  %v8763_v36 = vmul.u32.u64.low %v8728_v14, %v891_v44  ;;  %v8764_v50 = vmul.u32.u64.high %v8728_v14, %v891_v44, %v8763_v36  ;;  %v2520_v13 = vsel %vm2519_vm8, %v2518_v41, 0 }
 0x18d   : > { %v2276_v62 = vand.u32 2147483647, %v8636_v53  ;;  %v709_v55 = vshll.u32 %v8527_v49, %v8646_v43  ;;  %v2327_v54 = vshrl.u32 %v12557_v28, %v8657_v0  ;;  %v2522_v56 = vand.u32 31, %v2520_v13 }
 0x18e   : > { %v8771_v26 = vadd.s32 %v2463_v8, %v2459_v33  ;;  %v880_v2 = vsel %vm876_vm0, %v860_v18, %v863_v47  ;;  %v882_v21 = vsel %vm878_vm3, %v866_v20, %v881_v30  ;;  %v2515_v41 = vand.u32 8388607, %v12374_v12 }
 0x18f   : > { %v8779_v60 = vor.u32 %v710_v35, %v709_v55  ;;  %v8783_v49 = vshrl.u32 %v12558_v48, %v8657_v0  ;;  %v2523_v53 = vsub.s32 32, %v2522_v56  ;;  %v951_v43 = vand.u32 2139095040, %v8741_v39 }
 0x190   : > { %v714_v33 = vshll.u32 %v8707_v34, 23  ;;  %v808_v8 = vclz %v7471_v15  ;;  %v2525_v47 = vshll.u32 %v12561_v46, %v2522_v56  ;;  %v2528_v18 = vshll.u32 %v12562_v1, %v2522_v56  ;;  %v8798_v15 = vpop.f32.mrb[8].mxu1 }
 0x191   : > { %v883_v20 = vsel %vm877_vm5, %v880_v2, %v882_v21  ;;  %v8791_v30 = vshrl.u32 %v2520_v13, 5  ;;  %v2526_v35 = vshrl.u32 %v12562_v1, %v2523_v53  ;;  %v2529_v44 = vshrl.u32 %v12563_v57, %v2523_v53  ;;  %12585 = vst [vmem:[#allocation48_spill] sm:$0xff] %v8798_v15 }
 0x192   : > { %v2465_v36 = vadd.s32 536870912, %v8771_v26  ;;  %v902_v55 = vadd.s32 1, %v8758_v3  ;;  %v2516_v12 = vor.u32 8388608, %v2515_v41  ;;  %v2531_v34 = vshll.u32 %v12563_v57, %v2522_v56 }
 0x193   : > { %vm901_vm9 = vc.u32 %v8764_v50, %v8757_v42  ;;  %v2532_v31 = vshrl.u32 %v12564_v25, %v2523_v53  ;;  %v2534_v13 = vshll.u32 %v12564_v25, %v2522_v56  ;;  %v952_v2 = vshrl.u32 %v951_v43, 23 }
 0x194   : > { %v899_v21 = vmul.u32 %v8728_v14, %v883_v20  ;;  %v2527_v0 = vor.u32 %v2526_v35, %v2525_v47  ;;  %v2530_v10 = vor.u32 %v2529_v44, %v2528_v18  ;;  %v2535_v17 = vshrl.u32 %v12557_v28, %v2523_v53 }
 0x195   : > { %v2533_v58 = vor.u32 %v2532_v31, %v2531_v34  ;;  %v2537_v41 = vshll.u32 %v12557_v28, %v2522_v56  ;;  %v2538_v32 = vshrl.u32 %v12558_v48, %v2523_v53  ;;  %vm2540_vm10 = vcmp.lt.s32.totalorder %v8791_v30, 1 }
 0x196   : > { %v715_v22 = vor.u32 4788187, %v714_v33  ;;  %v8809_v59 = vshrl.u32 %v2465_v36, 30  ;;  %v903_v15 = vsel %vm901_vm9, %v902_v55, %v8758_v3  ;;  %v2536_v51 = vor.u32 %v2535_v17, %v2534_v13 }
 0x197   : > { %v2539_v43 = vor.u32 %v2538_v32, %v2537_v41  ;;  %vm2542_vm11 = vcmp.lt.s32.totalorder %v8791_v30, 3  ;;  %vm2543_vm12 = vcmp.lt.s32.totalorder %v8791_v30, 4  ;;  %v7478_v14 = vadd.s32 4294967169, %v952_v2 }
 0x198   : > { %12586 = vst [vmem:[#allocation49_spill] sm:$0xff] %v8809_v59  ;;  %v7472_v47 = vadd.s32 4294967294, %v808_v8  ;;  %vm2541_vm13 = vcmp.lt.s32.totalorder %v8791_v30, 2  ;;  %v2548_v56 = vsel %vm2540_vm10, %v2527_v0, %v2530_v10  ;;  %v8817_v18 = vshll.u32 %v2516_v12, 8 }
 0x199   : > { %v8819_v33 = vadd.s32 %v903_v15, %v899_v21  ;;  %v2549_v3 = vsel %vm2543_vm12, %v2536_v51, 920167782  ;;  %v2552_v17 = vsel %vm2540_vm10, %v2530_v10, %v2533_v58  ;;  %v2553_v32 = vsel %vm2543_vm12, %v2539_v43, 1326507024 }
 0x19a   : > { %v12587_v8 = vcvt.s32.f32 %v8623_v4  ;;  %v718_v35 = vcvt.s32.f32 %v8779_v60  ;;  %v8833_v12 = vor.u32 %v2327_v54, %v8690_v45  ;;  %v2550_v44 = vsel %vm2542_vm11, %v2533_v58, %v2549_v3 }
 0x19b   : > { %v2467_v36 = vshll.u32 %v8809_v59, 30  ;;  %v2551_v55 = vsel %vm2541_vm13, %v2548_v56, %v2550_v44  ;;  %v2554_v34 = vsel %vm2542_vm11, %v2536_v51, %v2553_v32  ;;  %v958_v15 = vadd.s32 1, %v7478_v14 }
 0x19c   : > { %v8829_v20 = vmul.f32 %v12587_v8, %v2276_v62  ;;  %12588 = vst [vmem:[#allocation50_spill] sm:$0xff] %v8833_v12  ;;  %v716_v4 = vand.u32 2147483647, %v715_v22  ;;  %vm7473_vm14 = vcmp.lt.s32.totalorder %v7472_v47, 0  ;;  %v2555_v62 = vsel %vm2541_vm13, %v2552_v17, %v2554_v34 }
 0x19d   : > { %v12389_v45 = vand.u32 2147483647, %v8741_v39  ;;  %v905_v54 = vadd.s32 536870912, %v8819_v33  ;;  %v2524_v60 = vshrl.u32 %v12561_v46, %v2523_v53  ;;  %v2545_v51 = vsel %vm2543_vm12, %v2533_v58, 2102212464 }
 0x19e   : > { %v8848_v31 = vmul.u32.u64.low %v8817_v18, %v2551_v55  ;;  %v8849_v13 = vmul.u32.u64.high %v8817_v18, %v2551_v55, %v8848_v31  ;;  %v8855_v22 = vmul.u32.u64.low %v8817_v18, %v2555_v62  ;;  %v8856_v2 = vmul.u32.u64.high %v8817_v18, %v2555_v62, %v8855_v22 }
 0x19f   : > { %vm959_vm15 = vcmp.gt.s32.totalorder %v958_v15, 0  ;;  %v8860_v41 = vsel %vm7473_vm14, 0, %v7472_v47  ;;  %v8863_v53 = vsub.s32 %v8771_v26, %v2467_v36  ;;  %v8866_v56 = vmul.f32 %v718_v35, %v716_v4 }
 0x1a0   : > { %v960_v43 = vsel %vm959_vm15, %v958_v15, 0  ;;  %v796_v58 = vadd.s32 %v8538_v37, %v8544_v11  ;;  %v2544_v17 = vsel %vm2540_vm10, %v2524_v60, %v2527_v0  ;;  %v2546_v32 = vsel %vm2542_vm11, %v2530_v10, %v2545_v51  ;;  %v8897_v51 = vpop.f32.mrb[9].mxu0 }
 0x1a1   : > { %v962_v3 = vand.u32 31, %v960_v43  ;;  %v955_v47 = vand.u32 8388607, %v12389_v45  ;;  %v8877_v26 = vmul.f32 6.2831855, %v8267_v27  ;;  %v812_v8 = vsub.s32 32, %v8860_v41 }
 0x1a2   : > { %v816_v35 = vsub.s32 4294967266, %v8860_v41  ;;  %v8881_v44 = vshrl.u32 %v905_v54, 30  ;;  %v2470_v11 = vsub.s32 0, %v8863_v53  ;;  %v2547_v55 = vsel %vm2541_vm13, %v2544_v17, %v2546_v32  ;;  %12591 = vst [vmem:[#allocation53_spill] sm:$0xff] %v8897_v51 }
 0x1a3   : > { %12589 = vst [vmem:[#allocation51_spill] sm:$0xff] %v8877_v26  ;;  %v963_v37 = vsub.s32 32, %v962_v3  ;;  %v965_v0 = vshll.u32 %v12561_v46, %v962_v3  ;;  %v968_v36 = vshll.u32 %v12562_v1, %v962_v3  ;;  %v974_v10 = vshll.u32 %v12564_v25, %v962_v3 }
 0x1a4   : > { %12590 = vst [vmem:[#allocation52_spill] sm:$0xff] %v8881_v44  ;;  %v2566_v27 = vadd.s32 1, %v8849_v13  ;;  %v8890_v34 = vshrl.u32 %v960_v43, 5  ;;  %v971_v62 = vshll.u32 %v12563_v57, %v962_v3  ;;  %v817_v22 = vadd.s32 127, %v816_v35 }
 0x1a5   : > { %v966_v15 = vshrl.u32 %v12562_v1, %v963_v37  ;;  %v969_v4 = vshrl.u32 %v12563_v57, %v963_v37  ;;  %v972_v54 = vshrl.u32 %v12564_v25, %v963_v37  ;;  %v975_v60 = vshrl.u32 %v12557_v28, %v963_v37 }
 0x1a6   : > { %v907_v30 = vshll.u32 %v8881_v44, 30  ;;  %vm2565_vm0 = vc.u32 %v8856_v2, %v8848_v31  ;;  %v977_v43 = vshll.u32 %v12557_v28, %v962_v3  ;;  %v956_v17 = vor.u32 8388608, %v955_v47 }
 0x1a7   : > { %v967_v32 = vor.u32 %v966_v15, %v965_v0  ;;  %v970_v45 = vor.u32 %v969_v4, %v968_v36  ;;  %v976_v14 = vor.u32 %v975_v60, %v974_v10  ;;  %v7535_v21 = vmin.u32 %v2470_v11, %v8863_v53 }
 0x1a8   : > { %v2563_v59 = vmul.u32 %v8817_v18, %v2547_v55  ;;  %v978_v39 = vshrl.u32 %v12558_v48, %v963_v37  ;;  %v2615_v51 = vand.u32 2139095040, %v8877_v26  ;;  %vm534_vm2 = vcmp.lt.s32.totalorder %v8209_v24, 0 }
 0x1a9   : > { %vm2335_vm3 = vcmp.lt.s32.totalorder %v8625_v19, 4  ;;  %v2567_v35 = vsel %vm2565_vm0, %v2566_v27, %v8849_v13  ;;  %v973_v44 = vor.u32 %v972_v54, %v971_v62  ;;  %vm980_vm4 = vcmp.lt.s32.totalorder %v8890_v34, 1 }
 0x1aa   : > { %vm983_vm5 = vcmp.lt.s32.totalorder %v8890_v34, 4  ;;  %v818_v3 = vshll.u32 %v817_v22, 23  ;;  %v8913_v47 = vsub.s32 %v8819_v33, %v907_v30  ;;  %v979_v18 = vor.u32 %v978_v39, %v977_v43 }
 0x1ab   : > { %vm982_vm8 = vcmp.lt.s32.totalorder %v8890_v34, 3  ;;  %vm2198_vm9 = vcmp.lt.s32.totalorder %v8215_v29, 0  ;;  %vm981_vm10 = vcmp.lt.s32.totalorder %v8890_v34, 2  ;;  %v988_v11 = vsel %vm980_vm4, %v967_v32, %v970_v45 }
 0x1ac   : > { %v989_v13 = vsel %vm983_vm5, %v976_v14, 920167782  ;;  %v8922_v0 = vshll.u32 %v956_v17, 8  ;;  %vm638_vm11 = vcmp.lt.s32.totalorder %v8235_v52, 0  ;;  %v813_v33 = vshll.u32 %v8710_v7, %v8860_v41 }
 0x1ad   : > { %v814_v39 = vshrl.u32 %v796_v58, %v812_v8  ;;  %v2472_v36 = vclz %v7535_v21  ;;  %v8927_v10 = vadd.s32 %v2567_v35, %v2563_v59  ;;  %v990_v55 = vsel %vm982_vm8, %v973_v44, %v989_v13 }
 0x1ae   : > { %v992_v27 = vsel %vm980_vm4, %v970_v45, %v973_v44  ;;  %v993_v15 = vsel %vm983_vm5, %v979_v18, 1326507024  ;;  %v2616_v4 = vshrl.u32 %v2615_v51, 23  ;;  %v819_v62 = vor.u32 4788187, %v818_v3 }
 0x1af   : > { %v910_v54 = vsub.s32 0, %v8913_v47  ;;  %v991_v7 = vsel %vm981_vm10, %v988_v11, %v990_v55  ;;  %v994_v59 = vsel %vm982_vm8, %v976_v14, %v993_v15  ;;  %v964_v21 = vshrl.u32 %v12561_v46, %v963_v37 }
 0x1b0   : > { %v995_v41 = vsel %vm981_vm10, %v992_v27, %v994_v59  ;;  %v8944_v58 = vmul.u32.u64.low %v8922_v0, %v991_v7  ;;  %v8945_v8 = vmul.u32.u64.high %v8922_v0, %v991_v7, %v8944_v58  ;;  %v2569_v60 = vadd.s32 536870912, %v8927_v10 }
 0x1b1   : > { %v985_v51 = vsel %vm983_vm5, %v973_v44, 2102212464  ;;  %v8952_v22 = vmul.u32.u64.low %v8922_v0, %v995_v41  ;;  %v8953_v30 = vmul.u32.u64.high %v8922_v0, %v995_v41, %v8952_v22  ;;  %v720_v14 = vxor.u32 2147483648, %v8866_v56 }
 0x1b2   : > { %v815_v37 = vor.u32 %v814_v39, %v813_v33  ;;  %v7536_v43 = vadd.s32 4294967294, %v2472_v36  ;;  %v7542_v17 = vadd.s32 4294967169, %v2616_v4  ;;  %v12592_v35 = vxor.u32 2147483648, %v8549_v40 }
 0x1b3   : > { %v8966_v44 = vsel %vm2335_vm3, %v8833_v12, 920167782  ;;  %v12595_v18 = vor.u32 %v8783_v49, %v8694_v9  ;;  %v12396_v13 = vand.u32 2147483647, %v8877_v26  ;;  %v820_v33 = vand.u32 2147483647, %v819_v62 }
 0x1b4   : > { %v8961_v3 = vsel %vm534_vm2, %v12592_v35, %v8549_v40  ;;  %12594 = vst [vmem:[#allocation55_spill] sm:$0xff] %v8966_v44  ;;  %v984_v39 = vsel %vm980_vm4, %v964_v21, %v967_v32  ;;  %v986_v40 = vsel %vm982_vm8, %v970_v45, %v985_v51  ;;  %v2622_v36 = vadd.s32 1, %v7542_v17  ;;  %v9019_v17 = vpop.f32.mrb[9].mxu1 }
 0x1b5   : > { %12593 = vst [vmem:[#allocation54_spill] sm:$0xff] %v8961_v3  ;;  %v8973_v11 = vsel %vm2335_vm3, %v12595_v18, 1326507024  ;;  %v12597_v55 = vxor.u32 2147483648, %v8829_v20  ;;  %v7475_v49 = vmin.u32 %v910_v54, %v8913_v47  ;;  %v8988_v27 = vshrl.u32 %v2569_v60, 30 }
 0x1b6   : > { %12596 = vst [vmem:[#allocation56_spill] sm:$0xff] %v8973_v11  ;;  %v8991_v15 = vmul.f32 6.2831855, %v8356_v63  ;;  %v8996_v32 = vsel %vm638_vm11, %v720_v14, %v8866_v56  ;;  %v822_v45 = vcvt.s32.f32 %v815_v37  ;;  %vm7537_vm12 = vcmp.lt.s32.totalorder %v7536_v43, 0 }
 0x1b7   : > { %v8985_v9 = vsel %vm2198_vm9, %v12597_v55, %v8829_v20  ;;  %12599 = vst [vmem:[#allocation58_spill] sm:$0xff] %v8988_v27  ;;  %12601 = vst [vmem:[#allocation60_spill] sm:$0xff] %v8996_v32  ;;  %vm2623_vm13 = vcmp.gt.s32.totalorder %v2622_v36, 0  ;;  %v987_v4 = vsel %vm981_vm10, %v984_v39, %v986_v40  ;;  %v1006_v20 = vadd.s32 1, %v8945_v8 }
 0x1b8   : > { %12598 = vst [vmem:[#allocation57_spill] sm:$0xff] %v8985_v9  ;;  %12600 = vst [vmem:[#allocation59_spill] sm:$0xff] %v8991_v15  ;;  %v2619_v62 = vand.u32 8388607, %v12396_v13  ;;  %v2624_v54 = vsel %vm2623_vm13, %v2622_v36, 0  ;;  %v9003_v7 = vmul.f32 %v822_v45, %v820_v33  ;;  %v2460_v63 = vadd.s32 %v8677_v38, %v8684_v61 }
 0x1b9   : > { %vm1005_vm14 = vc.u32 %v8953_v30, %v8944_v58  ;;  %v2626_v56 = vand.u32 31, %v2624_v54  ;;  %v9009_v59 = vsel %vm7537_vm12, 0, %v7536_v43  ;;  %v912_v21 = vclz %v7475_v49 }
 0x1ba   : > { %v2571_v34 = vshll.u32 %v8988_v27, 30  ;;  %v1055_v41 = vand.u32 2139095040, %v8991_v15  ;;  %v1003_v60 = vmul.u32 %v8922_v0, %v987_v4  ;;  %v1007_v38 = vsel %vm1005_vm14, %v1006_v20, %v8945_v8 }
 0x1bb   : > { %v2627_v51 = vsub.s32 32, %v2626_v56  ;;  %v2629_v22 = vshll.u32 %v12561_v46, %v2626_v56  ;;  %v2632_v14 = vshll.u32 %v12562_v1, %v2626_v56  ;;  %v2620_v61 = vor.u32 8388608, %v2619_v62 }
 0x1bc   : > { %v2635_v37 = vshll.u32 %v12563_v57, %v2626_v56  ;;  %v2638_v43 = vshll.u32 %v12564_v25, %v2626_v56  ;;  %v2625_v35 = vshrl.u32 %v2624_v54, 5  ;;  %v824_v39 = vxor.u32 2147483648, %v9003_v7 }
 0x1bd   : > { %v2630_v18 = vshrl.u32 %v12562_v1, %v2627_v51  ;;  %v2633_v33 = vshrl.u32 %v12563_v57, %v2627_v51  ;;  %v2636_v0 = vshrl.u32 %v12564_v25, %v2627_v51  ;;  %v2476_v40 = vsub.s32 32, %v9009_v59 }
 0x1be   : > { %v2639_v8 = vshrl.u32 %v12557_v28, %v2627_v51  ;;  %v1056_v36 = vshrl.u32 %v1055_v41, 23  ;;  %v7476_v55 = vadd.s32 4294967294, %v912_v21  ;;  %v2641_v4 = vshll.u32 %v12557_v28, %v2626_v56 }
 0x1bf   : > { %v2631_v49 = vor.u32 %v2630_v18, %v2629_v22  ;;  %v2634_v45 = vor.u32 %v2633_v33, %v2632_v14  ;;  %v9029_v20 = vsub.s32 %v8927_v10, %v2571_v34  ;;  %v9031_v62 = vadd.s32 %v1007_v38, %v1003_v60 }
 0x1c0   : > { %v2637_v54 = vor.u32 %v2636_v0, %v2635_v37  ;;  %v2640_v13 = vor.u32 %v2639_v8, %v2638_v43  ;;  %vm742_vm15 = vcmp.lt.s32.totalorder %v8398_v16, 0  ;;  %v2642_v27 = vshrl.u32 %v12558_v48, %v2627_v51 }
 0x1c1   : > { %vm2644_vm0 = vcmp.lt.s32.totalorder %v2625_v35, 1  ;;  %vm2646_vm4 = vcmp.lt.s32.totalorder %v2625_v35, 3  ;;  %v9035_v9 = vshll.u32 %v2620_v61, 8  ;;  %v2628_v21 = vshrl.u32 %v12561_v46, %v2627_v51 }
 0x1c2   : > { %vm2645_vm5 = vcmp.lt.s32.totalorder %v2625_v35, 2  ;;  %vm2647_vm8 = vcmp.lt.s32.totalorder %v2625_v35, 4  ;;  %v7482_v56 = vadd.s32 4294967169, %v1056_v36  ;;  %v2643_v41 = vor.u32 %v2642_v27, %v2641_v4 }
 0x1c3   : > { %v2649_v10 = vsel %vm2647_vm8, %v2637_v54, 2102212464  ;;  %v2652_v34 = vsel %vm2644_vm0, %v2631_v49, %v2634_v45  ;;  %v2653_v60 = vsel %vm2647_vm8, %v2640_v13, 920167782  ;;  %v2480_v22 = vsub.s32 4294967266, %v9009_v59 }
 0x1c4   : > { %v2574_v14 = vsub.s32 0, %v9029_v20  ;;  %v1009_v38 = vadd.s32 536870912, %v9031_v62  ;;  %v2654_v37 = vsel %vm2646_vm4, %v2637_v54, %v2653_v60  ;;  %v2478_v61 = vshrl.u32 %v2460_v63, %v2476_v40 }
 0x1c5   : > { %v2655_v43 = vsel %vm2645_vm5, %v2652_v34, %v2654_v37  ;;  %v2656_v51 = vsel %vm2644_vm0, %v2634_v45, %v2637_v54  ;;  %v2657_v18 = vsel %vm2647_vm8, %v2643_v41, 1326507024  ;;  %vm7477_vm10 = vcmp.lt.s32.totalorder %v7476_v55, 0 }
 0x1c6   : > { %v2648_v27 = vsel %vm2644_vm0, %v2628_v21, %v2631_v49  ;;  %v2650_v33 = vsel %vm2646_vm4, %v2634_v45, %v2649_v10  ;;  %v2658_v0 = vsel %vm2646_vm4, %v2640_v13, %v2657_v18  ;;  %v1062_v63 = vadd.s32 1, %v7482_v56 }
 0x1c7   : > { %v2659_v8 = vsel %vm2645_vm5, %v2656_v51, %v2658_v0  ;;  %v9050_v36 = vmul.u32.u64.low %v9035_v9, %v2655_v43  ;;  %v9051_v4 = vmul.u32.u64.high %v9035_v9, %v2655_v43, %v9050_v36  ;;  %v7539_v40 = vmin.u32 %v2574_v14, %v9029_v20 }
 0x1c8   : > { %v9055_v34 = vshrl.u32 %v1009_v38, 30  ;;  %v9058_v54 = vmul.u32.u64.low %v9035_v9, %v2659_v8  ;;  %v9059_v41 = vmul.u32.u64.high %v9035_v9, %v2659_v8, %v9058_v54  ;;  %v2477_v49 = vshll.u32 %v8863_v53, %v9009_v59 }
 0x1c9   : > { %v9063_v13 = vsel %vm7477_vm10, 0, %v7476_v55  ;;  %v12399_v45 = vand.u32 2147483647, %v8991_v15  ;;  %vm1063_vm12 = vcmp.gt.s32.totalorder %v1062_v63, 0  ;;  %v9069_v21 = vsel %vm742_vm15, %v824_v39, %v9003_v7 }
 0x1ca   : > { %12602 = vst [vmem:[#allocation61_spill] sm:$0xff] %v9055_v34  ;;  %12603 = vst [vmem:[#allocation62_spill] sm:$0xff] %v9069_v21  ;;  %v9071_v56 = vadd.s32 127, %v2480_v22  ;;  %v2651_v10 = vsel %vm2645_vm5, %v2648_v27, %v2650_v33  ;;  %v1064_v60 = vsel %vm1063_vm12, %v1062_v63, 0  ;;  %v9074_v14 = vor.u32 %v2478_v61, %v2477_v49 }
 0x1cb   : > { %v900_v53 = vadd.s32 %v8757_v42, %v8764_v50  ;;  %v2670_v59 = vadd.s32 1, %v9051_v4  ;;  %v1066_v55 = vand.u32 31, %v1064_v60  ;;  %v920_v38 = vsub.s32 4294967266, %v9063_v13 }
 0x1cc   : > { %v2576_v37 = vclz %v7539_v40  ;;  %v1011_v43 = vshll.u32 %v9055_v34, 30  ;;  %v9082_v7 = vmul.f32 6.2831855, %v8389_v5  ;;  %v2667_v35 = vmul.u32 %v9035_v9, %v2651_v10  ;;  %v9104_v10 = vpop.f32.mrb[10].mxu0 }
 0x1cd   : > { %vm2669_vm13 = vc.u32 %v9059_v41, %v9050_v36  ;;  %v1059_v39 = vand.u32 8388607, %v12399_v45  ;;  %v1067_v42 = vsub.s32 32, %v1066_v55  ;;  %v916_v50 = vsub.s32 32, %v9063_v13 }
 0x1ce   : > { %12604 = vst [vmem:[#allocation63_spill] sm:$0xff] %v9082_v7  ;;  %v2671_v22 = vsel %vm2669_vm13, %v2670_v59, %v9051_v4  ;;  %v1069_v61 = vshll.u32 %v12561_v46, %v1066_v55  ;;  %v1072_v51 = vshll.u32 %v12562_v1, %v1066_v55  ;;  %v1065_v18 = vshrl.u32 %v1064_v60, 5 }
 0x1cf   : > { %v1070_v5 = vshrl.u32 %v12562_v1, %v1067_v42  ;;  %v1073_v9 = vshrl.u32 %v12563_v57, %v1067_v42  ;;  %v1075_v27 = vshll.u32 %v12563_v57, %v1066_v55  ;;  %v7540_v33 = vadd.s32 4294967294, %v2576_v37 }
 0x1d0   : > { %v9097_v0 = vsub.s32 %v9031_v62, %v1011_v43  ;;  %v1076_v8 = vshrl.u32 %v12564_v25, %v1067_v42  ;;  %v1078_v63 = vshll.u32 %v12564_v25, %v1066_v55  ;;  %v921_v4 = vadd.s32 127, %v920_v38 }
 0x1d1   : > { %v9101_v40 = vadd.s32 %v2671_v22, %v2667_v35  ;;  %v1060_v54 = vor.u32 8388608, %v1059_v39  ;;  %v1079_v49 = vshrl.u32 %v12557_v28, %v1067_v42  ;;  %v1068_v60 = vshrl.u32 %v12561_v46, %v1067_v42 }
 0x1d2   : > { %v1071_v59 = vor.u32 %v1070_v5, %v1069_v61  ;;  %v1074_v45 = vor.u32 %v1073_v9, %v1072_v51  ;;  %v1081_v37 = vshll.u32 %v12557_v28, %v1066_v55  ;;  %v1077_v62 = vor.u32 %v1076_v8, %v1075_v27 }
 0x1d3   : > { %v1080_v43 = vor.u32 %v1079_v49, %v1078_v63  ;;  %v1082_v34 = vshrl.u32 %v12558_v48, %v1067_v42  ;;  %vm1084_vm14 = vcmp.lt.s32.totalorder %v1065_v18, 1  ;;  %vm7541_vm0 = vcmp.lt.s32.totalorder %v7540_v33, 0 }
 0x1d4   : > { %v1014_v38 = vsub.s32 0, %v9097_v0  ;;  %vm1086_vm4 = vcmp.lt.s32.totalorder %v1065_v18, 3  ;;  %vm1087_vm5 = vcmp.lt.s32.totalorder %v1065_v18, 4  ;;  %vm1085_vm8 = vcmp.lt.s32.totalorder %v1065_v18, 2 }
 0x1d5   : > { %v1083_v35 = vor.u32 %v1082_v34, %v1081_v37  ;;  %v1089_v39 = vsel %vm1087_vm5, %v1077_v62, 2102212464  ;;  %v1100_v22 = vshll.u32 %v1060_v54, 8  ;;  %v2673_v61 = vadd.s32 536870912, %v9101_v40 }
 0x1d6   : > { %v1092_v51 = vsel %vm1084_vm14, %v1071_v59, %v1074_v45  ;;  %v1093_v55 = vsel %vm1087_vm5, %v1080_v43, 920167782  ;;  %v2719_v5 = vand.u32 2139095040, %v9082_v7  ;;  %v1088_v42 = vsel %vm1084_vm14, %v1068_v60, %v1071_v59 }
 0x1d7   : > { %v1090_v9 = vsel %vm1086_vm4, %v1074_v45, %v1089_v39  ;;  %v1094_v27 = vsel %vm1086_vm4, %v1077_v62, %v1093_v55  ;;  %v1096_v34 = vsel %vm1084_vm14, %v1074_v45, %v1077_v62  ;;  %v2482_v8 = vshll.u32 %v9071_v56, 23 }
 0x1d8   : > { %v918_v63 = vshrl.u32 %v900_v53, %v916_v50  ;;  %v1095_v54 = vsel %vm1085_vm8, %v1092_v51, %v1094_v27  ;;  %v1097_v49 = vsel %vm1087_vm5, %v1083_v35, 1326507024  ;;  %v922_v37 = vshll.u32 %v921_v4, 23 }
 0x1d9   : > { %v1098_v29 = vsel %vm1086_vm4, %v1080_v43, %v1097_v49  ;;  %v9123_v21 = vmul.u32.u64.low %v1100_v22, %v1095_v54  ;;  %v9124_v16 = vmul.u32.u64.high %v1100_v22, %v1095_v54, %v9123_v21  ;;  %v2579_v60 = vsel %vm7541_vm0, 0, %v7540_v33 }
 0x1da   : > { %v1091_v59 = vsel %vm1085_vm8, %v1088_v42, %v1090_v9  ;;  %v1099_v45 = vsel %vm1085_vm8, %v1096_v34, %v1098_v29  ;;  %v2720_v62 = vshrl.u32 %v2719_v5, 23  ;;  %v7479_v56 = vmin.u32 %v1014_v38, %v9097_v0 }
 0x1db   : > { %v9131_v53 = vshrl.u32 %v2673_v61, 30  ;;  %v9133_v50 = vmul.u32.u64.low %v1100_v22, %v1099_v45  ;;  %v9134_v35 = vmul.u32.u64.high %v1100_v22, %v1099_v45, %v9133_v50  ;;  %v9136_v4 = vor.u32 4788187, %v2482_v8 }
 0x1dc   : > { %v917_v43 = vshll.u32 %v8913_v47, %v9063_v13  ;;  %v7546_v39 = vadd.s32 4294967169, %v2720_v62  ;;  %v9141_v33 = vmul.f32 6.2831855, %v8489_v6  ;;  %v2564_v29 = vadd.s32 %v8848_v31, %v8856_v2 }
 0x1dd   : > { %12605 = vst [vmem:[#allocation64_spill] sm:$0xff] %v9131_v53  ;;  %v2580_v18 = vsub.s32 32, %v2579_v60  ;;  %v1107_v51 = vmul.u32 %v1100_v22, %v1091_v59  ;;  %v1110_v38 = vadd.s32 1, %v9124_v16  ;;  %v9148_v55 = vor.u32 4788187, %v922_v37 }
 0x1de   : > { %v9146_v61 = vor.u32 %v918_v63, %v917_v43  ;;  %v12406_v5 = vand.u32 2147483647, %v9082_v7  ;;  %v2726_v42 = vadd.s32 1, %v7546_v39  ;;  %v2584_v9 = vsub.s32 4294967266, %v2579_v60 }
 0x1df   : > { %v1016_v47 = vclz %v7479_v56  ;;  %v2675_v13 = vshll.u32 %v9131_v53, 30  ;;  %vm1109_vm10 = vc.u32 %v9134_v35, %v9123_v21  ;;  %v1159_v2 = vand.u32 2139095040, %v9141_v33 }
 0x1e0   : > { %v1111_v31 = vsel %vm1109_vm10, %v1110_v38, %v9124_v16  ;;  %vm2727_vm12 = vcmp.gt.s32.totalorder %v2726_v42, 0  ;;  %v2582_v27 = vshrl.u32 %v2564_v29, %v2580_v18  ;;  %v2581_v49 = vshll.u32 %v9029_v20, %v2579_v60 }
 0x1e1   : > { %v9158_v34 = vadd.s32 %v1111_v31, %v1107_v51  ;;  %v2728_v8 = vsel %vm2727_vm12, %v2726_v42, 0  ;;  %v9163_v59 = vadd.s32 127, %v2584_v9  ;;  %v7480_v45 = vadd.s32 4294967294, %v1016_v47  ;;  %v9177_v51 = vpop.f32.mrb[10].mxu1 }
 0x1e2   : > { %v2730_v37 = vand.u32 31, %v2728_v8  ;;  %v9166_v16 = vsub.s32 %v9101_v40, %v2675_v13  ;;  %v2723_v62 = vand.u32 8388607, %v12406_v5  ;;  %v1160_v39 = vshrl.u32 %v1159_v2, 23 }
 0x1e3   : > { %v9172_v29 = vor.u32 %v2582_v27, %v2581_v49  ;;  %v1113_v20 = vadd.s32 536870912, %v9158_v34  ;;  %v2729_v40 = vshrl.u32 %v2728_v8, 5  ;;  %vm7481_vm13 = vcmp.lt.s32.totalorder %v7480_v45, 0 }
 0x1e4   : > { %v2731_v56 = vsub.s32 32, %v2730_v37  ;;  %v2733_v50 = vshll.u32 %v12561_v46, %v2730_v37  ;;  %v2736_v43 = vshll.u32 %v12562_v1, %v2730_v37  ;;  %v2739_v60 = vshll.u32 %v12563_v57, %v2730_v37 }
 0x1e5   : > { %v2742_v18 = vshll.u32 %v12564_v25, %v2730_v37  ;;  %v2678_v47 = vsub.s32 0, %v9166_v16  ;;  %v2724_v13 = vor.u32 8388608, %v2723_v62  ;;  %v2745_v49 = vshll.u32 %v12557_v28, %v2730_v37 }
 0x1e6   : > { %v2734_v38 = vshrl.u32 %v12562_v1, %v2731_v56  ;;  %v2737_v42 = vshrl.u32 %v12563_v57, %v2731_v56  ;;  %v2740_v9 = vshrl.u32 %v12564_v25, %v2731_v56  ;;  %v2743_v31 = vshrl.u32 %v12557_v28, %v2731_v56 }
 0x1e7   : > { %v7486_v5 = vadd.s32 4294967169, %v1160_v39  ;;  %v2586_v54 = vshll.u32 %v9163_v59, 23  ;;  %v9186_v8 = vshrl.u32 %v1113_v20, 30  ;;  %v9188_v22 = vsel %vm7481_vm13, 0, %v7480_v45 }
 0x1e8   : > { %v2735_v2 = vor.u32 %v2734_v38, %v2733_v50  ;;  %v2738_v27 = vor.u32 %v2737_v42, %v2736_v43  ;;  %v2741_v63 = vor.u32 %v2740_v9, %v2739_v60  ;;  %v2744_v6 = vor.u32 %v2743_v31, %v2742_v18 }
 0x1e9   : > { %12606 = vst [vmem:[#allocation65_spill] sm:$0xff] %v9186_v8  ;;  %v2746_v53 = vshrl.u32 %v12558_v48, %v2731_v56  ;;  %vm2748_vm14 = vcmp.lt.s32.totalorder %v2729_v40, 1  ;;  %vm2750_vm0 = vcmp.lt.s32.totalorder %v2729_v40, 3  ;;  %v7543_v62 = vmin.u32 %v2678_v47, %v9166_v16 }
 0x1ea   : > { %vm2749_vm4 = vcmp.lt.s32.totalorder %v2729_v40, 2  ;;  %vm2751_vm5 = vcmp.lt.s32.totalorder %v2729_v40, 4  ;;  %v9192_v50 = vshll.u32 %v2724_v13, 8  ;;  %v2756_v43 = vsel %vm2748_vm14, %v2735_v2, %v2738_v27 }
 0x1eb   : > { %v2747_v37 = vor.u32 %v2746_v53, %v2745_v49  ;;  %v2757_v59 = vsel %vm2751_vm5, %v2744_v6, 920167782  ;;  %v1166_v39 = vadd.s32 1, %v7486_v5  ;;  %v1115_v20 = vshll.u32 %v9186_v8, 30 }
 0x1ec   : > { %v2732_v45 = vshrl.u32 %v12561_v46, %v2731_v56  ;;  %v2758_v60 = vsel %vm2750_vm0, %v2741_v63, %v2757_v59  ;;  %v9199_v18 = vmul.f32 6.2831855, %v8571_v23  ;;  %v2753_v38 = vsel %vm2751_vm5, %v2741_v63, 2102212464 }
 0x1ed   : > { %v2759_v42 = vsel %vm2749_vm4, %v2756_v43, %v2758_v60  ;;  %v2760_v9 = vsel %vm2748_vm14, %v2738_v27, %v2741_v63  ;;  %v2761_v47 = vsel %vm2751_vm5, %v2747_v37, 1326507024  ;;  %v1020_v53 = vsub.s32 32, %v9188_v22 }
 0x1ee   : > { %12607 = vst [vmem:[#allocation66_spill] sm:$0xff] %v9199_v18  ;;  %v2680_v13 = vclz %v7543_v62  ;;  %v2762_v5 = vsel %vm2750_vm0, %v2744_v6, %v2761_v47  ;;  %v12409_v31 = vand.u32 2147483647, %v9141_v33  ;;  %vm1167_vm8 = vcmp.gt.s32.totalorder %v1166_v39, 0 }
 0x1ef   : > { %v2763_v56 = vsel %vm2749_vm4, %v2760_v9, %v2762_v5  ;;  %v9208_v49 = vmul.u32.u64.low %v9192_v50, %v2759_v42  ;;  %v9209_v59 = vmul.u32.u64.high %v9192_v50, %v2759_v42, %v9208_v49  ;;  %v2752_v23 = vsel %vm2748_vm14, %v2732_v45, %v2735_v2 }
 0x1f0   : > { %v2754_v63 = vsel %vm2750_vm0, %v2738_v27, %v2753_v38  ;;  %v9215_v37 = vmul.u32.u64.low %v9192_v50, %v2763_v56  ;;  %v9216_v43 = vmul.u32.u64.high %v9192_v50, %v2763_v56, %v9215_v37  ;;  %v12608_v6 = vand.u32 2147483647, %v9136_v4 }
 0x1f1   : > { %v12609_v62 = vcvt.s32.f32 %v9074_v14  ;;  %v9225_v9 = vsub.s32 %v9158_v34, %v1115_v20  ;;  %v1168_v42 = vsel %vm1167_vm8, %v1166_v39, 0  ;;  %v2823_v47 = vand.u32 2139095040, %v9199_v18 }
 0x1f2   : > { %v12610_v2 = vand.u32 2147483647, %v9148_v55  ;;  %v12611_v27 = vcvt.s32.f32 %v9146_v61  ;;  %v9234_v38 = vor.u32 4788187, %v2586_v54  ;;  %v1004_v4 = vadd.s32 %v8944_v58, %v8953_v30 }
 0x1f3   : > { %v9222_v60 = vmul.f32 %v12609_v62, %v12608_v6  ;;  %v1170_v14 = vand.u32 31, %v1168_v42  ;;  %v1021_v34 = vshll.u32 %v9097_v0, %v9188_v22  ;;  %v2755_v39 = vsel %vm2749_vm4, %v2752_v23, %v2754_v63  ;;  %v9258_v62 = vpop.f32.mrb[11].mxu0 }
 0x1f4   : > { %v9232_v45 = vmul.f32 %v12611_v27, %v12610_v2  ;;  %v2774_v20 = vadd.s32 1, %v9209_v59  ;;  %v1022_v55 = vshrl.u32 %v1004_v4, %v1020_v53  ;;  %v1024_v61 = vsub.s32 4294967266, %v9188_v22 }
 0x1f5   : > { %v7544_v56 = vadd.s32 4294967294, %v2680_v13  ;;  %v1163_v54 = vand.u32 8388607, %v12409_v31  ;;  %v1118_v37 = vsub.s32 0, %v9225_v9  ;;  %vm2773_vm10 = vc.u32 %v9216_v43, %v9208_v49 }
 0x1f6   : > { %v1171_v58 = vsub.s32 32, %v1170_v14  ;;  %v2824_v30 = vshrl.u32 %v2823_v47, 23  ;;  %v2771_v0 = vmul.u32 %v9192_v50, %v2755_v39  ;;  %v9250_v40 = vshrl.u32 %v1168_v42, 5 }
 0x1f7   : > { %v1173_v23 = vshll.u32 %v12561_v46, %v1170_v14  ;;  %v1176_v53 = vshll.u32 %v12562_v1, %v1170_v14  ;;  %v2775_v22 = vsel %vm2773_vm10, %v2774_v20, %v9209_v59  ;;  %v1179_v6 = vshll.u32 %v12563_v57, %v1170_v14 }
 0x1f8   : > { %v1174_v13 = vshrl.u32 %v12562_v1, %v1171_v58  ;;  %v1177_v63 = vshrl.u32 %v12563_v57, %v1171_v58  ;;  %v1025_v2 = vadd.s32 127, %v1024_v61  ;;  %v1164_v47 = vor.u32 8388608, %v1163_v54  ;;  %v12613_v54 = vld [vmem:[#allocation46_spill] sm:$0xff] }
 0x1f9   : > { %v1180_v50 = vshrl.u32 %v12564_v25, %v1171_v58  ;;  %v1182_v42 = vshll.u32 %v12564_v25, %v1170_v14  ;;  %vm7545_vm12 = vcmp.lt.s32.totalorder %v7544_v56, 0  ;;  %v7483_v27 = vmin.u32 %v1118_v37, %v9225_v9 }
 0x1fa   : > { %v1183_v4 = vshrl.u32 %v12557_v28, %v1171_v58  ;;  %v7550_v59 = vadd.s32 4294967169, %v2824_v30  ;;  %v9264_v39 = vadd.s32 %v2775_v22, %v2771_v0  ;;  %v1175_v20 = vor.u32 %v1174_v13, %v1173_v23 }
 0x1fb   : > { %v1178_v31 = vor.u32 %v1177_v63, %v1176_v53  ;;  %v1185_v5 = vshll.u32 %v12557_v28, %v1170_v14  ;;  %v1181_v8 = vor.u32 %v1180_v50, %v1179_v6  ;;  %v1186_v61 = vshrl.u32 %v12558_v48, %v1171_v58 }
 0x1fc   : > { %v1184_v3 = vor.u32 %v1183_v4, %v1182_v42  ;;  %vm1188_vm13 = vcmp.lt.s32.totalorder %v9250_v40, 1  ;;  %v1026_v24 = vshll.u32 %v1025_v2, 23  ;;  %vm1190_vm14 = vcmp.lt.s32.totalorder %v9250_v40, 3 }
 0x1fd   : > { %vm1191_vm0 = vcmp.lt.s32.totalorder %v9250_v40, 4  ;;  %v9272_v37 = vor.u32 %v1022_v55, %v1021_v34  ;;  %v9275_v30 = vsel %vm7545_vm12, 0, %v7544_v56  ;;  %v1187_v0 = vor.u32 %v1186_v61, %v1185_v5 }
 0x1fe   : > { %vm1189_vm4 = vcmp.lt.s32.totalorder %v9250_v40, 2  ;;  %v1120_v14 = vclz %v7483_v27  ;;  %v1196_v23 = vsel %vm1188_vm13, %v1175_v20, %v1178_v31  ;;  %v1197_v53 = vsel %vm1191_vm0, %v1184_v3, 920167782 }
 0x1ff   : > { %v2830_v22 = vadd.s32 1, %v7550_v59  ;;  %v2777_v13 = vadd.s32 536870912, %v9264_v39  ;;  %v1198_v34 = vsel %vm1190_vm14, %v1181_v8, %v1197_v53  ;;  %v1200_v55 = vsel %vm1188_vm13, %v1178_v31, %v1181_v8 }
 0x200   : > { %v9287_v56 = vshll.u32 %v1164_v47, 8  ;;  %v9289_v5 = vor.u32 4788187, %v1026_v24  ;;  %v2668_v63 = vadd.s32 %v9050_v36, %v9059_v41  ;;  %v1199_v6 = vsel %vm1189_vm4, %v1196_v23, %v1198_v34 }
 0x201   : > { %v1201_v2 = vsel %vm1191_vm0, %v1187_v0, 1326507024  ;;  %v2688_v42 = vsub.s32 4294967266, %v9275_v30  ;;  %v12414_v47 = vand.u32 2147483647, %v9199_v18  ;;  %v7484_v24 = vadd.s32 4294967294, %v1120_v14 }
 0x202   : > { %v1202_v27 = vsel %vm1190_vm14, %v1184_v3, %v1201_v2  ;;  %v1172_v4 = vshrl.u32 %v12561_v46, %v1171_v58  ;;  %vm2831_vm5 = vcmp.gt.s32.totalorder %v2830_v22, 0  ;;  %v9305_v41 = vshrl.u32 %v2777_v13, 30 }
 0x203   : > { %v1203_v36 = vsel %vm1189_vm4, %v1200_v55, %v1202_v27  ;;  %v9308_v59 = vmul.u32.u64.low %v9287_v56, %v1199_v6  ;;  %v9309_v61 = vmul.u32.u64.high %v9287_v56, %v1199_v6, %v9308_v59  ;;  %v2832_v0 = vsel %vm2831_vm5, %v2830_v22, 0 }
 0x204   : > { %12612 = vst [vmem:[#allocation67_spill] sm:$0xff] %v9305_v41  ;;  %v9315_v3 = vadd.s32 %v9123_v21, %v9134_v35  ;;  %v1193_v58 = vsel %vm1191_vm0, %v1181_v8, 2102212464  ;;  %v2834_v14 = vand.u32 31, %v2832_v0  ;;  %v2684_v53 = vsub.s32 32, %v9275_v30 }
 0x205   : > { %v2685_v13 = vshll.u32 %v9166_v16, %v9275_v30  ;;  %v9323_v34 = vmul.u32.u64.low %v9287_v56, %v1203_v36  ;;  %v9324_v55 = vmul.u32.u64.high %v9287_v56, %v1203_v36, %v9323_v34  ;;  %v2689_v22 = vadd.s32 127, %v2688_v42 }
 0x206   : > { %vm7485_vm8 = vcmp.lt.s32.totalorder %v7484_v24, 0  ;;  %v2827_v6 = vand.u32 8388607, %v12414_v47  ;;  %v2835_v21 = vsub.s32 32, %v2834_v14  ;;  %v2779_v35 = vshll.u32 %v9305_v41, 30  ;;  %v9338_v34 = vpop.f32.mrb[11].mxu1 }
 0x207   : > { %v1192_v8 = vsel %vm1188_vm13, %v1172_v4, %v1175_v20  ;;  %v1194_v2 = vsel %vm1190_vm14, %v1178_v31, %v1193_v58  ;;  %v2837_v16 = vshll.u32 %v12561_v46, %v2834_v14  ;;  %v2840_v27 = vshll.u32 %v12562_v1, %v2834_v14 }
 0x208   : > { %v2838_v30 = vshrl.u32 %v12562_v1, %v2835_v21  ;;  %v2841_v42 = vshrl.u32 %v12563_v57, %v2835_v21  ;;  %v2846_v36 = vshll.u32 %v12564_v25, %v2834_v14  ;;  %v9340_v47 = vshrl.u32 %v2832_v0, 5 }
 0x209   : > { %v2843_v50 = vshll.u32 %v12563_v57, %v2834_v14  ;;  %v2844_v20 = vshrl.u32 %v12564_v25, %v2835_v21  ;;  %v2847_v31 = vshrl.u32 %v12557_v28, %v2835_v21  ;;  %v2686_v4 = vshrl.u32 %v2668_v63, %v2684_v53 }
 0x20a   : > { %v2690_v58 = vshll.u32 %v2689_v22, 23  ;;  %v2849_v23 = vshll.u32 %v12557_v28, %v2834_v14  ;;  %v9347_v41 = vmul.f32 6.2831855, %v12613_v54  ;;  %v1123_v32 = vsel %vm7485_vm8, 0, %v7484_v24 }
 0x20b   : > { %v1195_v52 = vsel %vm1189_vm4, %v1192_v8, %v1194_v2  ;;  %v1214_v0 = vadd.s32 1, %v9309_v61  ;;  %v2828_v44 = vor.u32 8388608, %v2827_v6  ;;  %v2839_v12 = vor.u32 %v2838_v30, %v2837_v16  ;;  %v12615_v2 = vld [vmem:[#allocation48_spill] sm:$0xff] }
 0x20c   : > { %12614 = vst [vmem:[#allocation46_spill] sm:$0xff] %v9347_v41  ;;  %v2842_v11 = vor.u32 %v2841_v42, %v2840_v27  ;;  %v2848_v19 = vor.u32 %v2847_v31, %v2846_v36  ;;  %v2850_v18 = vshrl.u32 %v12558_v48, %v2835_v21  ;;  %v9355_v63 = vsub.s32 %v9264_v39, %v2779_v35 }
 0x20d   : > { %vm1213_vm10 = vc.u32 %v9324_v55, %v9308_v59  ;;  %v2845_v54 = vor.u32 %v2844_v20, %v2843_v50  ;;  %vm2852_vm12 = vcmp.lt.s32.totalorder %v9340_v47, 1  ;;  %v2687_v24 = vor.u32 %v2686_v4, %v2685_v13 }
 0x20e   : > { %v2851_v40 = vor.u32 %v2850_v18, %v2849_v23  ;;  %vm2855_vm13 = vcmp.lt.s32.totalorder %v9340_v47, 4  ;;  %v1263_v14 = vand.u32 2139095040, %v9347_v41  ;;  %v1124_v53 = vsub.s32 32, %v1123_v32 }
 0x20f   : > { %v1128_v22 = vsub.s32 4294967266, %v1123_v32  ;;  %v1211_v6 = vmul.u32 %v9287_v56, %v1195_v52  ;;  %vm2854_vm14 = vcmp.lt.s32.totalorder %v9340_v47, 3  ;;  %v1215_v39 = vsel %vm1213_vm10, %v1214_v0, %v9309_v61 }
 0x210   : > { %vm2853_vm0 = vcmp.lt.s32.totalorder %v9340_v47, 2  ;;  %v2860_v50 = vsel %vm2852_vm12, %v2839_v12, %v2842_v11  ;;  %v2861_v18 = vsel %vm2855_vm13, %v2848_v19, 920167782  ;;  %v2691_v23 = vor.u32 4788187, %v2690_v58 }
 0x211   : > { %v2782_v13 = vsub.s32 0, %v9355_v63  ;;  %v2864_v35 = vsel %vm2852_vm12, %v2842_v11, %v2845_v54  ;;  %v9373_v8 = vshll.u32 %v2828_v44, 8  ;;  %v2862_v52 = vsel %vm2854_vm14, %v2845_v54, %v2861_v18 }
 0x212   : > { %v2865_v56 = vsel %vm2855_vm13, %v2851_v40, 1326507024  ;;  %v1264_v61 = vshrl.u32 %v1263_v14, 23  ;;  %v9380_v16 = vmul.f32 6.2831855, %v12615_v2  ;;  %v1125_v30 = vshll.u32 %v9225_v9, %v1123_v32 }
 0x213   : > { %v9383_v27 = vadd.s32 %v1215_v39, %v1211_v6  ;;  %v2863_v42 = vsel %vm2853_vm0, %v2860_v50, %v2862_v52  ;;  %v2866_v44 = vsel %vm2854_vm14, %v2848_v19, %v2865_v56  ;;  %v1126_v36 = vshrl.u32 %v9315_v3, %v1124_v53 }
 0x214   : > { %12616 = vst [vmem:[#allocation48_spill] sm:$0xff] %v9380_v16  ;;  %v1129_v20 = vadd.s32 127, %v1128_v22  ;;  %v2867_v31 = vsel %vm2853_vm0, %v2864_v35, %v2866_v44  ;;  %v7490_v4 = vadd.s32 4294967169, %v1264_v61  ;;  %v7547_v58 = vmin.u32 %v2782_v13, %v9355_v63 }
 0x215   : > { %v2836_v0 = vshrl.u32 %v12561_v46, %v2835_v21  ;;  %v9395_v32 = vmul.u32.u64.low %v9373_v8, %v2863_v42  ;;  %v9396_v9 = vmul.u32.u64.high %v9373_v8, %v2863_v42, %v9395_v32  ;;  %v2857_v40 = vsel %vm2855_vm13, %v2845_v54, 2102212464 }
 0x216   : > { %v9402_v19 = vmul.u32.u64.low %v9373_v8, %v2867_v31  ;;  %v9403_v3 = vmul.u32.u64.high %v9373_v8, %v2867_v31, %v9402_v19  ;;  %v1270_v14 = vadd.s32 1, %v7490_v4  ;;  %v12617_v53 = vand.u32 2147483647, %v9234_v38 }
 0x217   : > { %v12618_v22 = vcvt.s32.f32 %v9172_v29  ;;  %v12619_v21 = vand.u32 2147483647, %v9289_v5  ;;  %v12620_v39 = vcvt.s32.f32 %v9272_v37  ;;  %v2692_v18 = vand.u32 2147483647, %v2691_v23 }
 0x218   : > { %v1217_v54 = vadd.s32 536870912, %v9383_v27  ;;  %v9418_v13 = vor.u32 %v1126_v36, %v1125_v30  ;;  %v1130_v35 = vshll.u32 %v1129_v20, 23  ;;  %v12424_v52 = vand.u32 2147483647, %v9347_v41 }
 0x219   : > { %v9409_v6 = vmul.f32 %v12618_v22, %v12617_v53  ;;  %v9415_v50 = vmul.f32 %v12620_v39, %v12619_v21  ;;  %vm1271_vm4 = vcmp.gt.s32.totalorder %v1270_v14, 0  ;;  %v2784_v38 = vclz %v7547_v58 }
 0x21a   : > { %v2856_v29 = vsel %vm2852_vm12, %v2836_v0, %v2839_v12  ;;  %v2858_v5 = vsel %vm2854_vm14, %v2842_v11, %v2857_v40  ;;  %v2927_v37 = vand.u32 2139095040, %v9380_v16  ;;  %v2488_v56 = vxor.u32 2147483648, %v9222_v60 }
 0x21b   : > { %v2694_v61 = vcvt.s32.f32 %v2687_v24  ;;  %v1272_v2 = vsel %vm1271_vm4, %v1270_v14, 0  ;;  %v9430_v44 = vshrl.u32 %v1217_v54, 30  ;;  %v1131_v12 = vor.u32 4788187, %v1130_v35 }
 0x21c   : > { %v1274_v36 = vand.u32 31, %v1272_v2  ;;  %v1134_v11 = vcvt.s32.f32 %v9418_v13  ;;  %v2859_v31 = vsel %vm2853_vm0, %v2856_v29, %v2858_v5  ;;  %v7548_v4 = vadd.s32 4294967294, %v2784_v38 }
 0x21d   : > { %12621 = vst [vmem:[#allocation68_spill] sm:$0xff] %v9430_v44  ;;  %v9432_v20 = vmul.f32 %v2694_v61, %v2692_v18  ;;  %v2878_v58 = vadd.s32 1, %v9396_v9  ;;  %v1267_v24 = vand.u32 8388607, %v12424_v52  ;;  %v2928_v0 = vshrl.u32 %v2927_v37, 23  ;;  %v12623_v52 = vld [vmem:[#allocation40_spill] sm:$0xff] }
 0x21e   : > { %vm2877_vm5 = vc.u32 %v9403_v3, %v9395_v32  ;;  %v1275_v40 = vsub.s32 32, %v1274_v36  ;;  %v1277_v19 = vshll.u32 %v12561_v46, %v1274_v36  ;;  %v1280_v14 = vshll.u32 %v12562_v1, %v1274_v36 }
 0x21f   : > { %v1219_v53 = vshll.u32 %v9430_v44, 30  ;;  %v2875_v47 = vmul.u32 %v9373_v8, %v2859_v31  ;;  %v1283_v22 = vshll.u32 %v12563_v57, %v1274_v36  ;;  %v1286_v21 = vshll.u32 %v12564_v25, %v1274_v36  ;;  %v9456_v31 = vpop.f32.mrb[12].mxu0 }
 0x220   : > { %v9448_v39 = vshrl.u32 %v1272_v2, 5  ;;  %v1278_v18 = vshrl.u32 %v12562_v1, %v1275_v40  ;;  %v1281_v54 = vshrl.u32 %v12563_v57, %v1275_v40  ;;  %v1284_v13 = vshrl.u32 %v12564_v25, %v1275_v40  ;;  %v12622_v2 = vld [vmem:[#allocation32_spill] sm:$0xff] }
 0x221   : > { %vm7549_vm8 = vcmp.lt.s32.totalorder %v7548_v4, 0  ;;  %v2879_v35 = vsel %vm2877_vm5, %v2878_v58, %v9396_v9  ;;  %v1268_v38 = vor.u32 8388608, %v1267_v24  ;;  %v1287_v29 = vshrl.u32 %v12557_v28, %v1275_v40 }
 0x222   : > { %v1279_v5 = vor.u32 %v1278_v18, %v1277_v19  ;;  %v1282_v8 = vor.u32 %v1281_v54, %v1280_v14  ;;  %v1289_v37 = vshll.u32 %v12557_v28, %v1274_v36  ;;  %v7554_v61 = vadd.s32 4294967169, %v2928_v0  ;;  %v12624_v36 = vld [vmem:[#allocation43_spill] sm:$0xff] }
 0x223   : > { %vm12518_vm10 = vcmp.lt.s32.totalorder %v12622_v2, 0  ;;  %vm12466_vm12 = vcmp.lt.s32.totalorder %v12623_v52, 0  ;;  %v1132_v42 = vand.u32 2147483647, %v1131_v12  ;;  %v9461_v30 = vsub.s32 %v9383_v27, %v1219_v53  ;;  %v12625_v0 = vld [vmem:[#allocation47_spill] sm:$0xff] }
 0x224   : > { %v1285_v23 = vor.u32 %v1284_v13, %v1283_v22  ;;  %v1288_v9 = vor.u32 %v1287_v29, %v1286_v21  ;;  %v9463_v58 = vadd.s32 %v2879_v35, %v2875_v47  ;;  %v1290_v24 = vshrl.u32 %v12558_v48, %v1275_v40 }
 0x225   : > { %vm1292_vm13 = vcmp.lt.s32.totalorder %v9448_v39, 1  ;;  %vm1294_vm14 = vcmp.lt.s32.totalorder %v9448_v39, 3  ;;  %vm12435_vm0 = vcmp.lt.s32.totalorder %v12624_v36, 0  ;;  %vm12434_vm4 = vcmp.lt.s32.totalorder %v12625_v0, 0 }
 0x226   : > { %v9471_v19 = vsel %vm7549_vm8, 0, %v7548_v4  ;;  %vm1293_vm5 = vcmp.lt.s32.totalorder %v9448_v39, 2  ;;  %vm1295_vm1 = vcmp.lt.s32.totalorder %v9448_v39, 4  ;;  %v9475_v27 = vshll.u32 %v1268_v38, 8 }
 0x227   : > { %v1291_v12 = vor.u32 %v1290_v24, %v1289_v37  ;;  %v1300_v14 = vsel %vm1292_vm13, %v1279_v5, %v1282_v8  ;;  %v1301_v53 = vsel %vm1295_vm1, %v1288_v9, 920167782  ;;  %v2934_v47 = vadd.s32 1, %v7554_v61 }
 0x228   : > { %v9481_v22 = vmul.f32 %v1134_v11, %v1132_v42  ;;  %v1222_v21 = vsub.s32 0, %v9461_v30  ;;  %v1302_v4 = vsel %vm1294_vm14, %v1285_v23, %v1301_v53  ;;  %v12426_v18 = vand.u32 2147483647, %v9380_v16 }
 0x229   : > { %v2881_v54 = vadd.s32 536870912, %v9463_v58  ;;  %v1303_v13 = vsel %vm1293_vm5, %v1300_v14, %v1302_v4  ;;  %v1304_v35 = vsel %vm1292_vm13, %v1282_v8, %v1285_v23  ;;  %v1305_v38 = vsel %vm1295_vm1, %v1291_v12, 1326507024 }
 0x22a   : > { %v2788_v42 = vsub.s32 32, %v9471_v19  ;;  %v1276_v11 = vshrl.u32 %v12561_v46, %v1275_v40  ;;  %v1297_v29 = vsel %vm1295_vm1, %v1285_v23, 2102212464  ;;  %v1306_v37 = vsel %vm1294_vm14, %v1288_v9, %v1305_v38 }
 0x22b   : > { %v1307_v61 = vsel %vm1293_vm5, %v1304_v35, %v1306_v37  ;;  %v9503_v24 = vmul.u32.u64.low %v9475_v27, %v1303_v13  ;;  %v9504_v14 = vmul.u32.u64.high %v9475_v27, %v1303_v13, %v9503_v24  ;;  %vm2935_vm8 = vcmp.gt.s32.totalorder %v2934_v47, 0 }
 0x22c   : > { %v2792_v12 = vsub.s32 4294967266, %v9471_v19  ;;  %v7487_v53 = vmin.u32 %v1222_v21, %v9461_v30  ;;  %v9510_v40 = vmul.u32.u64.low %v9475_v27, %v1307_v61  ;;  %v9511_v4 = vmul.u32.u64.high %v9475_v27, %v1307_v61, %v9510_v40 }
 0x22d   : > { %v9518_v23 = vsel %vm12518_vm10, %v2488_v56, %v9222_v60  ;;  %v12627_v9 = vxor.u32 2147483648, %v9232_v45  ;;  %v9527_v35 = vshrl.u32 %v2881_v54, 30  ;;  %v2936_v21 = vsel %vm2935_vm8, %v2934_v47, 0 }
 0x22e   : > { %12626 = vst [vmem:[#allocation69_spill] sm:$0xff] %v9518_v23  ;;  %v2772_v38 = vadd.s32 %v9208_v49, %v9216_v43  ;;  %v1296_v37 = vsel %vm1292_vm13, %v1276_v11, %v1279_v5  ;;  %v1298_v60 = vsel %vm1294_vm14, %v1282_v8, %v1297_v29  ;;  %v2938_v56 = vand.u32 31, %v2936_v21 }
 0x22f   : > { %v9525_v13 = vsel %vm12466_vm12, %v12627_v9, %v9232_v45  ;;  %12629 = vst [vmem:[#allocation71_spill] sm:$0xff] %v9527_v35  ;;  %v12630_v61 = vxor.u32 2147483648, %v9409_v6  ;;  %v12632_v47 = vxor.u32 2147483648, %v9415_v50  ;;  %v9553_v54 = vadd.s32 127, %v2792_v12 }
 0x230   : > { %12628 = vst [vmem:[#allocation70_spill] sm:$0xff] %v9525_v13  ;;  %v9551_v8 = vshrl.u32 %v2772_v38, %v2788_v42  ;;  %v1224_v11 = vclz %v7487_v53  ;;  %v2883_v29 = vshll.u32 %v9527_v35, 30  ;;  %v1299_v40 = vsel %vm1293_vm5, %v1296_v37, %v1298_v60  ;;  %v9566_v53 = vpop.f32.mrb[12].mxu1 }
 0x231   : > { %v9540_v45 = vsel %vm12435_vm0, %v12630_v61, %v9409_v6  ;;  %v9547_v49 = vsel %vm12434_vm4, %v12632_v47, %v9415_v50  ;;  %v2931_v6 = vand.u32 8388607, %v12426_v18  ;;  %v2939_v9 = vsub.s32 32, %v2938_v56  ;;  %v12634_v50 = vld [vmem:[#allocation53_spill] sm:$0xff] }
 0x232   : > { %12631 = vst [vmem:[#allocation72_spill] sm:$0xff] %v9540_v45  ;;  %12633 = vst [vmem:[#allocation73_spill] sm:$0xff] %v9547_v49  ;;  %v9561_v61 = vmul.f32 6.2831855, %v12634_v50  ;;  %v1318_v47 = vadd.s32 1, %v9504_v14  ;;  %v2937_v5 = vshrl.u32 %v2936_v21, 5  ;;  %v2941_v42 = vshll.u32 %v12561_v46, %v2938_v56 }
 0x233   : > { %v2944_v12 = vshll.u32 %v12562_v1, %v2938_v56  ;;  %vm1317_vm1 = vc.u32 %v9511_v4, %v9503_v24  ;;  %v2942_v38 = vshrl.u32 %v12562_v1, %v2939_v9  ;;  %v2945_v39 = vshrl.u32 %v12563_v57, %v2939_v9 }
 0x234   : > { %12635 = vst [vmem:[#allocation53_spill] sm:$0xff] %v9561_v61  ;;  %v2947_v37 = vshll.u32 %v12563_v57, %v2938_v56  ;;  %v7488_v60 = vadd.s32 4294967294, %v1224_v11  ;;  %v2932_v50 = vor.u32 8388608, %v2931_v6  ;;  %v2948_v18 = vshrl.u32 %v12564_v25, %v2939_v9 }
 0x235   : > { %v2950_v21 = vshll.u32 %v12564_v25, %v2938_v56  ;;  %v9576_v43 = vsub.s32 %v9463_v58, %v2883_v29  ;;  %v1315_v35 = vmul.u32 %v9475_v27, %v1299_v40  ;;  %v2951_v44 = vshrl.u32 %v12557_v28, %v2939_v9 }
 0x236   : > { %v1367_v49 = vand.u32 2139095040, %v9561_v61  ;;  %v1319_v0 = vsel %vm1317_vm1, %v1318_v47, %v9504_v14  ;;  %v2943_v45 = vor.u32 %v2942_v38, %v2941_v42  ;;  %v2946_v36 = vor.u32 %v2945_v39, %v2944_v12 }
 0x237   : > { %v2953_v11 = vshll.u32 %v12557_v28, %v2938_v56  ;;  %vm12444_vm13 = vcmp.lt.s32.totalorder %v8877_v26, 0  ;;  %v2949_v6 = vor.u32 %v2948_v18, %v2947_v37  ;;  %v2952_v13 = vor.u32 %v2951_v44, %v2950_v21 }
 0x238   : > { %v2954_v52 = vshrl.u32 %v12558_v48, %v2939_v9  ;;  %vm2956_vm14 = vcmp.lt.s32.totalorder %v2937_v5, 1  ;;  %v2940_v58 = vshrl.u32 %v12561_v46, %v2939_v9  ;;  %vm2958_vm5 = vcmp.lt.s32.totalorder %v2937_v5, 3 }
 0x239   : > { %vm2959_vm8 = vcmp.lt.s32.totalorder %v2937_v5, 4  ;;  %v2972_v27 = vshll.u32 %v2932_v50, 8  ;;  %vm12460_vm4 = vcmp.lt.s32.totalorder %v8991_v15, 0  ;;  %v9587_v29 = vadd.s32 %v1319_v0, %v1315_v35 }
 0x23a   : > { %v2955_v14 = vor.u32 %v2954_v52, %v2953_v11  ;;  %vm2957_vm1 = vcmp.lt.s32.totalorder %v2937_v5, 2  ;;  %v2961_v56 = vsel %vm2959_vm8, %v2949_v6, 2102212464  ;;  %v2794_v40 = vshll.u32 %v9553_v54, 23 }
 0x23b   : > { %v2964_v44 = vsel %vm2956_vm14, %v2943_v45, %v2946_v36  ;;  %v2965_v18 = vsel %vm2959_vm8, %v2952_v13, 920167782  ;;  %v1368_v47 = vshrl.u32 %v1367_v49, 23  ;;  %vm7489_vm0 = vcmp.lt.s32.totalorder %v7488_v60, 0 }
 0x23c   : > { %v2886_v9 = vsub.s32 0, %v9576_v43  ;;  %v2966_v42 = vsel %vm2958_vm5, %v2949_v6, %v2965_v18  ;;  %v2968_v12 = vsel %vm2956_vm14, %v2946_v36, %v2949_v6  ;;  %v2960_v0 = vsel %vm2956_vm14, %v2940_v58, %v2943_v45 }
 0x23d   : > { %v2962_v52 = vsel %vm2958_vm5, %v2946_v36, %v2961_v56  ;;  %v2967_v35 = vsel %vm2957_vm1, %v2964_v44, %v2966_v42  ;;  %v2969_v54 = vsel %vm2959_vm8, %v2955_v14, 1326507024  ;;  %v1321_v38 = vadd.s32 536870912, %v9587_v29 }
 0x23e   : > { %v2970_v39 = vsel %vm2958_vm5, %v2952_v13, %v2969_v54  ;;  %v9602_v49 = vmul.u32.u64.low %v2972_v27, %v2967_v35  ;;  %v9603_v37 = vmul.u32.u64.high %v2972_v27, %v2967_v35, %v9602_v49  ;;  %v2789_v50 = vshll.u32 %v9355_v63, %v9471_v19 }
 0x23f   : > { %v9608_v21 = vsel %vm7489_vm0, 0, %v7488_v60  ;;  %v2971_v45 = vsel %vm2957_vm1, %v2968_v12, %v2970_v39  ;;  %v7494_v36 = vadd.s32 4294967169, %v1368_v47  ;;  %v7551_v11 = vmin.u32 %v2886_v9, %v9576_v43 }
 0x240   : > { %v2963_v6 = vsel %vm2957_vm1, %v2960_v0, %v2962_v52  ;;  %v9613_v58 = vmul.u32.u64.low %v2972_v27, %v2971_v45  ;;  %v9614_v14 = vmul.u32.u64.high %v2972_v27, %v2971_v45, %v9613_v58  ;;  %v12636_v13 = vxor.u32 2147483648, %v9432_v20 }
 0x241   : > { %v9624_v63 = vor.u32 %v9551_v8, %v2789_v50  ;;  %v9626_v19 = vor.u32 4788187, %v2794_v40  ;;  %v1374_v60 = vadd.s32 1, %v7494_v36  ;;  %v9628_v44 = vshrl.u32 %v1321_v38, 30 }
 0x242   : > { %v9621_v56 = vsel %vm12444_vm13, %v12636_v13, %v9432_v20  ;;  %v2982_v5 = vadd.s32 1, %v9603_v37  ;;  %v12436_v18 = vand.u32 2147483647, %v9561_v61  ;;  %v9633_v47 = vmul.f32 6.2831855, %v9019_v17 }
 0x243   : > { %12637 = vst [vmem:[#allocation74_spill] sm:$0xff] %v9621_v56  ;;  %12638 = vst [vmem:[#allocation75_spill] sm:$0xff] %v9628_v44  ;;  %v12640_v9 = vxor.u32 2147483648, %v9481_v22  ;;  %v1232_v8 = vsub.s32 4294967266, %v9608_v21  ;;  %v2979_v40 = vmul.u32 %v2972_v27, %v2963_v6  ;;  %vm1375_vm0 = vcmp.gt.s32.totalorder %v1374_v60, 0 }
 0x244   : > { %12639 = vst [vmem:[#allocation76_spill] sm:$0xff] %v9633_v47  ;;  %v1228_v42 = vsub.s32 32, %v9608_v21  ;;  %v2888_v12 = vclz %v7551_v11  ;;  %vm2981_vm14 = vc.u32 %v9614_v14, %v9602_v49  ;;  %v1376_v0 = vsel %vm1375_vm0, %v1374_v60, 0 }
 0x245   : > { %v9640_v20 = vsel %vm12460_vm4, %v12640_v9, %v9481_v22  ;;  %v2798_v17 = vcvt.s32.f32 %v9624_v63  ;;  %v1212_v52 = vadd.s32 %v9308_v59, %v9324_v55  ;;  %v2983_v35 = vsel %vm2981_vm14, %v2982_v5, %v9603_v37  ;;  %v9668_v9 = vpop.f32.mrb[13].mxu0 }
 0x246   : > { %12641 = vst [vmem:[#allocation77_spill] sm:$0xff] %v9640_v20  ;;  %v1378_v22 = vand.u32 31, %v1376_v0  ;;  %v2796_v54 = vand.u32 2147483647, %v9626_v19  ;;  %v1323_v27 = vshll.u32 %v9628_v44, 30  ;;  %v3031_v39 = vand.u32 2139095040, %v9633_v47 }
 0x247   : > { %v1371_v38 = vand.u32 8388607, %v12436_v18  ;;  %v1229_v50 = vshll.u32 %v9461_v30, %v9608_v21  ;;  %v1233_v45 = vadd.s32 127, %v1232_v8  ;;  %v9657_v36 = vadd.s32 %v2983_v35, %v2979_v40 }
 0x248   : > { %v1379_v11 = vsub.s32 32, %v1378_v22  ;;  %v1230_v59 = vshrl.u32 %v1212_v52, %v1228_v42  ;;  %v7552_v55 = vadd.s32 4294967294, %v2888_v12  ;;  %v1381_v37 = vshll.u32 %v12561_v46, %v1378_v22 }
 0x249   : > { %v1384_v6 = vshll.u32 %v12562_v1, %v1378_v22  ;;  %v1377_v58 = vshrl.u32 %v1376_v0, 5  ;;  %v1387_v19 = vshll.u32 %v12563_v57, %v1378_v22  ;;  %v9665_v60 = vsub.s32 %v9587_v29, %v1323_v27 }
 0x24a   : > { %v1382_v13 = vshrl.u32 %v12562_v1, %v1379_v11  ;;  %v1385_v63 = vshrl.u32 %v12563_v57, %v1379_v11  ;;  %v1372_v30 = vor.u32 8388608, %v1371_v38  ;;  %v1388_v21 = vshrl.u32 %v12564_v25, %v1379_v11 }
 0x24b   : > { %v3032_v5 = vshrl.u32 %v3031_v39, 23  ;;  %v1234_v8 = vshll.u32 %v1233_v45, 23  ;;  %v2985_v40 = vadd.s32 536870912, %v9657_v36  ;;  %v1390_v42 = vshll.u32 %v12564_v25, %v1378_v22 }
 0x24c   : > { %v1391_v12 = vshrl.u32 %v12557_v28, %v1379_v11  ;;  %v1380_v0 = vshrl.u32 %v12561_v46, %v1379_v11  ;;  %v1383_v52 = vor.u32 %v1382_v13, %v1381_v37  ;;  %v1386_v35 = vor.u32 %v1385_v63, %v1384_v6 }
 0x24d   : > { %v1389_v18 = vor.u32 %v1388_v21, %v1387_v19  ;;  %v1393_v27 = vshll.u32 %v12557_v28, %v1378_v22  ;;  %v1394_v38 = vshrl.u32 %v12558_v48, %v1379_v11  ;;  %vm1396_vm5 = vcmp.lt.s32.totalorder %v1377_v58, 1 }
 0x24e   : > { %v1392_v29 = vor.u32 %v1391_v12, %v1390_v42  ;;  %vm7553_vm8 = vcmp.lt.s32.totalorder %v7552_v55, 0  ;;  %v1326_v39 = vsub.s32 0, %v9665_v60  ;;  %v1412_v45 = vshll.u32 %v1372_v30, 8 }
 0x24f   : > { %v7558_v44 = vadd.s32 4294967169, %v3032_v5  ;;  %v9677_v56 = vshrl.u32 %v2985_v40, 30  ;;  %v1395_v26 = vor.u32 %v1394_v38, %v1393_v27  ;;  %vm1398_vm1 = vcmp.lt.s32.totalorder %v1377_v58, 3 }
 0x250   : > { %vm1399_vm0 = vcmp.lt.s32.totalorder %v1377_v58, 4  ;;  %vm1397_vm14 = vcmp.lt.s32.totalorder %v1377_v58, 2  ;;  %v1400_v37 = vsel %vm1396_vm5, %v1380_v0, %v1383_v52  ;;  %v1404_v13 = vsel %vm1396_vm5, %v1383_v52, %v1386_v35 }
 0x251   : > { %12642 = vst [vmem:[#allocation78_spill] sm:$0xff] %v9677_v56  ;;  %v1401_v6 = vsel %vm1399_vm0, %v1389_v18, 2102212464  ;;  %v1405_v22 = vsel %vm1399_vm0, %v1392_v29, 920167782  ;;  %v1408_v19 = vsel %vm1396_vm5, %v1386_v35, %v1389_v18  ;;  %v9680_v21 = vmul.f32 %v2798_v17, %v2796_v54 }
 0x252   : > { %v1402_v63 = vsel %vm1398_vm1, %v1386_v35, %v1401_v6  ;;  %v1409_v11 = vsel %vm1399_vm0, %v1395_v26, 1326507024  ;;  %v9682_v42 = vor.u32 %v1230_v59, %v1229_v50  ;;  %v7491_v30 = vmin.u32 %v1326_v39, %v9665_v60 }
 0x253   : > { %v1406_v5 = vsel %vm1398_vm1, %v1389_v18, %v1405_v22  ;;  %v9687_v40 = vsel %vm7553_vm8, 0, %v7552_v55  ;;  %v1410_v0 = vsel %vm1398_vm1, %v1392_v29, %v1409_v11  ;;  %v3038_v52 = vadd.s32 1, %v7558_v44 }
 0x254   : > { %v1407_v12 = vsel %vm1397_vm14, %v1404_v13, %v1406_v5  ;;  %v9691_v27 = vor.u32 4788187, %v1234_v8  ;;  %v2987_v26 = vshll.u32 %v9677_v56, 30  ;;  %v1403_v17 = vsel %vm1397_vm14, %v1400_v37, %v1402_v63 }
 0x255   : > { %v1411_v54 = vsel %vm1397_vm14, %v1408_v19, %v1410_v0  ;;  %v9699_v18 = vmul.u32.u64.low %v1412_v45, %v1407_v12  ;;  %v9700_v35 = vmul.u32.u64.high %v1412_v45, %v1407_v12, %v9699_v18  ;;  %v2892_v55 = vsub.s32 32, %v9687_v40 }
 0x256   : > { %v9696_v50 = vmul.u32.u64.low %v1412_v45, %v1411_v54  ;;  %v9697_v59 = vmul.u32.u64.high %v1412_v45, %v1411_v54, %v9696_v50  ;;  %v1328_v38 = vclz %v7491_v30  ;;  %v12441_v44 = vand.u32 2147483647, %v9633_v47 }
 0x257   : > { %vm3039_vm5 = vcmp.gt.s32.totalorder %v3038_v52, 0  ;;  %v2876_v29 = vadd.s32 %v9395_v32, %v9403_v3  ;;  %v2896_v58 = vsub.s32 4294967266, %v9687_v40  ;;  %v9711_v6 = vsub.s32 %v9657_v36, %v2987_v26 }
 0x258   : > { %v3040_v39 = vsel %vm3039_vm5, %v3038_v52, 0  ;;  %v1419_v13 = vmul.u32 %v1412_v45, %v1403_v17  ;;  %v2893_v19 = vshll.u32 %v9576_v43, %v9687_v40  ;;  %vm1421_vm8 = vc.u32 %v9697_v59, %v9699_v18  ;;  %v9724_v52 = vpop.f32.mrb[13].mxu1 }
 0x259   : > { %v3042_v63 = vand.u32 31, %v3040_v39  ;;  %v1422_v32 = vadd.s32 1, %v9700_v35  ;;  %v2894_v3 = vshrl.u32 %v2876_v29, %v2892_v55  ;;  %v7492_v11 = vadd.s32 4294967294, %v1328_v38 }
 0x25a   : > { %v3035_v30 = vand.u32 8388607, %v12441_v44  ;;  %v2897_v36 = vadd.s32 127, %v2896_v58  ;;  %v2990_v43 = vsub.s32 0, %v9711_v6  ;;  %v9727_v26 = vshrl.u32 %v3040_v39, 5 }
 0x25b   : > { %v3043_v5 = vsub.s32 32, %v3042_v63  ;;  %v1423_v45 = vsel %vm1421_vm8, %v1422_v32, %v9700_v35  ;;  %v3045_v12 = vshll.u32 %v12561_v46, %v3042_v63  ;;  %v3048_v0 = vshll.u32 %v12562_v1, %v3042_v63 }
 0x25c   : > { %v1424_v40 = vadd.s32 %v1423_v45, %v1419_v13  ;;  %v3051_v17 = vshll.u32 %v12563_v57, %v3042_v63  ;;  %v3054_v35 = vshll.u32 %v12564_v25, %v3042_v63  ;;  %vm7493_vm1 = vcmp.lt.s32.totalorder %v7492_v11, 0 }
 0x25d   : > { %v3046_v54 = vshrl.u32 %v12562_v1, %v3043_v5  ;;  %v3049_v50 = vshrl.u32 %v12563_v57, %v3043_v5  ;;  %v3052_v55 = vshrl.u32 %v12564_v25, %v3043_v5  ;;  %v3036_v29 = vor.u32 8388608, %v3035_v30 }
 0x25e   : > { %v1425_v38 = vadd.s32 536870912, %v1424_v40  ;;  %v3055_v58 = vshrl.u32 %v12557_v28, %v3043_v5  ;;  %v3057_v39 = vshll.u32 %v12557_v28, %v3042_v63  ;;  %v9737_v13 = vmul.f32 6.2831855, %v9104_v10 }
 0x25f   : > { %v3047_v32 = vor.u32 %v3046_v54, %v3045_v12  ;;  %v3050_v44 = vor.u32 %v3049_v50, %v3048_v0  ;;  %vm12459_vm0 = vcmp.lt.s32.totalorder %v9082_v7, 0  ;;  %v2898_v45 = vshll.u32 %v2897_v36, 23 }
 0x260   : > { %v7555_v37 = vmin.u32 %v2990_v43, %v9711_v6  ;;  %v3053_v22 = vor.u32 %v3052_v55, %v3051_v17  ;;  %v3056_v8 = vor.u32 %v3055_v58, %v3054_v35  ;;  %v9741_v56 = vsel %vm7493_vm1, 0, %v7492_v11 }
 0x261   : > { %v3058_v30 = vshrl.u32 %v12558_v48, %v3043_v5  ;;  %vm3060_vm14 = vcmp.lt.s32.totalorder %v9727_v26, 1  ;;  %vm3062_vm5 = vcmp.lt.s32.totalorder %v9727_v26, 3  ;;  %v9746_v12 = vshrl.u32 %v1425_v38, 30 }
 0x262   : > { %vm3061_vm8 = vcmp.lt.s32.totalorder %v9727_v26, 2  ;;  %vm3063_vm13 = vcmp.lt.s32.totalorder %v9727_v26, 4  ;;  %v9750_v10 = vshll.u32 %v3036_v29, 8  ;;  %v3068_v36 = vsel %vm3060_vm14, %v3047_v32, %v3050_v44 }
 0x263   : > { %12643 = vst [vmem:[#allocation79_spill] sm:$0xff] %v9746_v12  ;;  %v3059_v63 = vor.u32 %v3058_v30, %v3057_v39  ;;  %v3069_v11 = vsel %vm3063_vm13, %v3056_v8, 920167782  ;;  %v1471_v0 = vand.u32 2139095040, %v9737_v13  ;;  %v9757_v43 = vor.u32 %v2894_v3, %v2893_v19 }
 0x264   : > { %v9759_v17 = vor.u32 4788187, %v2898_v45  ;;  %v2992_v54 = vclz %v7555_v37  ;;  %v3070_v50 = vsel %vm3062_vm5, %v3053_v22, %v3069_v11  ;;  %v3072_v35 = vsel %vm3060_vm14, %v3050_v44, %v3053_v22 }
 0x265   : > { %v3071_v55 = vsel %vm3061_vm8, %v3068_v36, %v3070_v50  ;;  %v3073_v38 = vsel %vm3063_vm13, %v3059_v63, 1326507024  ;;  %v9770_v29 = vmul.f32 6.2831855, %v9177_v51  ;;  %v1336_v19 = vsub.s32 4294967266, %v9741_v56 }
 0x266   : > { %v1427_v3 = vshll.u32 %v9746_v12, 30  ;;  %v3044_v37 = vshrl.u32 %v12561_v46, %v3043_v5  ;;  %v3074_v58 = vsel %vm3062_vm5, %v3056_v8, %v3073_v38  ;;  %v1472_v63 = vshrl.u32 %v1471_v0, 23 }
 0x267   : > { %12644 = vst [vmem:[#allocation80_spill] sm:$0xff] %v9770_v29  ;;  %v3075_v39 = vsel %vm3061_vm8, %v3072_v35, %v3074_v58  ;;  %v9780_v45 = vmul.u32.u64.low %v9750_v10, %v3071_v55  ;;  %v9781_v30 = vmul.u32.u64.high %v9750_v10, %v3071_v55, %v9780_v45  ;;  %v7556_v51 = vadd.s32 4294967294, %v2992_v54 }
 0x268   : > { %v3065_v36 = vsel %vm3063_vm13, %v3053_v22, 2102212464  ;;  %v9787_v11 = vmul.u32.u64.low %v9750_v10, %v3075_v39  ;;  %v9788_v50 = vmul.u32.u64.high %v9750_v10, %v3075_v39, %v9787_v11  ;;  %v12645_v8 = vxor.u32 2147483648, %v9680_v21 }
 0x269   : > { %v1316_v55 = vadd.s32 %v9503_v24, %v9511_v4  ;;  %v1332_v0 = vsub.s32 32, %v9741_v56  ;;  %v7498_v54 = vadd.s32 4294967169, %v1472_v63  ;;  %v12647_v35 = vand.u32 2147483647, %v9691_v27 }
 0x26a   : > { %v9795_v5 = vsel %vm12459_vm0, %v12645_v8, %v9680_v21  ;;  %v12648_v22 = vcvt.s32.f32 %v9682_v42  ;;  %v9808_v11 = vsub.s32 %v1424_v40, %v1427_v3  ;;  %v9810_v21 = vadd.s32 127, %v1336_v19 }
 0x26b   : > { %12646 = vst [vmem:[#allocation81_spill] sm:$0xff] %v9795_v5  ;;  %v3064_v24 = vsel %vm3060_vm14, %v3044_v37, %v3047_v32  ;;  %v3066_v4 = vsel %vm3062_vm5, %v3050_v44, %v3065_v36  ;;  %v1478_v63 = vadd.s32 1, %v7498_v54  ;;  %vm7557_vm13 = vcmp.lt.s32.totalorder %v7556_v51, 0 }
 0x26c   : > { %v9804_v38 = vmul.f32 %v12648_v22, %v12647_v35  ;;  %v12445_v42 = vand.u32 2147483647, %v9737_v13  ;;  %v3135_v27 = vand.u32 2139095040, %v9770_v29  ;;  %v9819_v8 = vmul.f32 6.2831855, %v9258_v62 }
 0x26d   : > { %v9823_v19 = vshrl.u32 %v1316_v55, %v1332_v0  ;;  %v2980_v32 = vadd.s32 %v9602_v49, %v9614_v14  ;;  %vm1479_vm1 = vcmp.gt.s32.totalorder %v1478_v63, 0  ;;  %v1430_v44 = vsub.s32 0, %v9808_v11 }
 0x26e   : > { %12649 = vst [vmem:[#allocation82_spill] sm:$0xff] %v9819_v8  ;;  %v3067_v3 = vsel %vm3061_vm8, %v3064_v24, %v3066_v4  ;;  %v3086_v37 = vadd.s32 1, %v9781_v30  ;;  %v1480_v36 = vsel %vm1479_vm1, %v1478_v63, 0  ;;  %v9832_v54 = vsel %vm7557_vm13, 0, %v7556_v51 }
 0x26f   : > { %vm3085_vm14 = vc.u32 %v9788_v50, %v9780_v45  ;;  %v1482_v55 = vand.u32 31, %v1480_v36  ;;  %v2996_v0 = vsub.s32 32, %v9832_v54  ;;  %v1475_v49 = vand.u32 8388607, %v12445_v42 }
 0x270   : > { %v3136_v26 = vshrl.u32 %v3135_v27, 23  ;;  %v3083_v35 = vmul.u32 %v9750_v10, %v3067_v3  ;;  %v7495_v4 = vmin.u32 %v1430_v44, %v9808_v11  ;;  %v3087_v63 = vsel %vm3085_vm14, %v3086_v37, %v9781_v30 }
 0x271   : > { %v1483_v22 = vsub.s32 32, %v1482_v55  ;;  %v1485_v24 = vshll.u32 %v12561_v46, %v1482_v55  ;;  %v1488_v51 = vshll.u32 %v12562_v1, %v1482_v55  ;;  %v1491_v62 = vshll.u32 %v12563_v57, %v1482_v55 }
 0x272   : > { %v1494_v40 = vshll.u32 %v12564_v25, %v1482_v55  ;;  %v1481_v39 = vshrl.u32 %v1480_v36, 5  ;;  %v2997_v3 = vshll.u32 %v9711_v6, %v9832_v54  ;;  %v1476_v58 = vor.u32 8388608, %v1475_v49  ;;  %v9855_v36 = vpop.f32.mrb[14].mxu0 }
 0x273   : > { %v1486_v42 = vshrl.u32 %v12562_v1, %v1483_v22  ;;  %v1489_v27 = vshrl.u32 %v12563_v57, %v1483_v22  ;;  %v1492_v10 = vshrl.u32 %v12564_v25, %v1483_v22  ;;  %v1495_v14 = vshrl.u32 %v12557_v28, %v1483_v22 }
 0x274   : > { %v7562_v44 = vadd.s32 4294967169, %v3136_v26  ;;  %v3000_v30 = vsub.s32 4294967266, %v9832_v54  ;;  %v1497_v5 = vshll.u32 %v12557_v28, %v1482_v55  ;;  %v9857_v7 = vadd.s32 %v3087_v63, %v3083_v35 }
 0x275   : > { %v1487_v37 = vor.u32 %v1486_v42, %v1485_v24  ;;  %v1490_v12 = vor.u32 %v1489_v27, %v1488_v51  ;;  %v1484_v20 = vshrl.u32 %v12561_v46, %v1483_v22  ;;  %v1493_v15 = vor.u32 %v1492_v10, %v1491_v62 }
 0x276   : > { %v1496_v23 = vor.u32 %v1495_v14, %v1494_v40  ;;  %v1432_v2 = vclz %v7495_v4  ;;  %v1498_v6 = vshrl.u32 %v12558_v48, %v1483_v22  ;;  %vm1500_vm5 = vcmp.lt.s32.totalorder %v1481_v39, 1 }
 0x277   : > { %vm1502_vm8 = vcmp.lt.s32.totalorder %v1481_v39, 3  ;;  %vm1501_vm13 = vcmp.lt.s32.totalorder %v1481_v39, 2  ;;  %vm1503_vm1 = vcmp.lt.s32.totalorder %v1481_v39, 4  ;;  %v1516_v54 = vshll.u32 %v1476_v58, 8 }
 0x278   : > { %v3142_v42 = vadd.s32 1, %v7562_v44  ;;  %v1499_v49 = vor.u32 %v1498_v6, %v1497_v5  ;;  %v1505_v26 = vsel %vm1503_vm1, %v1493_v15, 2102212464  ;;  %v1508_v55 = vsel %vm1500_vm5, %v1487_v37, %v1490_v12 }
 0x279   : > { %v1509_v24 = vsel %vm1503_vm1, %v1496_v23, 920167782  ;;  %v2998_v35 = vshrl.u32 %v2980_v32, %v2996_v0  ;;  %v3089_v51 = vadd.s32 536870912, %v9857_v7  ;;  %v1504_v62 = vsel %vm1500_vm5, %v1484_v20, %v1487_v37 }
 0x27a   : > { %v1510_v40 = vsel %vm1502_vm8, %v1493_v15, %v1509_v24  ;;  %v1506_v14 = vsel %vm1502_vm8, %v1490_v12, %v1505_v26  ;;  %v1512_v4 = vsel %vm1500_vm5, %v1490_v12, %v1493_v15  ;;  %v1513_v58 = vsel %vm1503_vm1, %v1499_v49, 1326507024 }
 0x27b   : > { %v1511_v22 = vsel %vm1501_vm13, %v1508_v55, %v1510_v40  ;;  %v9868_v63 = vadd.s32 127, %v3000_v30  ;;  %v7496_v5 = vadd.s32 4294967294, %v1432_v2  ;;  %v1514_v27 = vsel %vm1502_vm8, %v1496_v23, %v1513_v58  ;;  %v9917_v58 = vpop.f32.mrb[14].mxu1 }
 0x27c   : > { %v12650_v32 = vand.u32 2147483647, %v9770_v29  ;;  %v1515_v10 = vsel %vm1501_vm13, %v1512_v4, %v1514_v27  ;;  %v9874_v20 = vmul.u32.u64.low %v1516_v54, %v1511_v22  ;;  %v9875_v44 = vmul.u32.u64.high %v1516_v54, %v1511_v22, %v9874_v20 }
 0x27d   : > { %vm3143_vm14 = vcmp.gt.s32.totalorder %v3142_v42, 0  ;;  %v1507_v37 = vsel %vm1501_vm13, %v1504_v62, %v1506_v14  ;;  %v9879_v6 = vmul.u32.u64.low %v1516_v54, %v1515_v10  ;;  %v9880_v15 = vmul.u32.u64.high %v1516_v54, %v1515_v10, %v9879_v6 }
 0x27e   : > { %v3139_v0 = vand.u32 8388607, %v12650_v32  ;;  %v1575_v12 = vand.u32 2139095040, %v9819_v8  ;;  %v12651_v23 = vand.u32 2147483647, %v9759_v17  ;;  %v12652_v30 = vcvt.s32.f32 %v9757_v43 }
 0x27f   : > { %v9890_v26 = vshrl.u32 %v3089_v51, 30  ;;  %v3144_v55 = vsel %vm3143_vm14, %v3142_v42, 0  ;;  %v12654_v39 = vshll.u32 %v9665_v60, %v9741_v56  ;;  %v12655_v62 = vshll.u32 %v9810_v21, 23 }
 0x280   : > { %v9888_v49 = vmul.f32 %v12652_v30, %v12651_v23  ;;  %vm7497_vm5 = vcmp.lt.s32.totalorder %v7496_v5, 0  ;;  %v3146_v14 = vand.u32 31, %v3144_v55  ;;  %v9902_v17 = vor.u32 %v2998_v35, %v2997_v3 }
 0x281   : > { %12653 = vst [vmem:[#allocation83_spill] sm:$0xff] %v9890_v26  ;;  %v9896_v24 = vor.u32 %v9823_v19, %v12654_v39  ;;  %v9900_v40 = vor.u32 4788187, %v12655_v62  ;;  %v1420_v43 = vadd.s32 %v9699_v18, %v9697_v59  ;;  %v1523_v51 = vmul.u32 %v1516_v54, %v1507_v37 }
 0x282   : > { %v1526_v42 = vadd.s32 1, %v9875_v44  ;;  %v3140_v56 = vor.u32 8388608, %v3139_v0  ;;  %v1576_v19 = vshrl.u32 %v1575_v12, 23  ;;  %v9909_v4 = vsel %vm7497_vm5, 0, %v7496_v5 }
 0x283   : > { %v3091_v21 = vshll.u32 %v9890_v26, 30  ;;  %vm1525_vm8 = vc.u32 %v9880_v15, %v9874_v20  ;;  %v3147_v3 = vsub.s32 32, %v3146_v14  ;;  %v3145_v59 = vshrl.u32 %v3144_v55, 5 }
 0x284   : > { %v1527_v35 = vsel %vm1525_vm8, %v1526_v42, %v9875_v44  ;;  %v3149_v18 = vshll.u32 %v12561_v46, %v3146_v14  ;;  %v3152_v54 = vshll.u32 %v12562_v1, %v3146_v14  ;;  %v3155_v0 = vshll.u32 %v12563_v57, %v3146_v14 }
 0x285   : > { %v1528_v27 = vadd.s32 %v1527_v35, %v1523_v51  ;;  %v3150_v32 = vshrl.u32 %v12562_v1, %v3147_v3  ;;  %v3153_v5 = vshrl.u32 %v12563_v57, %v3147_v3  ;;  %v1436_v10 = vsub.s32 32, %v9909_v4 }
 0x286   : > { %v3156_v37 = vshrl.u32 %v12564_v25, %v3147_v3  ;;  %v3158_v44 = vshll.u32 %v12564_v25, %v3146_v14  ;;  %v9925_v6 = vshll.u32 %v3140_v56, 8  ;;  %v9928_v12 = vsub.s32 %v9857_v7, %v3091_v21 }
 0x287   : > { %v3148_v23 = vshrl.u32 %v12561_v46, %v3147_v3  ;;  %v3159_v30 = vshrl.u32 %v12557_v28, %v3147_v3  ;;  %v7502_v55 = vadd.s32 4294967169, %v1576_v19  ;;  %v1529_v39 = vadd.s32 536870912, %v1528_v27 }
 0x288   : > { %v3151_v62 = vor.u32 %v3150_v32, %v3149_v18  ;;  %v3154_v51 = vor.u32 %v3153_v5, %v3152_v54  ;;  %v3161_v42 = vshll.u32 %v12557_v28, %v3146_v14  ;;  %v3157_v35 = vor.u32 %v3156_v37, %v3155_v0 }
 0x289   : > { %v3160_v2 = vor.u32 %v3159_v30, %v3158_v44  ;;  %v3162_v60 = vshrl.u32 %v12558_v48, %v3147_v3  ;;  %vm3164_vm13 = vcmp.lt.s32.totalorder %v3145_v59, 1  ;;  %v1437_v56 = vshll.u32 %v9808_v11, %v9909_v4 }
 0x28a   : > { %v1440_v7 = vsub.s32 4294967266, %v9909_v4  ;;  %vm3166_vm1 = vcmp.lt.s32.totalorder %v3145_v59, 3  ;;  %vm3167_vm14 = vcmp.lt.s32.totalorder %v3145_v59, 4  ;;  %v3094_v21 = vsub.s32 0, %v9928_v12 }
 0x28b   : > { %v3163_v19 = vor.u32 %v3162_v60, %v3161_v42  ;;  %vm3165_vm5 = vcmp.lt.s32.totalorder %v3145_v59, 2  ;;  %v3169_v18 = vsel %vm3167_vm14, %v3157_v35, 2102212464  ;;  %v9939_v54 = vshrl.u32 %v1529_v39, 30 }
 0x28c   : > { %v3172_v14 = vsel %vm3164_vm13, %v3151_v62, %v3154_v51  ;;  %v3173_v3 = vsel %vm3167_vm14, %v3160_v2, 920167782  ;;  %v1582_v32 = vadd.s32 1, %v7502_v55  ;;  %v3168_v5 = vsel %vm3164_vm13, %v3148_v23, %v3151_v62 }
 0x28d   : > { %12656 = vst [vmem:[#allocation84_spill] sm:$0xff] %v9939_v54  ;;  %v3170_v11 = vsel %vm3166_vm1, %v3154_v51, %v3169_v18  ;;  %v3174_v4 = vsel %vm3166_vm1, %v3157_v35, %v3173_v3  ;;  %v3176_v0 = vsel %vm3164_vm13, %v3154_v51, %v3157_v35  ;;  %v1438_v37 = vshrl.u32 %v1420_v43, %v1436_v10 }
 0x28e   : > { %v1441_v60 = vadd.s32 127, %v1440_v7  ;;  %v3175_v44 = vsel %vm3165_vm5, %v3172_v14, %v3174_v4  ;;  %v3177_v30 = vsel %vm3167_vm14, %v3163_v19, 1326507024  ;;  %v7559_v39 = vmin.u32 %v3094_v21, %v9928_v12 }
 0x28f   : > { %v3178_v42 = vsel %vm3166_vm1, %v3160_v2, %v3177_v30  ;;  %v9952_v55 = vmul.u32.u64.low %v9925_v6, %v3175_v44  ;;  %v9953_v22 = vmul.u32.u64.high %v9925_v6, %v3175_v44, %v9952_v55  ;;  %v1531_v23 = vshll.u32 %v9939_v54, 30 }
 0x290   : > { %v3171_v62 = vsel %vm3165_vm5, %v3168_v5, %v3170_v11  ;;  %v3179_v43 = vsel %vm3165_vm5, %v3176_v0, %v3178_v42  ;;  %vm1583_vm8 = vcmp.gt.s32.totalorder %v1582_v32, 0  ;;  %v12657_v21 = vshll.u32 %v9868_v63, 23 }
 0x291   : > { %v9961_v51 = vmul.u32.u64.low %v9925_v6, %v3179_v43  ;;  %v9962_v35 = vmul.u32.u64.high %v9925_v6, %v3179_v43, %v9961_v51  ;;  %v1584_v7 = vsel %vm1583_vm8, %v1582_v32, 0  ;;  %v9970_v3 = vor.u32 %v1438_v37, %v1437_v56 }
 0x292   : > { %v9967_v19 = vor.u32 4788187, %v12657_v21  ;;  %v1586_v14 = vand.u32 31, %v1584_v7  ;;  %v1442_v59 = vshll.u32 %v1441_v60, 23  ;;  %v3187_v5 = vmul.u32 %v9925_v6, %v3171_v62  ;;  %v9991_v51 = vpop.f32.mrb[15].mxu0 }
 0x293   : > { %v3190_v11 = vadd.s32 1, %v9953_v22  ;;  %v3096_v4 = vclz %v7559_v39  ;;  %v9974_v0 = vsub.s32 %v1528_v27, %v1531_v23  ;;  %v12658_v32 = vand.u32 2147483647, %v9819_v8 }
 0x294   : > { %v1587_v30 = vsub.s32 32, %v1586_v14  ;;  %vm3189_vm13 = vc.u32 %v9962_v35, %v9952_v55  ;;  %v9980_v63 = vshrl.u32 %v1584_v7, 5  ;;  %v1589_v56 = vshll.u32 %v12561_v46, %v1586_v14 }
 0x295   : > { %v1579_v44 = vand.u32 8388607, %v12658_v32  ;;  %v1592_v37 = vshll.u32 %v12562_v1, %v1586_v14  ;;  %v3191_v6 = vsel %vm3189_vm13, %v3190_v11, %v9953_v22  ;;  %v1598_v39 = vshll.u32 %v12564_v25, %v1586_v14 }
 0x296   : > { %v1590_v60 = vshrl.u32 %v12562_v1, %v1587_v30  ;;  %v1593_v27 = vshrl.u32 %v12563_v57, %v1587_v30  ;;  %v3192_v42 = vadd.s32 %v3191_v6, %v3187_v5  ;;  %v1595_v23 = vshll.u32 %v12563_v57, %v1586_v14 }
 0x297   : > { %v1596_v62 = vshrl.u32 %v12564_v25, %v1587_v30  ;;  %v1599_v43 = vshrl.u32 %v12557_v28, %v1587_v30  ;;  %v3004_v7 = vand.u32 2147483647, %v9967_v19  ;;  %v7560_v21 = vadd.s32 4294967294, %v3096_v4 }
 0x298   : > { %v1601_v22 = vshll.u32 %v12557_v28, %v1586_v14  ;;  %v9996_v11 = vmul.f32 6.2831855, %v9338_v34  ;;  %v1443_v32 = vor.u32 4788187, %v1442_v59  ;;  %v3084_v5 = vadd.s32 %v9780_v45, %v9788_v50 }
 0x299   : > { %v3193_v6 = vadd.s32 536870912, %v3192_v42  ;;  %v1580_v18 = vor.u32 8388608, %v1579_v44  ;;  %v1591_v10 = vor.u32 %v1590_v60, %v1589_v56  ;;  %v1594_v2 = vor.u32 %v1593_v27, %v1592_v37  ;;  %v12660_v56 = vld [vmem:[#allocation66_spill] sm:$0xff] }
 0x29a   : > { %v1600_v26 = vor.u32 %v1599_v43, %v1598_v39  ;;  %v1602_v54 = vshrl.u32 %v12558_v48, %v1587_v30  ;;  %v1446_v8 = vcvt.s32.f32 %v9970_v3  ;;  %v1534_v19 = vsub.s32 0, %v9974_v0 }
 0x29b   : > { %v1597_v4 = vor.u32 %v1596_v62, %v1595_v23  ;;  %vm1604_vm1 = vcmp.lt.s32.totalorder %v9980_v63, 1  ;;  %vm7561_vm14 = vcmp.lt.s32.totalorder %v7560_v21, 0  ;;  %vm1607_vm5 = vcmp.lt.s32.totalorder %v9980_v63, 4 }
 0x29c   : > { %v1603_v34 = vor.u32 %v1602_v54, %v1601_v22  ;;  %v3239_v45 = vand.u32 2139095040, %v9996_v11  ;;  %v1444_v50 = vand.u32 2147483647, %v1443_v32  ;;  %v10006_v14 = vshrl.u32 %v3193_v6, 30 }
 0x29d   : > { %vm1606_vm8 = vcmp.lt.s32.totalorder %v9980_v63, 3  ;;  %v10010_v59 = vmul.f32 6.2831855, %v9456_v31  ;;  %vm1605_vm13 = vcmp.lt.s32.totalorder %v9980_v63, 2  ;;  %v1612_v3 = vsel %vm1604_vm1, %v1591_v10, %v1594_v2 }
 0x29e   : > { %12659 = vst [vmem:[#allocation85_spill] sm:$0xff] %v10006_v14  ;;  %v1613_v54 = vsel %vm1607_vm5, %v1600_v26, 920167782  ;;  %v1620_v44 = vshll.u32 %v1580_v18, 8  ;;  %vm12465_vm0 = vcmp.lt.s32.totalorder %v9141_v33, 0  ;;  %vm12464_vm4 = vcmp.lt.s32.totalorder %v12660_v56, 0 }
 0x29f   : > { %v3099_v37 = vsel %vm7561_vm14, 0, %v7560_v21  ;;  %v7499_v60 = vmin.u32 %v1534_v19, %v9974_v0  ;;  %v1588_v27 = vshrl.u32 %v12561_v46, %v1587_v30  ;;  %v1616_v31 = vsel %vm1604_vm1, %v1594_v2, %v1597_v4 }
 0x2a0   : > { %v1609_v39 = vsel %vm1607_vm5, %v1597_v4, 2102212464  ;;  %v1614_v23 = vsel %vm1606_vm8, %v1597_v4, %v1613_v54  ;;  %v1617_v18 = vsel %vm1607_vm5, %v1603_v34, 1326507024  ;;  %v3240_v62 = vshrl.u32 %v3239_v45, 23 }
 0x2a1   : > { %v3100_v43 = vsub.s32 32, %v3099_v37  ;;  %v3195_v21 = vshll.u32 %v10006_v14, 30  ;;  %v1615_v22 = vsel %vm1605_vm13, %v1612_v3, %v1614_v23  ;;  %v1618_v30 = vsel %vm1606_vm8, %v1600_v26, %v1617_v18 }
 0x2a2   : > { %v1619_v32 = vsel %vm1605_vm13, %v1616_v31, %v1618_v30  ;;  %v10036_v6 = vmul.u32.u64.low %v1620_v44, %v1615_v22  ;;  %v10037_v19 = vmul.u32.u64.high %v1620_v44, %v1615_v22, %v10036_v6  ;;  %v7566_v4 = vadd.s32 4294967169, %v3240_v62 }
 0x2a3   : > { %v1608_v34 = vsel %vm1604_vm1, %v1588_v27, %v1591_v10  ;;  %v1610_v45 = vsel %vm1606_vm8, %v1594_v2, %v1609_v39  ;;  %v10044_v54 = vmul.u32.u64.low %v1620_v44, %v1619_v32  ;;  %v10045_v14 = vmul.u32.u64.high %v1620_v44, %v1619_v32, %v10044_v54 }
 0x2a4   : > { %v2904_v3 = vxor.u32 2147483648, %v9888_v49  ;;  %v12661_v26 = vand.u32 2147483647, %v9900_v40  ;;  %v12662_v31 = vcvt.s32.f32 %v9896_v24  ;;  %v1536_v18 = vclz %v7499_v60 }
 0x2a5   : > { %v3246_v22 = vadd.s32 1, %v7566_v4  ;;  %v12663_v62 = vcvt.s32.f32 %v9902_v17  ;;  %v10058_v10 = vmul.f32 %v1446_v8, %v1444_v50  ;;  %v3101_v2 = vshll.u32 %v9928_v12, %v3099_v37 }
 0x2a6   : > { %v10052_v23 = vmul.f32 %v12662_v31, %v12661_v26  ;;  %v10061_v27 = vsub.s32 %v3192_v42, %v3195_v21  ;;  %v3104_v39 = vsub.s32 4294967266, %v3099_v37  ;;  %v1611_v40 = vsel %vm1605_vm13, %v1608_v34, %v1610_v45 }
 0x2a7   : > { %v10056_v30 = vmul.f32 %v12663_v62, %v3004_v7  ;;  %v1630_v24 = vadd.s32 1, %v10037_v19  ;;  %vm3247_vm1 = vcmp.gt.s32.totalorder %v3246_v22, 0  ;;  %v3102_v32 = vshrl.u32 %v3084_v5, %v3100_v43 }
 0x2a8   : > { %vm1629_vm14 = vc.u32 %v10045_v14, %v10036_v6  ;;  %v12463_v17 = vand.u32 2147483647, %v9996_v11  ;;  %v1679_v8 = vand.u32 2139095040, %v10010_v59  ;;  %v12664_v12 = vxor.u32 2147483648, %v9804_v38 }
 0x2a9   : > { %v10080_v63 = vsel %vm12464_vm4, %v2904_v3, %v9888_v49  ;;  %v7500_v7 = vadd.s32 4294967294, %v1536_v18  ;;  %v3248_v5 = vsel %vm3247_vm1, %v3246_v22, 0  ;;  %v3198_v37 = vsub.s32 0, %v10061_v27  ;;  %v10104_v22 = vpop.f32.mrb[15].mxu1 }
 0x2aa   : > { %v10075_v42 = vsel %vm12465_vm0, %v12664_v12, %v9804_v38  ;;  %12665 = vst [vmem:[#allocation66_spill] sm:$0xff] %v10080_v63  ;;  %v1627_v60 = vmul.u32 %v1620_v44, %v1611_v40  ;;  %v3250_v43 = vand.u32 31, %v3248_v5  ;;  %v10088_v38 = vadd.s32 %v9874_v20, %v9880_v15 }
 0x2ab   : > { %v1631_v34 = vsel %vm1629_vm14, %v1630_v24, %v10037_v19  ;;  %v10091_v49 = vor.u32 %v3102_v32, %v3101_v2  ;;  %v10093_v45 = vadd.s32 127, %v3104_v39  ;;  %v3243_v54 = vand.u32 8388607, %v12463_v17 }
 0x2ac   : > { %v1680_v3 = vshrl.u32 %v1679_v8, 23  ;;  %vm7501_vm5 = vcmp.lt.s32.totalorder %v7500_v7, 0  ;;  %v3251_v44 = vsub.s32 32, %v3250_v43  ;;  %v3253_v26 = vshll.u32 %v12561_v46, %v3250_v43 }
 0x2ad   : > { %v3256_v31 = vshll.u32 %v12562_v1, %v3250_v43  ;;  %v7563_v18 = vmin.u32 %v3198_v37, %v10061_v27  ;;  %v10100_v20 = vadd.s32 %v1631_v34, %v1627_v60  ;;  %v3259_v15 = vshll.u32 %v12563_v57, %v3250_v43 }
 0x2ae   : > { %v3262_v19 = vshll.u32 %v12564_v25, %v3250_v43  ;;  %v3249_v62 = vshrl.u32 %v3248_v5, 5  ;;  %v3254_v2 = vshrl.u32 %v12562_v1, %v3251_v44  ;;  %v3257_v39 = vshrl.u32 %v12563_v57, %v3251_v44 }
 0x2af   : > { %v3260_v40 = vshrl.u32 %v12564_v25, %v3251_v44  ;;  %v3106_v24 = vshll.u32 %v10093_v45, 23  ;;  %v3244_v32 = vor.u32 8388608, %v3243_v54  ;;  %v3263_v8 = vshrl.u32 %v12557_v28, %v3251_v44 }
 0x2b0   : > { %v7506_v12 = vadd.s32 4294967169, %v1680_v3  ;;  %v10112_v37 = vsel %vm7501_vm5, 0, %v7500_v7  ;;  %v3255_v60 = vor.u32 %v3254_v2, %v3253_v26  ;;  %v3258_v34 = vor.u32 %v3257_v39, %v3256_v31 }
 0x2b1   : > { %v3265_v17 = vshll.u32 %v12557_v28, %v3250_v43  ;;  %vm12508_vm8 = vcmp.lt.s32.totalorder %v9347_v41, 0  ;;  %vm12489_vm13 = vcmp.lt.s32.totalorder %v9380_v16, 0  ;;  %vm12486_vm1 = vcmp.lt.s32.totalorder %v9561_v61, 0 }
 0x2b2   : > { %v1633_v5 = vadd.s32 536870912, %v10100_v20  ;;  %v3252_v45 = vshrl.u32 %v12561_v46, %v3251_v44  ;;  %v3261_v54 = vor.u32 %v3260_v40, %v3259_v15  ;;  %v3264_v4 = vor.u32 %v3263_v8, %v3262_v19 }
 0x2b3   : > { %v3200_v3 = vclz %v7563_v18  ;;  %v3266_v7 = vshrl.u32 %v12558_v48, %v3251_v44  ;;  %vm3268_vm14 = vcmp.lt.s32.totalorder %v3249_v62, 1  ;;  %vm3270_vm5 = vcmp.lt.s32.totalorder %v3249_v62, 3 }
 0x2b4   : > { %vm3269_vm4 = vcmp.lt.s32.totalorder %v3249_v62, 2  ;;  %vm3271_vm0 = vcmp.lt.s32.totalorder %v3249_v62, 4  ;;  %v3284_v43 = vshll.u32 %v3244_v32, 8  ;;  %v1686_v26 = vadd.s32 1, %v7506_v12 }
 0x2b5   : > { %v3267_v31 = vor.u32 %v3266_v7, %v3265_v17  ;;  %v3273_v2 = vsel %vm3271_vm0, %v3261_v54, 2102212464  ;;  %v3276_v39 = vsel %vm3268_vm14, %v3255_v60, %v3258_v34  ;;  %v3277_v21 = vsel %vm3271_vm0, %v3264_v4, 920167782 }
 0x2b6   : > { %v10122_v50 = vshrl.u32 %v1633_v5, 30  ;;  %v3272_v63 = vsel %vm3268_vm14, %v3252_v45, %v3255_v60  ;;  %v3278_v15 = vsel %vm3270_vm5, %v3261_v54, %v3277_v21  ;;  %v12467_v18 = vand.u32 2147483647, %v10010_v59 }
 0x2b7   : > { %v3274_v44 = vsel %vm3270_vm5, %v3258_v34, %v3273_v2  ;;  %v3279_v19 = vsel %vm3269_vm4, %v3276_v39, %v3278_v15  ;;  %v3280_v40 = vsel %vm3268_vm14, %v3258_v34, %v3261_v54  ;;  %v3281_v32 = vsel %vm3271_vm0, %v3267_v31, 1326507024 }
 0x2b8   : > { %12666 = vst [vmem:[#allocation86_spill] sm:$0xff] %v10122_v50  ;;  %v1540_v17 = vsub.s32 32, %v10112_v37  ;;  %v1544_v8 = vsub.s32 4294967266, %v10112_v37  ;;  %v7564_v12 = vadd.s32 4294967294, %v3200_v3  ;;  %v3282_v5 = vsel %vm3270_vm5, %v3264_v4, %v3281_v32 }
 0x2b9   : > { %v3283_v60 = vsel %vm3269_vm4, %v3280_v40, %v3282_v5  ;;  %v10134_v45 = vmul.u32.u64.low %v3284_v43, %v3279_v19  ;;  %v10135_v21 = vmul.u32.u64.high %v3284_v43, %v3279_v19, %v10134_v45  ;;  %vm1687_vm12 = vcmp.gt.s32.totalorder %v1686_v26, 0 }
 0x2ba   : > { %v1635_v7 = vshll.u32 %v10122_v50, 30  ;;  %v3275_v2 = vsel %vm3269_vm4, %v3272_v63, %v3274_v44  ;;  %v10140_v34 = vmul.u32.u64.low %v3284_v43, %v3283_v60  ;;  %v10141_v54 = vmul.u32.u64.high %v3284_v43, %v3283_v60, %v10140_v34 }
 0x2bb   : > { %v12667_v31 = vxor.u32 2147483648, %v10052_v23  ;;  %v12669_v3 = vxor.u32 2147483648, %v10056_v30  ;;  %v12671_v63 = vxor.u32 2147483648, %v10058_v10  ;;  %v1688_v15 = vsel %vm1687_vm12, %v1686_v26, 0 }
 0x2bc   : > { %v10164_v44 = vor.u32 4788187, %v3106_v24  ;;  %vm7565_vm4 = vcmp.lt.s32.totalorder %v7564_v12, 0  ;;  %v1690_v19 = vand.u32 31, %v1688_v15  ;;  %v3291_v32 = vmul.u32 %v3284_v43, %v3275_v2 }
 0x2bd   : > { %v10148_v4 = vsel %vm12508_vm8, %v12667_v31, %v10052_v23  ;;  %v10155_v39 = vsel %vm12489_vm13, %v12669_v3, %v10056_v30  ;;  %v10162_v62 = vsel %vm12486_vm1, %v12671_v63, %v10058_v10  ;;  %v10171_v30 = vadd.s32 %v9952_v55, %v9962_v35 }
 0x2be   : > { %12668 = vst [vmem:[#allocation87_spill] sm:$0xff] %v10148_v4  ;;  %12670 = vst [vmem:[#allocation88_spill] sm:$0xff] %v10155_v39  ;;  %v3294_v5 = vadd.s32 1, %v10135_v21  ;;  %v10175_v10 = vshrl.u32 %v10088_v38, %v1540_v17  ;;  %v10177_v26 = vadd.s32 127, %v1544_v8  ;;  %v10180_v24 = vsub.s32 %v10100_v20, %v1635_v7 }
 0x2bf   : > { %12672 = vst [vmem:[#allocation89_spill] sm:$0xff] %v10162_v62  ;;  %v1683_v60 = vand.u32 8388607, %v12467_v18  ;;  %v10184_v34 = vsel %vm7565_vm4, 0, %v7564_v12  ;;  %vm3293_vm12 = vc.u32 %v10141_v54, %v10134_v45  ;;  %v1691_v55 = vsub.s32 32, %v1690_v19 }
 0x2c0   : > { %v10189_v35 = vmul.f32 6.2831855, %v9566_v53  ;;  %v3295_v38 = vsel %vm3293_vm12, %v3294_v5, %v10135_v21  ;;  %v1693_v43 = vshll.u32 %v12561_v46, %v1690_v19  ;;  %v1696_v17 = vshll.u32 %v12562_v1, %v1690_v19 }
 0x2c1   : > { %v1699_v20 = vshll.u32 %v12563_v57, %v1690_v19  ;;  %v3296_v8 = vadd.s32 %v3295_v38, %v3291_v32  ;;  %v1689_v7 = vshrl.u32 %v1688_v15, 5  ;;  %v1694_v12 = vshrl.u32 %v12562_v1, %v1691_v55 }
 0x2c2   : > { %v1697_v2 = vshrl.u32 %v12563_v57, %v1691_v55  ;;  %v1638_v31 = vsub.s32 0, %v10180_v24  ;;  %v1684_v3 = vor.u32 8388608, %v1683_v60  ;;  %v1700_v53 = vshrl.u32 %v12564_v25, %v1691_v55 }
 0x2c3   : > { %v1702_v63 = vshll.u32 %v12564_v25, %v1690_v19  ;;  %v3297_v21 = vadd.s32 536870912, %v3296_v8  ;;  %v1692_v5 = vshrl.u32 %v12561_v46, %v1691_v55  ;;  %v1703_v18 = vshrl.u32 %v12557_v28, %v1691_v55 }
 0x2c4   : > { %v3343_v23 = vand.u32 2139095040, %v10189_v35  ;;  %v1695_v32 = vor.u32 %v1694_v12, %v1693_v43  ;;  %v1698_v15 = vor.u32 %v1697_v2, %v1696_v17  ;;  %v1701_v38 = vor.u32 %v1700_v53, %v1699_v20 }
 0x2c5   : > { %v1705_v40 = vshll.u32 %v12557_v28, %v1690_v19  ;;  %v10204_v50 = vshrl.u32 %v3297_v21, 30  ;;  %v1704_v62 = vor.u32 %v1703_v18, %v1702_v63  ;;  %v1706_v60 = vshrl.u32 %v12558_v48, %v1691_v55 }
 0x2c6   : > { %vm1708_vm0 = vcmp.lt.s32.totalorder %v1689_v7, 1  ;;  %v3208_v61 = vsub.s32 4294967266, %v10184_v34  ;;  %vm1710_vm14 = vcmp.lt.s32.totalorder %v1689_v7, 3  ;;  %vm1711_vm5 = vcmp.lt.s32.totalorder %v1689_v7, 4 }
 0x2c7   : > { %12673 = vst [vmem:[#allocation90_spill] sm:$0xff] %v10204_v50  ;;  %v1724_v39 = vshll.u32 %v1684_v3, 8  ;;  %v3299_v16 = vshll.u32 %v10204_v50, 30  ;;  %v1707_v4 = vor.u32 %v1706_v60, %v1705_v40  ;;  %vm1709_vm4 = vcmp.lt.s32.totalorder %v1689_v7, 2 }
 0x2c8   : > { %v1713_v43 = vsel %vm1711_vm5, %v1701_v38, 2102212464  ;;  %v7503_v17 = vmin.u32 %v1638_v31, %v10180_v24  ;;  %v1716_v19 = vsel %vm1708_vm0, %v1695_v32, %v1698_v15  ;;  %v1717_v18 = vsel %vm1711_vm5, %v1704_v62, 920167782 }
 0x2c9   : > { %v3344_v20 = vshrl.u32 %v3343_v23, 23  ;;  %v1712_v55 = vsel %vm1708_vm0, %v1692_v5, %v1695_v32  ;;  %v1714_v12 = vsel %vm1710_vm14, %v1698_v15, %v1713_v43  ;;  %v1718_v2 = vsel %vm1710_vm14, %v1701_v38, %v1717_v18 }
 0x2ca   : > { %v1720_v3 = vsel %vm1708_vm0, %v1698_v15, %v1701_v38  ;;  %v1546_v40 = vshll.u32 %v10177_v26, 23  ;;  %v3204_v53 = vsub.s32 32, %v10184_v34  ;;  %v1719_v63 = vsel %vm1709_vm4, %v1716_v19, %v1718_v2 }
 0x2cb   : > { %v1721_v31 = vsel %vm1711_vm5, %v1707_v4, 1326507024  ;;  %v10221_v21 = vsub.s32 %v3296_v8, %v3299_v16  ;;  %v10224_v60 = vmul.u32.u64.low %v1724_v39, %v1719_v63  ;;  %v10225_v5 = vmul.u32.u64.high %v1724_v39, %v1719_v63, %v10224_v60 }
 0x2cc   : > { %v1722_v23 = vsel %vm1710_vm14, %v1704_v62, %v1721_v31  ;;  %v1640_v32 = vclz %v7503_v17  ;;  %v1715_v43 = vsel %vm1709_vm4, %v1712_v55, %v1714_v12  ;;  %v7570_v26 = vadd.s32 4294967169, %v3344_v20 }
 0x2cd   : > { %v1723_v15 = vsel %vm1709_vm4, %v1720_v3, %v1722_v23  ;;  %v3108_v38 = vand.u32 2147483647, %v10164_v44  ;;  %v3209_v18 = vadd.s32 127, %v3208_v61  ;;  %v12674_v16 = vshll.u32 %v9974_v0, %v10112_v37 }
 0x2ce   : > { %v10231_v19 = vmul.u32.u64.low %v1724_v39, %v1723_v15  ;;  %v10232_v2 = vmul.u32.u64.high %v1724_v39, %v1723_v15, %v10231_v19  ;;  %v10240_v62 = vor.u32 4788187, %v1546_v40  ;;  %v12474_v8 = vand.u32 2147483647, %v10189_v35 }
 0x2cf   : > { %v10238_v4 = vor.u32 %v10175_v10, %v12674_v16  ;;  %v3350_v17 = vadd.s32 1, %v7570_v26  ;;  %v3205_v7 = vshll.u32 %v10061_v27, %v10184_v34  ;;  %v3302_v44 = vsub.s32 0, %v10221_v21 }
 0x2d0   : > { %v1731_v61 = vmul.u32 %v1724_v39, %v1715_v43  ;;  %v1734_v20 = vadd.s32 1, %v10225_v5  ;;  %v3206_v55 = vshrl.u32 %v10171_v30, %v3204_v53  ;;  %v7504_v12 = vadd.s32 4294967294, %v1640_v32 }
 0x2d1   : > { %vm3351_vm12 = vcmp.gt.s32.totalorder %v3350_v17, 0  ;;  %v10249_v0 = vmul.f32 6.2831855, %v9668_v9  ;;  %v12676_v37 = vcvt.s32.f32 %v10091_v49  ;;  %v3210_v3 = vshll.u32 %v3209_v18, 23 }
 0x2d2   : > { %vm1733_vm0 = vc.u32 %v10232_v2, %v10224_v60  ;;  %v3352_v27 = vsel %vm3351_vm12, %v3350_v17, 0  ;;  %v1628_v9 = vadd.s32 %v10036_v6, %v10045_v14  ;;  %v7567_v53 = vmin.u32 %v3302_v44, %v10221_v21 }
 0x2d3   : > { %12675 = vst [vmem:[#allocation91_spill] sm:$0xff] %v10249_v0  ;;  %v10253_v10 = vmul.f32 %v12676_v37, %v3108_v38  ;;  %v1735_v30 = vsel %vm1733_vm0, %v1734_v20, %v10225_v5  ;;  %v3354_v40 = vand.u32 31, %v3352_v27  ;;  %v3347_v63 = vand.u32 8388607, %v12474_v8 }
 0x2d4   : > { %v1736_v49 = vadd.s32 %v1735_v30, %v1731_v61  ;;  %v10265_v31 = vor.u32 %v3206_v55, %v3205_v7  ;;  %vm7505_vm14 = vcmp.lt.s32.totalorder %v7504_v12, 0  ;;  %v1783_v32 = vand.u32 2139095040, %v10249_v0 }
 0x2d5   : > { %v3355_v23 = vsub.s32 32, %v3354_v40  ;;  %v10268_v43 = vor.u32 4788187, %v3210_v3  ;;  %v3357_v5 = vshll.u32 %v12561_v46, %v3354_v40  ;;  %v3360_v26 = vshll.u32 %v12562_v1, %v3354_v40 }
 0x2d6   : > { %v1737_v15 = vadd.s32 536870912, %v1736_v49  ;;  %v3353_v14 = vshrl.u32 %v3352_v27, 5  ;;  %v3363_v18 = vshll.u32 %v12563_v57, %v3354_v40  ;;  %v1643_v19 = vsel %vm7505_vm14, 0, %v7504_v12 }
 0x2d7   : > { %v3358_v6 = vshrl.u32 %v12562_v1, %v3355_v23  ;;  %v3361_v38 = vshrl.u32 %v12563_v57, %v3355_v23  ;;  %v3304_v16 = vclz %v7567_v53  ;;  %v3348_v17 = vor.u32 8388608, %v3347_v63 }
 0x2d8   : > { %v3364_v7 = vshrl.u32 %v12564_v25, %v3355_v23  ;;  %v1644_v44 = vsub.s32 32, %v1643_v19  ;;  %v3366_v61 = vshll.u32 %v12564_v25, %v3354_v40  ;;  %v3367_v20 = vshrl.u32 %v12557_v28, %v3355_v23 }
 0x2d9   : > { %v1784_v55 = vshrl.u32 %v1783_v32, 23  ;;  %v10278_v37 = vshrl.u32 %v1737_v15, 30  ;;  %v3359_v3 = vor.u32 %v3358_v6, %v3357_v5  ;;  %v3362_v27 = vor.u32 %v3361_v38, %v3360_v26 }
 0x2da   : > { %v3365_v30 = vor.u32 %v3364_v7, %v3363_v18  ;;  %v3368_v8 = vor.u32 %v3367_v20, %v3366_v61  ;;  %v3369_v34 = vshll.u32 %v12557_v28, %v3354_v40  ;;  %v3370_v12 = vshrl.u32 %v12558_v48, %v3355_v23 }
 0x2db   : > { %12677 = vst [vmem:[#allocation92_spill] sm:$0xff] %v10278_v37  ;;  %vm3372_vm5 = vcmp.lt.s32.totalorder %v3353_v14, 1  ;;  %v1645_v53 = vshll.u32 %v10180_v24, %v1643_v19  ;;  %v1648_v63 = vsub.s32 4294967266, %v1643_v19  ;;  %v7568_v39 = vadd.s32 4294967294, %v3304_v16 }
 0x2dc   : > { %v10283_v50 = vshll.u32 %v3348_v17, 8  ;;  %v3371_v41 = vor.u32 %v3370_v12, %v3369_v34  ;;  %vm3374_vm4 = vcmp.lt.s32.totalorder %v3353_v14, 3  ;;  %vm3375_vm12 = vcmp.lt.s32.totalorder %v3353_v14, 4 }
 0x2dd   : > { %v7510_v32 = vadd.s32 4294967169, %v1784_v55  ;;  %v1739_v15 = vshll.u32 %v10278_v37, 30  ;;  %v3356_v5 = vshrl.u32 %v12561_v46, %v3355_v23  ;;  %vm3373_vm0 = vcmp.lt.s32.totalorder %v3353_v14, 2 }
 0x2de   : > { %v3380_v40 = vsel %vm3372_vm5, %v3359_v3, %v3362_v27  ;;  %v3377_v26 = vsel %vm3375_vm12, %v3365_v30, 2102212464  ;;  %v3381_v6 = vsel %vm3375_vm12, %v3368_v8, 920167782  ;;  %v3384_v38 = vsel %vm3372_vm5, %v3362_v27, %v3365_v30 }
 0x2df   : > { %v3385_v24 = vsel %vm3375_vm12, %v3371_v41, 1326507024  ;;  %v1646_v18 = vshrl.u32 %v1628_v9, %v1644_v44  ;;  %v1649_v19 = vadd.s32 127, %v1648_v63  ;;  %v3382_v16 = vsel %vm3374_vm4, %v3365_v30, %v3381_v6 }
 0x2e0   : > { %v12479_v34 = vand.u32 2147483647, %v10249_v0  ;;  %vm7569_vm14 = vcmp.lt.s32.totalorder %v7568_v39, 0  ;;  %v3383_v17 = vsel %vm3373_vm0, %v3380_v40, %v3382_v16  ;;  %v3386_v7 = vsel %vm3374_vm4, %v3368_v8, %v3385_v24 }
 0x2e1   : > { %v1790_v23 = vadd.s32 1, %v7510_v32  ;;  %v10293_v61 = vsub.s32 %v1736_v49, %v1739_v15  ;;  %v3376_v20 = vsel %vm3372_vm5, %v3356_v5, %v3359_v3  ;;  %v3378_v55 = vsel %vm3374_vm4, %v3362_v27, %v3377_v26 }
 0x2e2   : > { %v3387_v41 = vsel %vm3373_vm0, %v3384_v38, %v3386_v7  ;;  %v10303_v30 = vmul.u32.u64.low %v10283_v50, %v3383_v17  ;;  %v10304_v12 = vmul.u32.u64.high %v10283_v50, %v3383_v17, %v10303_v30  ;;  %v12678_v49 = vand.u32 2147483647, %v10240_v62 }
 0x2e3   : > { %v10299_v9 = vmul.u32.u64.low %v10283_v50, %v3387_v41  ;;  %v10300_v44 = vmul.u32.u64.high %v10283_v50, %v3387_v41, %v10299_v9  ;;  %v12679_v63 = vcvt.s32.f32 %v10238_v4  ;;  %v1650_v27 = vshll.u32 %v1649_v19, 23 }
 0x2e4   : > { %vm1791_vm5 = vcmp.gt.s32.totalorder %v1790_v23, 0  ;;  %v3379_v5 = vsel %vm3373_vm0, %v3376_v20, %v3378_v55  ;;  %v10318_v26 = vsel %vm7569_vm14, 0, %v7568_v39  ;;  %v1742_v6 = vsub.s32 0, %v10293_v61 }
 0x2e5   : > { %v10312_v3 = vmul.f32 %v12679_v63, %v12678_v49  ;;  %v1792_v40 = vsel %vm1791_vm5, %v1790_v23, 0  ;;  %v1787_v62 = vand.u32 8388607, %v12479_v34  ;;  %v10323_v38 = vor.u32 %v1646_v18, %v1645_v53 }
 0x2e6   : > { %v1794_v4 = vand.u32 31, %v1792_v40  ;;  %v3292_v24 = vadd.s32 %v10134_v45, %v10141_v54  ;;  %vm3397_vm4 = vc.u32 %v10300_v44, %v10303_v30  ;;  %v3398_v14 = vadd.s32 1, %v10304_v12 }
 0x2e7   : > { %v10330_v19 = vor.u32 4788187, %v1650_v27  ;;  %v3395_v39 = vmul.u32 %v10283_v50, %v3379_v5  ;;  %v10334_v17 = vmul.f32 6.2831855, %v9724_v52  ;;  %v3312_v7 = vsub.s32 4294967266, %v10318_v26 }
 0x2e8   : > { %v1795_v16 = vsub.s32 32, %v1794_v4  ;;  %v3399_v53 = vsel %vm3397_vm4, %v3398_v14, %v10304_v12  ;;  %v1797_v18 = vshll.u32 %v12561_v46, %v1794_v4  ;;  %v1800_v45 = vshll.u32 %v12562_v1, %v1794_v4 }
 0x2e9   : > { %12680 = vst [vmem:[#allocation93_spill] sm:$0xff] %v10334_v17  ;;  %v7507_v54 = vmin.u32 %v1742_v6, %v10293_v61  ;;  %v1788_v23 = vor.u32 8388608, %v1787_v62  ;;  %v1793_v20 = vshrl.u32 %v1792_v40, 5  ;;  %v1803_v55 = vshll.u32 %v12563_v57, %v1794_v4 }
 0x2ea   : > { %v1798_v50 = vshrl.u32 %v12562_v1, %v1795_v16  ;;  %v1801_v41 = vshrl.u32 %v12563_v57, %v1795_v16  ;;  %v1804_v52 = vshrl.u32 %v12564_v25, %v1795_v16  ;;  %v1806_v9 = vshll.u32 %v12564_v25, %v1794_v4 }
 0x2eb   : > { %v3308_v12 = vsub.s32 32, %v10318_v26  ;;  %v10347_v49 = vadd.s32 %v3399_v53, %v3395_v39  ;;  %v1796_v63 = vshrl.u32 %v12561_v46, %v1795_v16  ;;  %v1807_v27 = vshrl.u32 %v12557_v28, %v1795_v16 }
 0x2ec   : > { %v3313_v5 = vadd.s32 127, %v3312_v7  ;;  %v1799_v40 = vor.u32 %v1798_v50, %v1797_v18  ;;  %v1802_v6 = vor.u32 %v1801_v41, %v1800_v45  ;;  %v1809_v62 = vshll.u32 %v12557_v28, %v1794_v4 }
 0x2ed   : > { %vm12485_vm12 = vcmp.lt.s32.totalorder %v9633_v47, 0  ;;  %v1744_v14 = vclz %v7507_v54  ;;  %v1805_v34 = vor.u32 %v1804_v52, %v1803_v55  ;;  %v1808_v8 = vor.u32 %v1807_v27, %v1806_v9 }
 0x2ee   : > { %v1828_v15 = vshll.u32 %v1788_v23, 8  ;;  %v1810_v32 = vshrl.u32 %v12558_v48, %v1795_v16  ;;  %vm1812_vm0 = vcmp.lt.s32.totalorder %v1793_v20, 1  ;;  %vm1814_vm14 = vcmp.lt.s32.totalorder %v1793_v20, 3 }
 0x2ef   : > { %v3447_v39 = vand.u32 2139095040, %v10334_v17  ;;  %v3401_v53 = vadd.s32 536870912, %v10347_v49  ;;  %vm1813_vm5 = vcmp.lt.s32.totalorder %v1793_v20, 2  ;;  %vm1815_vm4 = vcmp.lt.s32.totalorder %v1793_v20, 4 }
 0x2f0   : > { %v1816_v7 = vsel %vm1812_vm0, %v1796_v63, %v1799_v40  ;;  %v1811_v18 = vor.u32 %v1810_v32, %v1809_v62  ;;  %v1817_v4 = vsel %vm1815_vm4, %v1805_v34, 2102212464  ;;  %v1820_v45 = vsel %vm1812_vm0, %v1799_v40, %v1802_v6 }
 0x2f1   : > { %v1821_v54 = vsel %vm1815_vm4, %v1808_v8, 920167782  ;;  %v3309_v23 = vshll.u32 %v10221_v21, %v10318_v26  ;;  %v3310_v55 = vshrl.u32 %v3292_v24, %v3308_v12  ;;  %v1818_v16 = vsel %vm1814_vm14, %v1802_v6, %v1817_v4 }
 0x2f2   : > { %v1822_v50 = vsel %vm1814_vm14, %v1805_v34, %v1821_v54  ;;  %v3314_v41 = vshll.u32 %v3313_v5, 23  ;;  %v1824_v9 = vsel %vm1812_vm0, %v1802_v6, %v1805_v34  ;;  %v1825_v27 = vsel %vm1815_vm4, %v1811_v18, 1326507024 }
 0x2f3   : > { %v1823_v52 = vsel %vm1813_vm5, %v1820_v45, %v1822_v50  ;;  %v7508_v63 = vadd.s32 4294967294, %v1744_v14  ;;  %v10364_v32 = vshrl.u32 %v3401_v53, 30  ;;  %v1819_v40 = vsel %vm1813_vm5, %v1816_v7, %v1818_v16 }
 0x2f4   : > { %v1826_v62 = vsel %vm1814_vm14, %v1808_v8, %v1825_v27  ;;  %v10369_v26 = vmul.u32.u64.low %v1828_v15, %v1823_v52  ;;  %v10370_v24 = vmul.u32.u64.high %v1828_v15, %v1823_v52, %v10369_v26  ;;  %v3448_v12 = vshrl.u32 %v3447_v39, 23 }
 0x2f5   : > { %12681 = vst [vmem:[#allocation94_spill] sm:$0xff] %v10364_v32  ;;  %v1827_v21 = vsel %vm1813_vm5, %v1824_v9, %v1826_v62  ;;  %v12682_v5 = vand.u32 2147483647, %v10268_v43  ;;  %v12683_v4 = vcvt.s32.f32 %v10265_v31  ;;  %v10383_v53 = vmul.f32 6.2831855, %v9855_v36 }
 0x2f6   : > { %v10379_v6 = vmul.u32.u64.low %v1828_v15, %v1827_v21  ;;  %v10380_v14 = vmul.u32.u64.high %v1828_v15, %v1827_v21, %v10379_v6  ;;  %v12684_v8 = vxor.u32 2147483648, %v10253_v10  ;;  %v1652_v39 = vand.u32 2147483647, %v10330_v19 }
 0x2f7   : > { %v10377_v34 = vmul.f32 %v12683_v4, %v12682_v5  ;;  %v1654_v43 = vcvt.s32.f32 %v10323_v38  ;;  %v7574_v31 = vadd.s32 4294967169, %v3448_v12  ;;  %v10395_v18 = vor.u32 %v3310_v55, %v3309_v23 }
 0x2f8   : > { %v10390_v20 = vsel %vm12485_vm12, %v12684_v8, %v10253_v10  ;;  %v3403_v45 = vshll.u32 %v10364_v32, 30  ;;  %v1835_v36 = vmul.u32 %v1828_v15, %v1819_v40  ;;  %v10398_v54 = vor.u32 4788187, %v3314_v41 }
 0x2f9   : > { %12685 = vst [vmem:[#allocation95_spill] sm:$0xff] %v10390_v20  ;;  %vm7509_vm0 = vcmp.lt.s32.totalorder %v7508_v63, 0  ;;  %v1838_v16 = vadd.s32 1, %v10370_v24  ;;  %v3454_v50 = vadd.s32 1, %v7574_v31  ;;  %vm1837_vm14 = vc.u32 %v10380_v14, %v10369_v26 }
 0x2fa   : > { %v12480_v38 = vand.u32 2147483647, %v10334_v17  ;;  %v1887_v19 = vand.u32 2139095040, %v10383_v53  ;;  %v10406_v23 = vmul.f32 %v1654_v43, %v1652_v39  ;;  %v10410_v15 = vmul.f32 6.2831855, %v9917_v58 }
 0x2fb   : > { %v1839_v55 = vsel %vm1837_vm14, %v1838_v16, %v10370_v24  ;;  %vm3455_vm5 = vcmp.gt.s32.totalorder %v3454_v50, 0  ;;  %v10412_v41 = vsel %vm7509_vm0, 0, %v7508_v63  ;;  %v10415_v52 = vsub.s32 %v10347_v49, %v3403_v45 }
 0x2fc   : > { %12686 = vst [vmem:[#allocation96_spill] sm:$0xff] %v10410_v15  ;;  %v1840_v9 = vadd.s32 %v1839_v55, %v1835_v36  ;;  %v3456_v27 = vsel %vm3455_vm5, %v3454_v50, 0  ;;  %v1732_v21 = vadd.s32 %v10224_v60, %v10232_v2  ;;  %v3451_v58 = vand.u32 8388607, %v12480_v38 }
 0x2fd   : > { %v3458_v12 = vand.u32 31, %v3456_v27  ;;  %v1888_v5 = vshrl.u32 %v1887_v19, 23  ;;  %v1752_v49 = vsub.s32 4294967266, %v10412_v41  ;;  %v3406_v39 = vsub.s32 0, %v10415_v52 }
 0x2fe   : > { %v1841_v24 = vadd.s32 536870912, %v1840_v9  ;;  %v3457_v31 = vshrl.u32 %v3456_v27, 5  ;;  %v1748_v50 = vsub.s32 32, %v10412_v41  ;;  %v3452_v19 = vor.u32 8388608, %v3451_v58 }
 0x2ff   : > { %v3459_v4 = vsub.s32 32, %v3458_v12  ;;  %v3461_v6 = vshll.u32 %v12561_v46, %v3458_v12  ;;  %v3464_v8 = vshll.u32 %v12562_v1, %v3458_v12  ;;  %v3467_v60 = vshll.u32 %v12563_v57, %v3458_v12 }
 0x300   : > { %v10428_v43 = vshrl.u32 %v1841_v24, 30  ;;  %v3470_v2 = vshll.u32 %v12564_v25, %v3458_v12  ;;  %v7514_v38 = vadd.s32 4294967169, %v1888_v5  ;;  %v1753_v62 = vadd.s32 127, %v1752_v49 }
 0x301   : > { %v3462_v45 = vshrl.u32 %v12562_v1, %v3459_v4  ;;  %v3465_v36 = vshrl.u32 %v12563_v57, %v3459_v4  ;;  %v3468_v16 = vshrl.u32 %v12564_v25, %v3459_v4  ;;  %v3471_v55 = vshrl.u32 %v12557_v28, %v3459_v4 }
 0x302   : > { %12687 = vst [vmem:[#allocation97_spill] sm:$0xff] %v10428_v43  ;;  %v3473_v10 = vshll.u32 %v12557_v28, %v3458_v12  ;;  %vm12507_vm4 = vcmp.lt.s32.totalorder %v9737_v13, 0  ;;  %v1843_v27 = vshll.u32 %v10428_v43, 30  ;;  %v3460_v63 = vshrl.u32 %v12561_v46, %v3459_v4 }
 0x303   : > { %v3463_v24 = vor.u32 %v3462_v45, %v3461_v6  ;;  %v3466_v40 = vor.u32 %v3465_v36, %v3464_v8  ;;  %v3469_v7 = vor.u32 %v3468_v16, %v3467_v60  ;;  %v3472_v32 = vor.u32 %v3471_v55, %v3470_v2 }
 0x304   : > { %vm12500_vm0 = vcmp.lt.s32.totalorder %v9770_v29, 0  ;;  %v7571_v58 = vmin.u32 %v3406_v39, %v10415_v52  ;;  %v3474_v37 = vshrl.u32 %v12558_v48, %v3459_v4  ;;  %vm3476_vm14 = vcmp.lt.s32.totalorder %v3457_v31, 1 }
 0x305   : > { %vm3478_vm5 = vcmp.lt.s32.totalorder %v3457_v31, 3  ;;  %vm3477_vm12 = vcmp.lt.s32.totalorder %v3457_v31, 2  ;;  %vm3479_vm1 = vcmp.lt.s32.totalorder %v3457_v31, 4  ;;  %v3492_v5 = vshll.u32 %v3452_v19, 8 }
 0x306   : > { %v1894_v12 = vadd.s32 1, %v7514_v38  ;;  %v3475_v49 = vor.u32 %v3474_v37, %v3473_v10  ;;  %v3481_v6 = vsel %vm3479_vm1, %v3469_v7, 2102212464  ;;  %v3484_v8 = vsel %vm3476_vm14, %v3463_v24, %v3466_v40 }
 0x307   : > { %v3485_v45 = vsel %vm3479_vm1, %v3472_v32, 920167782  ;;  %v1749_v60 = vshll.u32 %v10293_v61, %v10412_v41  ;;  %v10447_v2 = vsub.s32 %v1840_v9, %v1843_v27  ;;  %v3480_v39 = vsel %vm3476_vm14, %v3460_v63, %v3463_v24 }
 0x308   : > { %v3486_v4 = vsel %vm3478_vm5, %v3469_v7, %v3485_v45  ;;  %v3482_v36 = vsel %vm3478_vm5, %v3466_v40, %v3481_v6  ;;  %v3488_v38 = vsel %vm3476_vm14, %v3466_v40, %v3469_v7  ;;  %v3489_v37 = vsel %vm3479_vm1, %v3475_v49, 1326507024 }
 0x309   : > { %v3487_v16 = vsel %vm3477_vm12, %v3484_v8, %v3486_v4  ;;  %v1750_v10 = vshrl.u32 %v1732_v21, %v1748_v50  ;;  %v1754_v19 = vshll.u32 %v1753_v62, 23  ;;  %v3408_v55 = vclz %v7571_v58 }
 0x30a   : > { %v3490_v43 = vsel %vm3478_vm5, %v3472_v32, %v3489_v37  ;;  %v10456_v41 = vmul.u32.u64.low %v3492_v5, %v3487_v16  ;;  %v10457_v9 = vmul.u32.u64.high %v3492_v5, %v3487_v16, %v10456_v41  ;;  %vm1895_vm13 = vcmp.gt.s32.totalorder %v1894_v12, 0 }
 0x30b   : > { %v3491_v61 = vsel %vm3477_vm12, %v3488_v38, %v3490_v43  ;;  %v1846_v63 = vsub.s32 0, %v10447_v2  ;;  %v3483_v24 = vsel %vm3477_vm12, %v3480_v39, %v3482_v36  ;;  %v12688_v7 = vxor.u32 2147483648, %v10312_v3 }
 0x30c   : > { %v10462_v27 = vmul.u32.u64.low %v3492_v5, %v3491_v61  ;;  %v10463_v6 = vmul.u32.u64.high %v3492_v5, %v3491_v61, %v10462_v27  ;;  %v12690_v40 = vand.u32 2147483647, %v10383_v53  ;;  %v1896_v21 = vsel %vm1895_vm13, %v1894_v12, 0 }
 0x30d   : > { %v10470_v32 = vsel %vm12507_vm4, %v12688_v7, %v10312_v3  ;;  %v3551_v43 = vand.u32 2139095040, %v10410_v15  ;;  %v12691_v31 = vxor.u32 2147483648, %v10377_v34  ;;  %v12693_v49 = vand.u32 2147483647, %v10398_v54 }
 0x30e   : > { %12689 = vst [vmem:[#allocation98_spill] sm:$0xff] %v10470_v32  ;;  %v1891_v62 = vand.u32 8388607, %v12690_v40  ;;  %v12694_v3 = vcvt.s32.f32 %v10395_v18  ;;  %v1898_v45 = vand.u32 31, %v1896_v21  ;;  %v10489_v39 = vor.u32 %v1750_v10, %v1749_v60 }
 0x30f   : > { %v10480_v50 = vsel %vm12500_vm0, %v12691_v31, %v10377_v34  ;;  %v10493_v12 = vadd.s32 %v10303_v30, %v10300_v44  ;;  %v3499_v4 = vmul.u32 %v3492_v5, %v3483_v24  ;;  %v3502_v36 = vadd.s32 1, %v10457_v9 }
 0x310   : > { %12692 = vst [vmem:[#allocation99_spill] sm:$0xff] %v10480_v50  ;;  %v10487_v8 = vmul.f32 %v12694_v3, %v12693_v49  ;;  %v10496_v34 = vor.u32 4788187, %v1754_v19  ;;  %v7572_v16 = vadd.s32 4294967294, %v3408_v55  ;;  %v7511_v38 = vmin.u32 %v1846_v63, %v10447_v2 }
 0x311   : > { %vm3501_vm13 = vc.u32 %v10463_v6, %v10456_v41  ;;  %v1892_v18 = vor.u32 8388608, %v1891_v62  ;;  %v1899_v60 = vsub.s32 32, %v1898_v45  ;;  %v3552_v37 = vshrl.u32 %v3551_v43, 23 }
 0x312   : > { %v3503_v10 = vsel %vm3501_vm13, %v3502_v36, %v10457_v9  ;;  %v1901_v44 = vshll.u32 %v12561_v46, %v1898_v45  ;;  %v1904_v30 = vshll.u32 %v12562_v1, %v1898_v45  ;;  %v1907_v5 = vshll.u32 %v12563_v57, %v1898_v45 }
 0x313   : > { %v3504_v19 = vadd.s32 %v3503_v10, %v3499_v4  ;;  %v1897_v55 = vshrl.u32 %v1896_v21, 5  ;;  %v1902_v61 = vshrl.u32 %v12562_v1, %v1899_v60  ;;  %v1905_v63 = vshrl.u32 %v12563_v57, %v1899_v60 }
 0x314   : > { %vm7573_vm1 = vcmp.lt.s32.totalorder %v7572_v16, 0  ;;  %v1848_v24 = vclz %v7511_v38  ;;  %v1908_v27 = vshrl.u32 %v12564_v25, %v1899_v60  ;;  %v1910_v7 = vshll.u32 %v12564_v25, %v1898_v45 }
 0x315   : > { %v3505_v40 = vadd.s32 536870912, %v3504_v19  ;;  %v1900_v9 = vshrl.u32 %v12561_v46, %v1899_v60  ;;  %v1911_v62 = vshrl.u32 %v12557_v28, %v1899_v60  ;;  %v7578_v43 = vadd.s32 4294967169, %v3552_v37 }
 0x316   : > { %v1903_v31 = vor.u32 %v1902_v61, %v1901_v44  ;;  %v1906_v49 = vor.u32 %v1905_v63, %v1904_v30  ;;  %v1909_v3 = vor.u32 %v1908_v27, %v1907_v5  ;;  %v1913_v21 = vshll.u32 %v12557_v28, %v1898_v45 }
 0x317   : > { %v10513_v4 = vshrl.u32 %v3505_v40, 30  ;;  %v1912_v36 = vor.u32 %v1911_v62, %v1910_v7  ;;  %v1914_v38 = vshrl.u32 %v12558_v48, %v1899_v60  ;;  %vm1916_vm12 = vcmp.lt.s32.totalorder %v1897_v55, 1 }
 0x318   : > { %v7512_v10 = vadd.s32 4294967294, %v1848_v24  ;;  %vm1918_vm14 = vcmp.lt.s32.totalorder %v1897_v55, 3  ;;  %vm1919_vm5 = vcmp.lt.s32.totalorder %v1897_v55, 4  ;;  %v1932_v58 = vshll.u32 %v1892_v18, 8 }
 0x319   : > { %12695 = vst [vmem:[#allocation100_spill] sm:$0xff] %v10513_v4  ;;  %v10517_v54 = vsel %vm7573_vm1, 0, %v7572_v16  ;;  %v1915_v20 = vor.u32 %v1914_v38, %v1913_v21  ;;  %vm1917_vm13 = vcmp.lt.s32.totalorder %v1897_v55, 2  ;;  %v1921_v37 = vsel %vm1919_vm5, %v1909_v3, 2102212464 }
 0x31a   : > { %v3507_v44 = vshll.u32 %v10513_v4, 30  ;;  %v1924_v45 = vsel %vm1916_vm12, %v1903_v31, %v1906_v49  ;;  %v1925_v30 = vsel %vm1919_vm5, %v1912_v36, 920167782  ;;  %v3558_v5 = vadd.s32 1, %v7578_v43 }
 0x31b   : > { %v1920_v60 = vsel %vm1916_vm12, %v1900_v9, %v1903_v31  ;;  %v1922_v61 = vsel %vm1918_vm14, %v1906_v49, %v1921_v37  ;;  %v1926_v18 = vsel %vm1918_vm14, %v1909_v3, %v1925_v30  ;;  %v1928_v16 = vsel %vm1916_vm12, %v1906_v49, %v1909_v3 }
 0x31c   : > { %v3416_v63 = vsub.s32 4294967266, %v10517_v54  ;;  %vm7513_vm1 = vcmp.lt.s32.totalorder %v7512_v10, 0  ;;  %v1927_v24 = vsel %vm1917_vm13, %v1924_v45, %v1926_v18  ;;  %v1929_v27 = vsel %vm1919_vm5, %v1915_v20, 1326507024 }
 0x31d   : > { %v1930_v7 = vsel %vm1918_vm14, %v1912_v36, %v1929_v27  ;;  %v10531_v40 = vmul.u32.u64.low %v1932_v58, %v1927_v24  ;;  %v10532_v62 = vmul.u32.u64.high %v1932_v58, %v1927_v24, %v10531_v40  ;;  %v12696_v9 = vand.u32 2147483647, %v10410_v15 }
 0x31e   : > { %v10537_v31 = vsub.s32 %v3504_v19, %v3507_v44  ;;  %v1923_v49 = vsel %vm1917_vm13, %v1920_v60, %v1922_v61  ;;  %v1931_v3 = vsel %vm1917_vm13, %v1928_v16, %v1930_v7  ;;  %vm3559_vm12 = vcmp.gt.s32.totalorder %v3558_v5, 0 }
 0x31f   : > { %v3555_v43 = vand.u32 8388607, %v12696_v9  ;;  %v10541_v21 = vsel %vm7513_vm1, 0, %v7512_v10  ;;  %v10543_v38 = vmul.u32.u64.low %v1932_v58, %v1931_v3  ;;  %v10544_v20 = vmul.u32.u64.high %v1932_v58, %v1931_v3, %v10543_v38 }
 0x320   : > { %v3560_v36 = vsel %vm3559_vm12, %v3558_v5, 0  ;;  %v3412_v45 = vsub.s32 32, %v10517_v54  ;;  %v1836_v30 = vadd.s32 %v10369_v26, %v10380_v14  ;;  %v10552_v55 = vadd.s32 127, %v3416_v63 }
 0x321   : > { %v3562_v19 = vand.u32 31, %v3560_v36  ;;  %v1939_v60 = vmul.u32 %v1932_v58, %v1923_v49  ;;  %v1942_v10 = vadd.s32 1, %v10532_v62  ;;  %v1856_v61 = vsub.s32 4294967266, %v10541_v21 }
 0x322   : > { %v3510_v5 = vsub.s32 0, %v10537_v31  ;;  %v3556_v18 = vor.u32 8388608, %v3555_v43  ;;  %vm1941_vm14 = vc.u32 %v10544_v20, %v10531_v40  ;;  %v3561_v24 = vshrl.u32 %v3560_v36, 5 }
 0x323   : > { %v3563_v16 = vsub.s32 32, %v3562_v19  ;;  %v3565_v26 = vshll.u32 %v12561_v46, %v3562_v19  ;;  %v3568_v14 = vshll.u32 %v12562_v1, %v3562_v19  ;;  %v1943_v63 = vsel %vm1941_vm14, %v1942_v10, %v10532_v62 }
 0x324   : > { %v3574_v7 = vshll.u32 %v12564_v25, %v3562_v19  ;;  %v1944_v9 = vadd.s32 %v1943_v63, %v1939_v60  ;;  %v3571_v43 = vshll.u32 %v12563_v57, %v3562_v19  ;;  %v3414_v38 = vshrl.u32 %v10493_v12, %v3412_v45  ;;  %v12698_v12 = vld [vmem:[#allocation82_spill] sm:$0xff] }
 0x325   : > { %v3566_v58 = vshrl.u32 %v12562_v1, %v3563_v16  ;;  %v3569_v27 = vshrl.u32 %v12563_v57, %v3563_v16  ;;  %v3572_v49 = vshrl.u32 %v12564_v25, %v3563_v16  ;;  %v3575_v3 = vshrl.u32 %v12557_v28, %v3563_v16 }
 0x326   : > { %v7575_v36 = vmin.u32 %v3510_v5, %v10537_v31  ;;  %v3577_v37 = vshll.u32 %v12557_v28, %v3562_v19  ;;  %v10572_v62 = vmul.f32 6.2831855, %v9991_v51  ;;  %v3418_v10 = vshll.u32 %v10552_v55, 23 }
 0x327   : > { %v1852_v44 = vsub.s32 32, %v10541_v21  ;;  %v1945_v60 = vadd.s32 536870912, %v1944_v9  ;;  %v3564_v63 = vshrl.u32 %v12561_v46, %v3563_v16  ;;  %v3567_v4 = vor.u32 %v3566_v58, %v3565_v26 }
 0x328   : > { %12697 = vst [vmem:[#allocation101_spill] sm:$0xff] %v10572_v62  ;;  %v3570_v15 = vor.u32 %v3569_v27, %v3568_v14  ;;  %v3576_v47 = vor.u32 %v3575_v3, %v3574_v7  ;;  %v3578_v50 = vshrl.u32 %v12558_v48, %v3563_v16  ;;  %vm12499_vm5 = vcmp.lt.s32.totalorder %v12698_v12, 0 }
 0x329   : > { %v1857_v45 = vadd.s32 127, %v1856_v61  ;;  %v3573_v5 = vor.u32 %v3572_v49, %v3571_v43  ;;  %vm3580_vm13 = vcmp.lt.s32.totalorder %v3561_v24, 1  ;;  %v3596_v19 = vshll.u32 %v3556_v18, 8 }
 0x32a   : > { %v3512_v51 = vclz %v7575_v36  ;;  %v3579_v29 = vor.u32 %v3578_v50, %v3577_v37  ;;  %vm3583_vm1 = vcmp.lt.s32.totalorder %v3561_v24, 4  ;;  %v1991_v55 = vand.u32 2139095040, %v10572_v62 }
 0x32b   : > { %v10580_v32 = vshrl.u32 %v1945_v60, 30  ;;  %vm3581_vm12 = vcmp.lt.s32.totalorder %v3561_v24, 2  ;;  %vm3582_vm14 = vcmp.lt.s32.totalorder %v3561_v24, 3  ;;  %v3585_v26 = vsel %vm3583_vm1, %v3573_v5, 2102212464 }
 0x32c   : > { %v3584_v14 = vsel %vm3580_vm13, %v3564_v63, %v3567_v4  ;;  %v3586_v16 = vsel %vm3582_vm14, %v3570_v15, %v3585_v26  ;;  %v3588_v61 = vsel %vm3580_vm13, %v3567_v4, %v3570_v15  ;;  %v3589_v58 = vsel %vm3583_vm1, %v3576_v47, 920167782 }
 0x32d   : > { %v1853_v50 = vshll.u32 %v10447_v2, %v10541_v21  ;;  %v1854_v37 = vshrl.u32 %v1836_v30, %v1852_v44  ;;  %v1858_v18 = vshll.u32 %v1857_v45, 23  ;;  %v3592_v27 = vsel %vm3580_vm13, %v3570_v15, %v3573_v5 }
 0x32e   : > { %v7576_v7 = vadd.s32 4294967294, %v3512_v51  ;;  %v3590_v43 = vsel %vm3582_vm14, %v3573_v5, %v3589_v58  ;;  %v3593_v49 = vsel %vm3583_vm1, %v3579_v29, 1326507024  ;;  %v1992_v3 = vshrl.u32 %v1991_v55, 23 }
 0x32f   : > { %v1947_v36 = vshll.u32 %v10580_v32, 30  ;;  %v3587_v60 = vsel %vm3581_vm12, %v3584_v14, %v3586_v16  ;;  %v3591_v4 = vsel %vm3581_vm12, %v3588_v61, %v3590_v43  ;;  %v3594_v63 = vsel %vm3582_vm14, %v3576_v47, %v3593_v49 }
 0x330   : > { %v3595_v2 = vsel %vm3581_vm12, %v3592_v27, %v3594_v63  ;;  %v10597_v21 = vmul.u32.u64.low %v3596_v19, %v3591_v4  ;;  %v10598_v30 = vmul.u32.u64.high %v3596_v19, %v3591_v4, %v10597_v21  ;;  %v7518_v15 = vadd.s32 4294967169, %v1992_v3 }
 0x331   : > { %v1756_v44 = vand.u32 2147483647, %v10496_v34  ;;  %v10602_v45 = vmul.u32.u64.low %v3596_v19, %v3595_v2  ;;  %v10603_v29 = vmul.u32.u64.high %v3596_v19, %v3595_v2, %v10602_v45  ;;  %v10606_v5 = vmul.f32 6.2831855, %v10104_v22 }
 0x332   : > { %v12700_v51 = vxor.u32 2147483648, %v10406_v23  ;;  %v12701_v24 = vshll.u32 %v10415_v52, %v10517_v54  ;;  %v10620_v26 = vor.u32 4788187, %v3418_v10  ;;  %v1998_v34 = vadd.s32 1, %v7518_v15 }
 0x333   : > { %12699 = vst [vmem:[#allocation82_spill] sm:$0xff] %v10606_v5  ;;  %v10623_v16 = vor.u32 %v1854_v37, %v1853_v50  ;;  %v10625_v22 = vsub.s32 %v1944_v9, %v1947_v36  ;;  %v3603_v61 = vmul.u32 %v3596_v19, %v3587_v60  ;;  %v10627_v58 = vor.u32 4788187, %v1858_v18 }
 0x334   : > { %v10613_v47 = vsel %vm12499_vm5, %v12700_v51, %v10406_v23  ;;  %v10618_v55 = vor.u32 %v3414_v38, %v12701_v24  ;;  %vm7577_vm13 = vcmp.lt.s32.totalorder %v7576_v7, 0  ;;  %v3606_v23 = vadd.s32 1, %v10598_v30 }
 0x335   : > { %vm1999_vm1 = vcmp.gt.s32.totalorder %v1998_v34, 0  ;;  %v12702_v52 = vcvt.s32.f32 %v10489_v39  ;;  %vm3605_vm12 = vc.u32 %v10603_v29, %v10597_v21  ;;  %v12498_v38 = vand.u32 2147483647, %v10572_v62 }
 0x336   : > { %v3655_v10 = vand.u32 2139095040, %v10606_v5  ;;  %v3607_v50 = vsel %vm3605_vm12, %v3606_v23, %v10598_v30  ;;  %v2000_v37 = vsel %vm1999_vm1, %v1998_v34, 0  ;;  %v3515_v18 = vsel %vm7577_vm13, 0, %v7576_v7 }
 0x337   : > { %v10632_v54 = vmul.f32 %v12702_v52, %v1756_v44  ;;  %v1950_v27 = vsub.s32 0, %v10625_v22  ;;  %v3608_v39 = vadd.s32 %v3607_v50, %v3603_v61  ;;  %v2002_v43 = vand.u32 31, %v2000_v37 }
 0x338   : > { %v3500_v36 = vadd.s32 %v10456_v41, %v10463_v6  ;;  %v3516_v60 = vsub.s32 32, %v3515_v18  ;;  %v3517_v4 = vshll.u32 %v10537_v31, %v3515_v18  ;;  %v1995_v2 = vand.u32 8388607, %v12498_v38 }
 0x339   : > { %v3609_v63 = vadd.s32 536870912, %v3608_v39  ;;  %v3656_v30 = vshrl.u32 %v3655_v10, 23  ;;  %v3520_v7 = vsub.s32 4294967266, %v3515_v18  ;;  %v2003_v15 = vsub.s32 32, %v2002_v43 }
 0x33a   : > { %v2005_v44 = vshll.u32 %v12561_v46, %v2002_v43  ;;  %v2008_v45 = vshll.u32 %v12562_v1, %v2002_v43  ;;  %v7515_v51 = vmin.u32 %v1950_v27, %v10625_v22  ;;  %v2011_v41 = vshll.u32 %v12563_v57, %v2002_v43 }
 0x33b   : > { %v10652_v24 = vshrl.u32 %v3609_v63, 30  ;;  %v2014_v6 = vshll.u32 %v12564_v25, %v2002_v43  ;;  %v2001_v31 = vshrl.u32 %v2000_v37, 5  ;;  %v2006_v34 = vshrl.u32 %v12562_v1, %v2003_v15 }
 0x33c   : > { %v2009_v61 = vshrl.u32 %v12563_v57, %v2003_v15  ;;  %v2012_v23 = vshrl.u32 %v12564_v25, %v2003_v15  ;;  %v3518_v52 = vshrl.u32 %v3500_v36, %v3516_v60  ;;  %v1996_v10 = vor.u32 8388608, %v1995_v2 }
 0x33d   : > { %12703 = vst [vmem:[#allocation102_spill] sm:$0xff] %v10652_v24  ;;  %v2015_v50 = vshrl.u32 %v12557_v28, %v2003_v15  ;;  %v7582_v18 = vadd.s32 4294967169, %v3656_v30  ;;  %v3521_v38 = vadd.s32 127, %v3520_v7  ;;  %v2007_v27 = vor.u32 %v2006_v34, %v2005_v44 }
 0x33e   : > { %v2010_v63 = vor.u32 %v2009_v61, %v2008_v45  ;;  %v2017_v3 = vshll.u32 %v12557_v28, %v2002_v43  ;;  %vm12506_vm14 = vcmp.lt.s32.totalorder %v9996_v11, 0  ;;  %v3611_v37 = vshll.u32 %v10652_v24, 30 }
 0x33f   : > { %v2004_v49 = vshrl.u32 %v12561_v46, %v2003_v15  ;;  %v2013_v19 = vor.u32 %v2012_v23, %v2011_v41  ;;  %v2016_v9 = vor.u32 %v2015_v50, %v2014_v6  ;;  %v1952_v14 = vclz %v7515_v51 }
 0x340   : > { %v2018_v36 = vshrl.u32 %v12558_v48, %v2003_v15  ;;  %vm2020_vm13 = vcmp.lt.s32.totalorder %v2001_v31, 1  ;;  %vm2022_vm1 = vcmp.lt.s32.totalorder %v2001_v31, 3  ;;  %vm2021_vm12 = vcmp.lt.s32.totalorder %v2001_v31, 2 }
 0x341   : > { %vm2023_vm5 = vcmp.lt.s32.totalorder %v2001_v31, 4  ;;  %v2036_v60 = vshll.u32 %v1996_v10, 8  ;;  %v3662_v2 = vadd.s32 1, %v7582_v18  ;;  %v2028_v43 = vsel %vm2020_vm13, %v2007_v27, %v2010_v63 }
 0x342   : > { %v2019_v30 = vor.u32 %v2018_v36, %v2017_v3  ;;  %v2025_v7 = vsel %vm2023_vm5, %v2013_v19, 2102212464  ;;  %v2029_v44 = vsel %vm2023_vm5, %v2016_v9, 920167782  ;;  %v10666_v45 = vsub.s32 %v3608_v39, %v3611_v37 }
 0x343   : > { %v2024_v34 = vsel %vm2020_vm13, %v2004_v49, %v2007_v27  ;;  %v2030_v41 = vsel %vm2022_vm1, %v2013_v19, %v2029_v44  ;;  %v12501_v51 = vand.u32 2147483647, %v10606_v5  ;;  %v2026_v15 = vsel %vm2022_vm1, %v2010_v63, %v2025_v7 }
 0x344   : > { %v2031_v6 = vsel %vm2021_vm12, %v2028_v43, %v2030_v41  ;;  %v2032_v61 = vsel %vm2020_vm13, %v2010_v63, %v2013_v19  ;;  %v2033_v23 = vsel %vm2023_vm5, %v2019_v30, 1326507024  ;;  %v10674_v3 = vor.u32 %v3518_v52, %v3517_v4 }
 0x345   : > { %v3522_v10 = vshll.u32 %v3521_v38, 23  ;;  %v7516_v50 = vadd.s32 4294967294, %v1952_v14  ;;  %v2034_v39 = vsel %vm2022_vm1, %v2016_v9, %v2033_v23  ;;  %vm3663_vm0 = vcmp.gt.s32.totalorder %v3662_v2, 0 }
 0x346   : > { %v2035_v18 = vsel %vm2021_vm12, %v2032_v61, %v2034_v39  ;;  %v10678_v49 = vmul.u32.u64.low %v2036_v60, %v2031_v6  ;;  %v10679_v27 = vmul.u32.u64.high %v2036_v60, %v2031_v6, %v10678_v49  ;;  %v3614_v37 = vsub.s32 0, %v10666_v45 }
 0x347   : > { %v2027_v36 = vsel %vm2021_vm12, %v2024_v34, %v2026_v15  ;;  %v10684_v7 = vmul.u32.u64.low %v2036_v60, %v2035_v18  ;;  %v10685_v19 = vmul.u32.u64.high %v2036_v60, %v2035_v18, %v10684_v7  ;;  %v12704_v38 = vxor.u32 2147483648, %v10487_v8 }
 0x348   : > { %v3659_v4 = vand.u32 8388607, %v12501_v51  ;;  %v3664_v52 = vsel %vm3663_vm0, %v3662_v2, 0  ;;  %v12705_v63 = vand.u32 2147483647, %v10620_v26  ;;  %v12706_v31 = vcvt.s32.f32 %v10618_v55 }
 0x349   : > { %v10692_v14 = vsel %vm12506_vm14, %v12704_v38, %v10487_v8  ;;  %v12707_v43 = vand.u32 2147483647, %v10627_v58  ;;  %v12708_v44 = vcvt.s32.f32 %v10623_v16  ;;  %vm7517_vm5 = vcmp.lt.s32.totalorder %v7516_v50, 0  ;;  %v12709_v58 = vld [vmem:[#allocation26_spill] sm:$0xff] }
 0x34a   : > { %v10701_v30 = vmul.f32 %v12706_v31, %v12705_v63  ;;  %v3666_v8 = vand.u32 31, %v3664_v52  ;;  %v10709_v41 = vor.u32 4788187, %v3522_v10  ;;  %v1940_v15 = vadd.s32 %v10531_v40, %v10544_v20 }
 0x34b   : > { %v10707_v34 = vmul.f32 %v12708_v44, %v12707_v43  ;;  %v2043_v2 = vmul.u32 %v2036_v60, %v2027_v36  ;;  %v2046_v26 = vadd.s32 1, %v10679_v27  ;;  %v10717_v6 = vadd.s32 %v10597_v21, %v10603_v29 }
 0x34c   : > { %v7579_v16 = vmin.u32 %v3614_v37, %v10666_v45  ;;  %v10721_v23 = vsel %vm7517_vm5, 0, %v7516_v50  ;;  %vm2045_vm0 = vc.u32 %v10685_v19, %v10678_v49  ;;  %v3660_v10 = vor.u32 8388608, %v3659_v4 }
 0x34d   : > { %v3667_v40 = vsub.s32 32, %v3666_v8  ;;  %v2047_v20 = vsel %vm2045_vm0, %v2046_v26, %v10679_v27  ;;  %v3665_v60 = vshrl.u32 %v3664_v52, 5  ;;  %v3669_v39 = vshll.u32 %v12561_v46, %v3666_v8 }
 0x34e   : > { %v3672_v18 = vshll.u32 %v12562_v1, %v3666_v8  ;;  %v2048_v21 = vadd.s32 %v2047_v20, %v2043_v2  ;;  %v3675_v50 = vshll.u32 %v12563_v57, %v3666_v8  ;;  %v1956_v36 = vsub.s32 32, %v10721_v23 }
 0x34f   : > { %v3670_v29 = vshrl.u32 %v12562_v1, %v3667_v40  ;;  %v3673_v37 = vshrl.u32 %v12563_v57, %v3667_v40  ;;  %v3616_v7 = vclz %v7579_v16  ;;  %v3676_v38 = vshrl.u32 %v12564_v25, %v3667_v40 }
 0x350   : > { %v3678_v4 = vshll.u32 %v12564_v25, %v3666_v8  ;;  %v1960_v52 = vsub.s32 4294967266, %v10721_v23  ;;  %v2049_v63 = vadd.s32 536870912, %v2048_v21  ;;  %v3679_v31 = vshrl.u32 %v12557_v28, %v3667_v40 }
 0x351   : > { %v3668_v43 = vshrl.u32 %v12561_v46, %v3667_v40  ;;  %v3671_v44 = vor.u32 %v3670_v29, %v3669_v39  ;;  %v3674_v2 = vor.u32 %v3673_v37, %v3672_v18  ;;  %v3681_v26 = vshll.u32 %v12557_v28, %v3666_v8 }
 0x352   : > { %v3677_v20 = vor.u32 %v3676_v38, %v3675_v50  ;;  %v3680_v16 = vor.u32 %v3679_v31, %v3678_v4  ;;  %v3682_v51 = vshrl.u32 %v12558_v48, %v3667_v40  ;;  %vm3684_vm13 = vcmp.lt.s32.totalorder %v3665_v60, 1  ;;  %v12712_v50 = vld [vmem:[#allocation30_spill] sm:$0xff] }
 0x353   : > { %v7580_v9 = vadd.s32 4294967294, %v3616_v7  ;;  %vm3686_vm1 = vcmp.lt.s32.totalorder %v3665_v60, 3  ;;  %vm3687_vm12 = vcmp.lt.s32.totalorder %v3665_v60, 4  ;;  %v3700_v55 = vshll.u32 %v3660_v10, 8 }
 0x354   : > { %v10741_v27 = vshrl.u32 %v2049_v63, 30  ;;  %v3683_v61 = vor.u32 %v3682_v51, %v3681_v26  ;;  %vm3685_vm5 = vcmp.lt.s32.totalorder %v3665_v60, 2  ;;  %v3689_v5 = vsel %vm3687_vm12, %v3677_v20, 2102212464 }
 0x355   : > { %v1961_v62 = vadd.s32 127, %v1960_v52  ;;  %v3692_v39 = vsel %vm3684_vm13, %v3671_v44, %v3674_v2  ;;  %v3693_v28 = vsel %vm3687_vm12, %v3680_v16, 920167782  ;;  %v12711_v8 = vand.u32 2147483647, %v12709_v58 }
 0x356   : > { %12710 = vst [vmem:[#allocation26_spill] sm:$0xff] %v10741_v27  ;;  %v3688_v48 = vsel %vm3684_vm13, %v3668_v43, %v3671_v44  ;;  %v3690_v40 = vsel %vm3686_vm1, %v3674_v2, %v3689_v5  ;;  %v3694_v10 = vsel %vm3686_vm1, %v3677_v20, %v3693_v28  ;;  %v3696_v29 = vsel %vm3684_vm13, %v3674_v2, %v3677_v20  ;;  %v12713_v43 = vld [vmem:[#allocation31_spill] sm:$0xff] }
 0x357   : > { %v435_v18 = vand.u32 8388607, %v12711_v8  ;;  %vm7581_vm0 = vcmp.lt.s32.totalorder %v7580_v9, 0  ;;  %v3695_v51 = vsel %vm3685_vm5, %v3692_v39, %v3694_v10  ;;  %v3697_v37 = vsel %vm3687_vm12, %v3683_v61, 1326507024 }
 0x358   : > { %v445_v7 = vshll.u32 %v12561_v46, %v12712_v50  ;;  %v2051_v38 = vshll.u32 %v10741_v27, 30  ;;  %v3698_v4 = vsel %vm3686_vm1, %v3680_v16, %v3697_v37  ;;  %v3691_v5 = vsel %vm3685_vm5, %v3688_v48, %v3690_v40  ;;  %v12714_v37 = vld [vmem:[#allocation33_spill] sm:$0xff] }
 0x359   : > { %v10758_v52 = vmul.u32.u64.low %v3700_v55, %v3695_v51  ;;  %v10759_v63 = vmul.u32.u64.high %v3700_v55, %v3695_v51, %v10758_v52  ;;  %v3699_v31 = vsel %vm3685_vm5, %v3696_v29, %v3698_v4  ;;  %v446_v44 = vshrl.u32 %v12562_v1, %v12713_v43 }
 0x35a   : > { %v448_v61 = vshll.u32 %v12562_v1, %v12712_v50  ;;  %v1958_v2 = vshrl.u32 %v1940_v15, %v1956_v36  ;;  %v10768_v26 = vmul.u32.u64.low %v3700_v55, %v3699_v31  ;;  %v10769_v20 = vmul.u32.u64.high %v3700_v55, %v3699_v31, %v10768_v26 }
 0x35b   : > { %v449_v16 = vshrl.u32 %v12563_v57, %v12713_v43  ;;  %v1962_v39 = vshll.u32 %v1961_v62, 23  ;;  %v447_v28 = vor.u32 %v446_v44, %v445_v7  ;;  %v451_v8 = vshll.u32 %v12563_v57, %v12712_v50  ;;  %v12717_v44 = vld [vmem:[#allocation36_spill] sm:$0xff] }
 0x35c   : > { %v452_v60 = vshrl.u32 %v12564_v25, %v12713_v43  ;;  %v3619_v48 = vsel %vm7581_vm0, 0, %v7580_v9  ;;  %v3707_v40 = vmul.u32 %v3700_v55, %v3691_v5  ;;  %v3710_v10 = vadd.s32 1, %v10759_v63 }
 0x35d   : > { %v450_v15 = vor.u32 %v449_v16, %v448_v61  ;;  %v10779_v36 = vsub.s32 %v2048_v21, %v2051_v38  ;;  %v436_v29 = vor.u32 8388608, %v435_v18  ;;  %vm460_vm13 = vcmp.lt.s32.totalorder %v12714_v37, 1  ;;  %v12715_v21 = vld [vmem:[#allocation37_spill] sm:$0xff] }
 0x35e   : > { %v453_v51 = vor.u32 %v452_v60, %v451_v8  ;;  %vm3709_vm1 = vc.u32 %v10769_v20, %v10758_v52  ;;  %v444_v62 = vshrl.u32 %v12561_v46, %v12713_v43  ;;  %vm462_vm12 = vcmp.lt.s32.totalorder %v12714_v37, 3 }
 0x35f   : > { %v468_v9 = vsel %vm460_vm13, %v447_v28, %v450_v15  ;;  %v3624_v55 = vsub.s32 4294967266, %v3619_v48  ;;  %v3711_v50 = vsel %vm3709_vm1, %v3710_v10, %v10759_v63  ;;  %vm461_vm5 = vcmp.lt.s32.totalorder %v12714_v37, 2  ;;  %v12716_v63 = vld [vmem:[#allocation38_spill] sm:$0xff] }
 0x360   : > { %v470_v18 = vsel %vm462_vm12, %v453_v51, %v12715_v21  ;;  %v3712_v7 = vadd.s32 %v3711_v50, %v3707_v40  ;;  %v465_v38 = vsel %vm463_vm6, %v453_v51, 2102212464  ;;  %v472_v5 = vsel %vm460_vm13, %v450_v15, %v453_v51 }
 0x361   : > { %v471_v4 = vsel %vm461_vm5, %v468_v9, %v470_v18  ;;  %v3620_v31 = vsub.s32 32, %v3619_v48  ;;  %v2054_v43 = vsub.s32 0, %v10779_v36  ;;  %v474_v61 = vsel %vm462_vm12, %v12717_v44, %v12716_v63 }
 0x362   : > { %v476_v26 = vshll.u32 %v436_v29, 8  ;;  %v3524_v16 = vand.u32 2147483647, %v10709_v41  ;;  %v12718_v8 = vshll.u32 %v10625_v22, %v10721_v23  ;;  %v3713_v40 = vadd.s32 536870912, %v3712_v7 }
 0x363   : > { %v464_v10 = vsel %vm460_vm13, %v444_v62, %v447_v28  ;;  %v466_v51 = vsel %vm462_vm12, %v450_v15, %v465_v38  ;;  %v475_v9 = vsel %vm461_vm5, %v472_v5, %v474_v61  ;;  %v1963_v29 = vor.u32 4788187, %v1962_v39  ;;  %v12721_v5 = vld [vmem:[#allocation34_spill] sm:$0xff]  ;;  %v12722_v61 = vld [vmem:[#allocation44_spill] sm:$0xff] }
 0x364   : > { %v1959_v60 = vor.u32 %v1958_v2, %v12718_v8  ;;  %v10815_v50 = vmul.u32.u64.low %v476_v26, %v471_v4  ;;  %v10816_v21 = vmul.u32.u64.high %v476_v26, %v471_v4, %v10815_v50  ;;  %v3621_v41 = vshll.u32 %v10666_v45, %v3619_v48 }
 0x365   : > { %v3625_v18 = vadd.s32 127, %v3624_v55  ;;  %v10820_v22 = vshrl.u32 %v3713_v40, 30  ;;  %v3622_v23 = vshrl.u32 %v10717_v6, %v3620_v31  ;;  %v7519_v2 = vmin.u32 %v2054_v43, %v10779_v36 }
 0x366   : > { %v10824_v28 = vmul.u32.u64.low %v476_v26, %v475_v9  ;;  %v10825_v62 = vmul.u32.u64.high %v476_v26, %v475_v9, %v10824_v28  ;;  %vm12515_vm6 = vcmp.lt.s32.totalorder %v10010_v59, 0  ;;  %vm12514_vm0 = vcmp.lt.s32.totalorder %v10189_v35, 0 }
 0x367   : > { %12719 = vst [vmem:[#allocation30_spill] sm:$0xff] %v10820_v22  ;;  %v3424_v15 = vxor.u32 2147483648, %v10701_v30  ;;  %v1864_v39 = vxor.u32 2147483648, %v10707_v34  ;;  %v3715_v45 = vshll.u32 %v10820_v22, 30  ;;  %v467_v48 = vsel %vm461_vm5, %v464_v10, %v466_v51 }
 0x368   : > { %vm12510_vm13 = vcmp.lt.s32.totalorder %v10249_v0, 0  ;;  %v12720_v6 = vcvt.s32.f32 %v10674_v3  ;;  %v1966_v38 = vcvt.s32.f32 %v1959_v60  ;;  %v486_v4 = vadd.s32 1, %v10816_v21 }
 0x369   : > { %v2300_v31 = vand.u32 2147483647, %v12721_v5  ;;  %v1964_v43 = vand.u32 2147483647, %v1963_v29  ;;  %v3626_v63 = vshll.u32 %v3625_v18, 23  ;;  %v10839_v44 = vsub.s32 %v3712_v7, %v3715_v45 }
 0x36a   : > { %v3527_v55 = vmul.f32 %v12720_v6, %v3524_v16  ;;  %v2318_v8 = vshrl.u32 %v12562_v1, %v12722_v61  ;;  %vm12509_vm1 = vcmp.lt.s32.totalorder %v10334_v17, 0  ;;  %v3623_v37 = vor.u32 %v3622_v23, %v3621_v41  ;;  %v12723_v16 = vld [vmem:[#allocation42_spill] sm:$0xff] }
 0x36b   : > { %v2056_v40 = vclz %v7519_v2  ;;  %v483_v10 = vmul.u32 %v476_v26, %v467_v48  ;;  %vm485_vm12 = vc.u32 %v10825_v62, %v10815_v50  ;;  %v2317_v60 = vshll.u32 %v12561_v46, %v12723_v16 }
 0x36c   : > { %v487_v3 = vsel %vm485_vm12, %v486_v4, %v10816_v21  ;;  %v2320_v7 = vshll.u32 %v12562_v1, %v12723_v16  ;;  %v2321_v51 = vshrl.u32 %v12563_v57, %v12722_v61  ;;  %v2307_v29 = vand.u32 8388607, %v2300_v31 }
 0x36d   : > { %v488_v9 = vadd.s32 %v487_v3, %v483_v10  ;;  %v2323_v26 = vshll.u32 %v12563_v57, %v12723_v16  ;;  %v2324_v41 = vshrl.u32 %v12564_v25, %v12722_v61  ;;  %vm12511_vm5 = vcmp.lt.s32.totalorder %v10383_v53, 0  ;;  %v12724_v10 = vld [vmem:[#allocation41_spill] sm:$0xff]  ;;  %v12726_v16 = vld [vmem:[#allocation50_spill] sm:$0xff] }
 0x36e   : > { %v3627_v21 = vor.u32 4788187, %v3626_v63  ;;  %v3718_v18 = vsub.s32 0, %v10839_v44  ;;  %v2319_v23 = vor.u32 %v2318_v8, %v2317_v60  ;;  %v2322_v1 = vor.u32 %v2321_v51, %v2320_v7  ;;  %v12725_v63 = vld [vmem:[#allocation56_spill] sm:$0xff] }
 0x36f   : > { %v3528_v2 = vxor.u32 2147483648, %v3527_v55  ;;  %v1967_v28 = vmul.f32 %v1966_v38, %v1964_v43  ;;  %v489_v45 = vadd.s32 536870912, %v488_v9  ;;  %v2325_v48 = vor.u32 %v2324_v41, %v2323_v26 }
 0x370   : > { %v3630_v6 = vcvt.s32.f32 %v3623_v37  ;;  %v7520_v4 = vadd.s32 4294967294, %v2056_v40  ;;  %vm2332_vm12 = vcmp.lt.s32.totalorder %v12724_v10, 1  ;;  %vm2334_vm14 = vcmp.lt.s32.totalorder %v12724_v10, 3  ;;  %v12727_v37 = vld [vmem:[#allocation55_spill] sm:$0xff] }
 0x371   : > { %v490_v57 = vshrl.u32 %v489_v45, 30  ;;  %v2308_v3 = vor.u32 8388608, %v2307_v29  ;;  %v2344_v25 = vsel %vm2332_vm12, %v2322_v1, %v2325_v48  ;;  %v2346_v8 = vsel %vm2334_vm14, %v12726_v16, %v12725_v63 }
 0x372   : > { %v3628_v60 = vand.u32 2147483647, %v3627_v21  ;;  %v7583_v38 = vmin.u32 %v3718_v18, %v10839_v44  ;;  %v2340_v43 = vsel %vm2332_vm12, %v2319_v23, %v2322_v1  ;;  %v2342_v40 = vsel %vm2334_vm14, %v2325_v48, %v12727_v37 }
 0x373   : > { %v12728_v7 = vxor.u32 2147483648, %v10632_v54  ;;  %v10885_v29 = vsel %vm12514_vm0, %v3424_v15, %v10701_v30  ;;  %v491_v26 = vshll.u32 %v490_v57, 30  ;;  %vm2333_vm4 = vcmp.lt.s32.totalorder %v12724_v10, 2 }
 0x374   : > { %v10891_v41 = vsel %vm12510_vm13, %v1864_v39, %v10707_v34  ;;  %v1968_v21 = vxor.u32 2147483648, %v1967_v28  ;;  %vm7521_vm8 = vcmp.lt.s32.totalorder %v7520_v4, 0  ;;  %v2347_v18 = vsel %vm2333_vm4, %v2344_v25, %v2346_v8 }
 0x375   : > { %v10880_v51 = vsel %vm12515_vm6, %v12728_v7, %v10632_v54  ;;  %12729 = vst [vmem:[#allocation31_spill] sm:$0xff] %v10891_v41  ;;  %v10895_v54 = vsub.s32 %v488_v9, %v491_v26  ;;  %v2337_v45 = vsel %vm2335_vm3, %v2325_v48, 2102212464  ;;  %v2343_v30 = vsel %vm2333_vm4, %v2340_v43, %v2342_v40  ;;  %v12736_v7 = vld [vmem:[#allocation21_spill] sm:$0xff] }
 0x376   : > { %v2348_v15 = vshll.u32 %v2308_v3, 8  ;;  %v10903_v63 = vsel %vm12509_vm1, %v3528_v2, %v3527_v55  ;;  %v10905_v34 = vmul.f32 %v3630_v6, %v3628_v60  ;;  %v3720_v39 = vclz %v7583_v38 }
 0x377   : > { %12730 = vst [vmem:[#allocation33_spill] sm:$0xff] %v10903_v63  ;;  %v2316_v16 = vshrl.u32 %v12561_v46, %v12722_v61  ;;  %v2059_v25 = vsel %vm7521_vm8, 0, %v7520_v4  ;;  %v494_v9 = vsub.s32 0, %v10895_v54  ;;  %v2338_v3 = vsel %vm2334_vm14, %v2322_v1, %v2337_v45  ;;  %v12764_v63 = vld [vmem:[#allocation29_spill] sm:$0xff] }
 0x378   : > { %12731 = vst [vmem:[#allocation37_spill] sm:$0xff] %v10905_v34  ;;  %v10910_v8 = vmul.u32.u64.low %v2348_v15, %v2347_v18  ;;  %v10911_v37 = vmul.u32.u64.high %v2348_v15, %v2347_v18, %v10910_v8  ;;  %v10917_v55 = vmul.u32.u64.low %v2348_v15, %v2343_v30  ;;  %v10918_v2 = vmul.u32.u64.high %v2348_v15, %v2343_v30, %v10917_v55 }
 0x379   : > { %v2336_v48 = vsel %vm2332_vm12, %v2316_v16, %v2319_v23  ;;  %v10923_v6 = vsel %vm12511_vm5, %v1968_v21, %v1967_v28  ;;  %v12733_v46 = vand.u32 2147483647, %v12709_v58  ;;  %vm430_vm8 = vcmp.lt.s32.totalorder %v12709_v58, 0  ;;  %v12741_v16 = vld [vmem:[#allocation25_spill] sm:$0xff] }
 0x37a   : > { %12732 = vst [vmem:[#allocation38_spill] sm:$0xff] %v10923_v6  ;;  %v7459_v23 = vmin.u32 %v494_v9, %v10895_v54  ;;  %v2044_v1 = vadd.s32 %v10678_v49, %v10685_v19  ;;  %v2060_v4 = vsub.s32 32, %v2059_v25  ;;  %v2064_v60 = vsub.s32 4294967266, %v2059_v25  ;;  %v12740_v49 = vld [vmem:[#allocation39_spill] sm:$0xff] }
 0x37b   : > { %vm10927_vm3 = vcmp.le.f32.partialorder %v12733_v46, 0.7853982  ;;  %v7584_v38 = vadd.s32 4294967294, %v3720_v39  ;;  %v514_v40 = vsub.s32 4, %v490_v57  ;;  %v2339_v28 = vsel %vm2333_vm4, %v2336_v48, %v2338_v3 }
 0x37c   : > { %v496_v43 = vclz %v7459_v23  ;;  %v12737_v26 = vand.u32 2147483647, %v12736_v7  ;;  %v3708_v45 = vadd.s32 %v10758_v52, %v10769_v20  ;;  %vm2357_vm12 = vc.u32 %v10911_v37, %v10917_v55 }
 0x37d   : > { %v2061_v10 = vshll.u32 %v10779_v36, %v2059_v25  ;;  %v2358_v39 = vadd.s32 1, %v10918_v2  ;;  %v2178_v9 = vsub.s32 4, %v12741_v16  ;;  %v2062_v8 = vshrl.u32 %v2044_v1, %v2060_v4 }
 0x37e   : > { %vm10939_vm14 = vcmp.le.f32.partialorder %v12737_v26, 0.7853982  ;;  %v7460_v30 = vadd.s32 4294967294, %v496_v43  ;;  %v2065_v48 = vadd.s32 127, %v2064_v60  ;;  %vm7585_vm4 = vcmp.lt.s32.totalorder %v7584_v38, 0 }
 0x37f   : > { %v2180_v19 = vsel %vm10939_vm14, %v12736_v7, %v12740_v49  ;;  %v2355_v3 = vmul.u32 %v2348_v15, %v2339_v28  ;;  %v515_v52 = vsel %vm430_vm8, %v514_v40, %v490_v57  ;;  %v2359_v20 = vsel %vm2357_vm12, %v2358_v39, %v10918_v2 }
 0x380   : > { %vm7461_vm1 = vcmp.lt.s32.totalorder %v7460_v30, 0  ;;  %7875 = vcosq.f32 %v2180_v19  ;;  %v484_v46 = vadd.s32 %v10815_v50, %v10825_v62  ;;  %v10960_v23 = vsel %vm7585_vm4, 0, %v7584_v38  ;;  %v12742_v38 = vld [vmem:[#allocation35_spill] sm:$0xff] }
 0x381   : > { %v499_v36 = vsel %vm7461_vm1, 0, %v7460_v30  ;;  %v2360_v25 = vadd.s32 %v2359_v20, %v2355_v3  ;;  %7877 = vsinq.f32 %v2180_v19  ;;  %v2179_v15 = vsel %vm2094_vm7, %v2178_v9, %v12741_v16  ;;  %v12743_v19 = vld [vmem:[#allocation24_spill] sm:$0xff] }
 0x382   : > { %v500_v43 = vsub.s32 32, %v499_v36  ;;  %v504_v1 = vsub.s32 4294967266, %v499_v36  ;;  %v10965_v4 = vor.u32 %v2062_v8, %v2061_v10  ;;  %v517_v57 = vsel %vm10927_vm3, 0, %v515_v52 }
 0x383   : > { %vm2302_vm12 = vcmp.lt.s32.totalorder %v12721_v5, 0  ;;  %v2361_v2 = vadd.s32 536870912, %v2360_v25  ;;  %v501_v50 = vshll.u32 %v10895_v54, %v499_v36  ;;  %v722_v40 = vsub.s32 4, %v12742_v38  ;;  %v12747_v54 = vld [vmem:[#allocation60_spill] sm:$0xff] }
 0x384   : > { %v502_v62 = vshrl.u32 %v484_v46, %v500_v43  ;;  %v505_v60 = vadd.s32 127, %v504_v1  ;;  %v3728_v28 = vsub.s32 4294967266, %v10960_v23  ;;  %v2181_v49 = vsel %vm10939_vm14, 0, %v2179_v15 }
 0x385   : > { %v2362_v26 = vshrl.u32 %v2361_v2, 30  ;;  %v12744_v10 = vand.u32 2147483647, %v12743_v19  ;;  %v2066_v39 = vshll.u32 %v2065_v48, 23  ;;  %v3724_v3 = vsub.s32 32, %v10960_v23 }
 0x386   : > { %v503_v16 = vor.u32 %v502_v62, %v501_v50  ;;  %v506_v9 = vshll.u32 %v505_v60, 23  ;;  %v521_v52 = vadd.s32 3, %v517_v57  ;;  %v2185_v36 = vadd.s32 3, %v2181_v49 }
 0x387   : > { %vm10977_vm7 = vcmp.le.f32.partialorder %v12744_v10, 0.7853982  ;;  %v2363_v20 = vshll.u32 %v2362_v26, 30  ;;  %v2386_v21 = vsub.s32 4, %v2362_v26  ;;  %v723_v43 = vsel %vm638_vm11, %v722_v40, %v12742_v38 }
 0x388   : > { %v724_v8 = vsel %vm10977_vm7, %v12743_v19, %v12747_v54  ;;  %v507_v46 = vor.u32 4788187, %v506_v9  ;;  %v10989_v48 = vadd.s32 127, %v3728_v28  ;;  %v10995_v50 = vor.u32 4788187, %v2066_v39 }
 0x389   : > { %7879 = vcosq.f32 %v724_v8  ;;  %v10991_v1 = vsub.s32 %v2360_v25, %v2363_v20  ;;  %v2387_v15 = vsel %vm2302_vm12, %v2386_v21, %v2362_v26  ;;  %v510_v60 = vcvt.s32.f32 %v503_v16 }
 0x38a   : > { %7881 = vsinq.f32 %v724_v8  ;;  %v7876_v2 = vpop.eup %7875  ;;  %v508_v62 = vand.u32 2147483647, %v507_v46  ;;  %vm10999_vm1 = vcmp.le.f32.partialorder %v2300_v31, 0.7853982  ;;  %v11009_v26 = vsel %vm10977_vm7, 0, %v723_v43 }
 0x38b   : > { %v7878_v38 = vpop.eup %7877  ;;  %v2366_v28 = vsub.s32 0, %v10991_v1  ;;  %v11011_v39 = vshrl.u32 %v3708_v45, %v3724_v3  ;;  %v11015_v31 = vsel %vm10999_vm1, 0, %v2387_v15  ;;  %v2186_v9 = vand.u32 3, %v2185_v36 }
 0x38c   : > { %v511_v16 = vmul.f32 %v510_v60, %v508_v62  ;;  %v11018_v8 = vand.u32 3, %v521_v52  ;;  %v2192_v21 = vxor.u32 2147483648, %v7876_v2  ;;  %v2189_v18 = vxor.u32 2147483648, %v7878_v38 }
 0x38d   : > { %v7531_v20 = vmin.u32 %v2366_v28, %v10991_v1  ;;  %v11022_v30 = vand.u32 3, %v11009_v26  ;;  %v5497_v45 = vand.u32 3, %v2181_v49  ;;  %v2356_v3 = vadd.s32 %v10917_v55, %v10911_v37  ;;  %v12750_v28 = vld [vmem:[#allocation27_spill] sm:$0xff] }
 0x38e   : > { %v512_v46 = vxor.u32 2147483648, %v511_v16  ;;  %v2393_v15 = vadd.s32 3, %v11015_v31  ;;  %v11027_v36 = vand.u32 3, %v517_v57  ;;  %vm2187_vm11 = vcmp.lt.s32.totalorder %v2186_v9, 2 }
 0x38f   : > { %v2368_v43 = vclz %v7531_v20  ;;  %vm2188_vm14 = vcmp.eq.s32.totalorder %v2186_v9, 0  ;;  %vm2191_vm4 = vcmp.eq.s32.totalorder %v2186_v9, 2  ;;  %v618_v40 = vsub.s32 4, %v12750_v28 }
 0x390   : > { %v513_v52 = vsel %vm430_vm8, %v512_v46, %v511_v16  ;;  %v2193_v49 = vsel %vm2191_vm4, %v2192_v21, %v7878_v38  ;;  %v2190_v55 = vsel %vm2188_vm14, %v7876_v2, %v2189_v18  ;;  %vm4057_vm7 = vcmp.eq.s32.totalorder %v11022_v30, 0  ;;  %v12751_v46 = vld [vmem:[#allocation22_spill] sm:$0xff] }
 0x391   : > { %v516_v62 = vsel %vm10927_vm3, %v12709_v58, %v513_v52  ;;  %v7532_v60 = vadd.s32 4294967294, %v2368_v43  ;;  %vm4060_vm13 = vcmp.eq.s32.totalorder %v11022_v30, 2  ;;  %vm5498_vm8 = vcmp.lt.s32.totalorder %v5497_v45, 2 }
 0x392   : > { %7883 = vcosq.f32 %v516_v62  ;;  %v11041_v16 = vand.u32 3, %v2393_v15  ;;  %vm5499_vm3 = vcmp.eq.s32.totalorder %v5497_v45, 0  ;;  %vm5502_vm4 = vcmp.eq.s32.totalorder %v5497_v45, 2 }
 0x393   : > { %v11035_v37 = vpop.eup %7879  ;;  %7885 = vsinq.f32 %v516_v62  ;;  %vm7533_vm5 = vcmp.lt.s32.totalorder %v7532_v60, 0  ;;  %v5501_v20 = vsel %vm5499_vm3, %v7876_v2, %v2189_v18  ;;  %v619_v43 = vsel %vm534_vm2, %v618_v40, %v12750_v28  ;;  %v12753_v18 = vld [vmem:[#allocation54_spill] sm:$0xff] }
 0x394   : > { %v11039_v57 = vpop.eup %7881  ;;  %v2371_v61 = vsel %vm7533_vm5, 0, %v7532_v60  ;;  %vm2184_vm14 = vweird.f32 %v12736_v7  ;;  %v5504_v25 = vsel %vm5502_vm4, %v2192_v21, %v7878_v38  ;;  %v12752_v22 = vand.u32 2147483647, %v12751_v46  ;;  %v12754_v21 = vld [vmem:[#allocation28_spill] sm:$0xff] }
 0x395   : > { %v2372_v52 = vsub.s32 32, %v2371_v61  ;;  %v2376_v54 = vsub.s32 4294967266, %v2371_v61  ;;  %vm527_vm6 = vcmp.eq.s32.totalorder %v11018_v8, 2  ;;  %vm524_vm2 = vcmp.eq.s32.totalorder %v11018_v8, 0 }
 0x396   : > { %vm533_vm0 = vcmp.le.f32.partialorder %v12752_v22, 0.7853982  ;;  %v2373_v40 = vshll.u32 %v10991_v1, %v2371_v61  ;;  %vm4056_vm5 = vcmp.lt.s32.totalorder %v11022_v30, 2  ;;  %vm523_vm3 = vcmp.lt.s32.totalorder %v11018_v8, 2 }
 0x397   : > { %v620_v2 = vsel %vm533_vm0, %v12751_v46, %v12753_v18  ;;  %v11054_v60 = vsel %vm533_vm0, 0, %v619_v43  ;;  %v2374_v28 = vshrl.u32 %v2356_v3, %v2372_v52  ;;  %v2377_v38 = vadd.s32 127, %v2376_v54  ;;  %v12756_v18 = vld [vmem:[#allocation45_spill] sm:$0xff]  ;;  %v12757_v54 = vld [vmem:[#allocation62_spill] sm:$0xff] }
 0x398   : > { %7887 = vcosq.f32 %v620_v2  ;;  %v625_v22 = vadd.s32 3, %v11054_v60  ;;  %v12755_v15 = vand.u32 2147483647, %v12754_v21  ;;  %v826_v43 = vsub.s32 4, %v12756_v18 }
 0x399   : > { %7889 = vsinq.f32 %v620_v2  ;;  %vm520_vm0 = vweird.f32 %v12709_v58  ;;  %v2375_v62 = vor.u32 %v2374_v28, %v2373_v40  ;;  %v2378_v27 = vshll.u32 %v2377_v38, 23  ;;  %v12760_v38 = vld [vmem:[#allocation23_spill] sm:$0xff] }
 0x39a   : > { %vm741_vm4 = vcmp.le.f32.partialorder %v12755_v15, 0.7853982  ;;  %v2194_v1 = vsel %vm2187_vm11, %v2190_v55, %v2193_v49  ;;  %vm3854_vm10 = vcmp.eq.s32.totalorder %v11027_v36, 2  ;;  %v12758_v61 = vxor.u32 2147483648, %v11035_v37 }
 0x39b   : > { %v828_v3 = vsel %vm741_vm4, %v12754_v21, %v12757_v54  ;;  %v5505_v15 = vsel %vm5498_vm8, %v5501_v20, %v5504_v25  ;;  %v827_v2 = vsel %vm742_vm15, %v826_v43, %v12756_v18  ;;  %v2379_v9 = vor.u32 4788187, %v2378_v27 }
 0x39c   : > { %v4062_v52 = vsel %vm4060_vm13, %v12758_v61, %v11039_v57  ;;  %7891 = vcosq.f32 %v828_v3  ;;  %vm3851_vm11 = vcmp.eq.s32.totalorder %v11027_v36, 0  ;;  %v12759_v49 = vxor.u32 2147483648, %v11039_v57  ;;  %v7884_v28 = vpop.eup %7883 }
 0x39d   : > { %v11084_v40 = vsel %vm741_vm4, 0, %v827_v2  ;;  %7893 = vsinq.f32 %v828_v3  ;;  %v2382_v45 = vcvt.s32.f32 %v2375_v62  ;;  %v626_v25 = vand.u32 3, %v625_v22  ;;  %v7886_v43 = vpop.eup %7885 }
 0x39e   : > { %v4059_v55 = vsel %vm4057_vm7, %v11035_v37, %v12759_v49  ;;  %v833_v20 = vadd.s32 3, %v11084_v40  ;;  %v12761_v18 = vand.u32 2147483647, %v12760_v38  ;;  %v528_v54 = vxor.u32 2147483648, %v7884_v28  ;;  %v12765_v49 = vld [vmem:[#allocation57_spill] sm:$0xff] }
 0x39f   : > { %v2380_v61 = vand.u32 2147483647, %v2379_v9  ;;  %v2282_v17 = vsub.s32 4, %v12764_v63  ;;  %v525_v62 = vxor.u32 2147483648, %v7886_v43  ;;  %v2195_v22 = vsel %vm2184_vm14, nan, %v2194_v1 }
 0x3a0   : > { %vm11089_vm15 = vcmp.le.f32.partialorder %v12761_v18, 0.7853982  ;;  %vm3850_vm13 = vcmp.lt.s32.totalorder %v11027_v36, 2  ;;  %v11102_v2 = vand.u32 3, %v11015_v31  ;;  %v529_v9 = vsel %vm527_vm6, %v528_v54, %v7886_v43 }
 0x3a1   : > { %v2284_v3 = vsel %vm11089_vm15, %v12760_v38, %v12765_v49  ;;  %v2383_v18 = vmul.f32 %v2382_v45, %v2380_v61  ;;  %v11108_v41 = vsel %vm2184_vm14, nan, %v5505_v15  ;;  %v2283_v49 = vsel %vm2198_vm9, %v2282_v17, %v12764_v63 }
 0x3a2   : > { %7895 = vcosq.f32 %v2284_v3  ;;  %v526_v1 = vsel %vm524_vm2, %v7884_v28, %v525_v62  ;;  %vm12528_vm7 = vweird.f32 %v12743_v19  ;;  %v4063_v31 = vsel %vm4056_vm5, %v4059_v55, %v4062_v52  ;;  %v11118_v24 = vpop.eup %7887 }
 0x3a3   : > { %vm627_vm8 = vcmp.lt.s32.totalorder %v626_v25, 2  ;;  %v834_v0 = vand.u32 3, %v833_v20  ;;  %v530_v7 = vsel %vm523_vm3, %v526_v1, %v529_v9  ;;  %v2384_v15 = vxor.u32 2147483648, %v2383_v18  ;;  %v11122_v45 = vpop.eup %7889 }
 0x3a4   : > { %vm628_vm6 = vcmp.eq.s32.totalorder %v626_v25, 0  ;;  %vm631_vm14 = vcmp.eq.s32.totalorder %v626_v25, 2  ;;  %v531_v17 = vsel %vm520_vm0, nan, %v530_v7  ;;  %v3856_v63 = vsel %vm3854_vm10, %v528_v54, %v7886_v43  ;;  %v12766_v54 = vld [vmem:[#allocation49_spill] sm:$0xff] }
 0x3a5   : > { %vm624_vm9 = vweird.f32 %v12751_v46  ;;  %v12525_v30 = vxor.u32 2147483648, %v11118_v24  ;;  %v2285_v52 = vsel %vm11089_vm15, 0, %v2283_v49  ;;  %7052 = vrot.lane.b32.xlu0 %v531_v17, %s8051_s3  ;;  %v2385_v8 = vsel %vm2302_vm12, %v2384_v15, %v2383_v18 }
 0x3a6   : > { %v629_v55 = vxor.u32 2147483648, %v11122_v45  ;;  %7897 = vsinq.f32 %v2284_v3  ;;  %v2289_v20 = vadd.s32 3, %v2285_v52  ;;  %v11136_v61 = vpop.eup %7891  ;;  %v2388_v43 = vsel %vm10999_vm1, %v12721_v5, %v2385_v8 }
 0x3a7   : > { %v3853_v27 = vsel %vm3851_vm11, %v7884_v28, %v525_v62  ;;  %vm836_vm10 = vcmp.eq.s32.totalorder %v834_v0, 0  ;;  %v2490_v9 = vsub.s32 4, %v12766_v54  ;;  %v11144_v49 = vpop.eup %7893  ;;  %7899 = vcosq.f32 %v2388_v43  ;;  %v12767_v28 = vld [vmem:[#allocation32_spill] sm:$0xff] }
 0x3a8   : > { %v630_v18 = vsel %vm628_vm6, %v11118_v24, %v629_v55  ;;  %v633_v3 = vsel %vm631_vm14, %v12525_v30, %v11122_v45  ;;  %v840_v10 = vxor.u32 2147483648, %v11136_v61  ;;  %7901 = vsinq.f32 %v2388_v43 }
 0x3a9   : > { %v837_v1 = vxor.u32 2147483648, %v11144_v49  ;;  %vm839_vm12 = vcmp.eq.s32.totalorder %v834_v0, 2  ;;  %vm12768_vm1 = vcmp.lt.s32.totalorder %v12767_v28, 0  ;;  %7068 = vrot.lane.b32.xlu0 %v2195_v22, %s8051_s3  ;;  %v3857_v7 = vsel %vm3850_vm13, %v3853_v27, %v3856_v63 }
 0x3aa   : > { %v2491_v62 = vsel %vm12768_vm1, %v2490_v9, %v12766_v54  ;;  %v841_v15 = vsel %vm839_vm12, %v840_v10, %v11144_v49  ;;  %v2290_v17 = vand.u32 3, %v2289_v20  ;;  %v12769_v8 = vand.u32 2147483647, %v12767_v28  ;;  %v12770_v54 = vld [vmem:[#allocation69_spill] sm:$0xff] }
 0x3ab   : > { %v634_v43 = vsel %vm627_vm8, %v630_v18, %v633_v3  ;;  %vm835_vm5 = vcmp.lt.s32.totalorder %v834_v0, 2  ;;  %v838_v34 = vsel %vm836_vm10, %v11136_v61, %v837_v1  ;;  %vm2399_vm3 = vcmp.eq.s32.totalorder %v11041_v16, 2 }
 0x3ac   : > { %vm2405_vm2 = vcmp.le.f32.partialorder %v12769_v8, 0.7853982  ;;  %v11163_v30 = vpop.eup %7895  ;;  %v11173_v36 = vsel %vm12528_vm7, nan, %v4063_v31  ;;  %vm5708_vm4 = vcmp.eq.s32.totalorder %v11102_v2, 2  ;;  %v842_v63 = vsel %vm835_vm5, %v838_v34, %v841_v15 }
 0x3ad   : > { %v2492_v22 = vsel %vm2405_vm2, %v12767_v28, %v12770_v54  ;;  %v2493_v20 = vsel %vm2405_vm2, 0, %v2491_v62  ;;  %vm2396_vm11 = vcmp.eq.s32.totalorder %v11041_v16, 0  ;;  %v3858_v0 = vsel %vm520_vm0, nan, %v3857_v7 }
 0x3ae   : > { %7903 = vcosq.f32 %v2492_v22  ;;  %vm5705_vm15 = vcmp.eq.s32.totalorder %v11102_v2, 0  ;;  %vm12529_vm13 = vweird.f32 %v12754_v21  ;;  %v3952_v25 = vand.u32 3, %v11054_v60  ;;  %7151 = vrot.lane.b32.xlu0 %v3858_v0, %s8051_s3 }
 0x3af   : > { %7905 = vsinq.f32 %v2492_v22  ;;  %vm2395_vm8 = vcmp.lt.s32.totalorder %v11041_v16, 2  ;;  %vm5704_vm6 = vcmp.lt.s32.totalorder %v11102_v2, 2  ;;  %v635_v34 = vsel %vm624_vm9, nan, %v634_v43 }
 0x3b0   : > { %vm2291_vm14 = vcmp.lt.s32.totalorder %v2290_v17, 2  ;;  %v2296_v58 = vxor.u32 2147483648, %v11163_v30  ;;  %v4158_v31 = vand.u32 3, %v11084_v40  ;;  %vm2392_vm0 = vweird.f32 %v12721_v5  ;;  %v7898_v9 = vpop.eup %7897 }
 0x3b1   : > { %v11192_v27 = vsel %vm12529_vm13, nan, %v842_v63  ;;  %vm2292_vm10 = vcmp.eq.s32.totalorder %v2290_v17, 0  ;;  %vm2295_vm12 = vcmp.eq.s32.totalorder %v2290_v17, 2  ;;  %v2497_v60 = vadd.s32 3, %v2493_v20  ;;  %v7900_v8 = vpop.eup %7899 }
 0x3b2   : > { %vm2288_vm1 = vweird.f32 %v12760_v38  ;;  %vm3954_vm2 = vcmp.eq.s32.totalorder %v3952_v25, 0  ;;  %vm3957_vm5 = vcmp.eq.s32.totalorder %v3952_v25, 2  ;;  %v5600_v18 = vand.u32 3, %v2285_v52  ;;  %7167 = vrot.lane.b32.xlu0 %v11108_v41, %s8051_s3  ;;  %v7902_v22 = vpop.eup %7901 }
 0x3b3   : > { %v11195_v3 = vand.u32 3, %v2493_v20  ;;  %v2293_v62 = vxor.u32 2147483648, %v7898_v9  ;;  %v3956_v40 = vsel %vm3954_vm2, %v11118_v24, %v629_v55  ;;  %v12771_v7 = vxor.u32 2147483648, %v11118_v24 }
 0x3b4   : > { %vm4160_vm7 = vcmp.eq.s32.totalorder %v4158_v31, 0  ;;  %v2297_v43 = vsel %vm2295_vm12, %v2296_v58, %v7898_v9  ;;  %vm4163_vm13 = vcmp.eq.s32.totalorder %v4158_v31, 2  ;;  %v729_v52 = vadd.s32 3, %v11009_v26 }
 0x3b5   : > { %v3959_v15 = vsel %vm3957_vm5, %v12771_v7, %v11122_v45  ;;  %v4162_v54 = vsel %vm4160_vm7, %v11136_v61, %v837_v1  ;;  %v2400_v63 = vxor.u32 2147483648, %v7900_v8  ;;  %v2294_v55 = vsel %vm2292_vm10, %v11163_v30, %v2293_v62 }
 0x3b6   : > { %vm3953_vm2 = vcmp.lt.s32.totalorder %v3952_v25, 2  ;;  %v4165_v24 = vsel %vm4163_vm13, %v840_v10, %v11144_v49  ;;  %v2397_v45 = vxor.u32 2147483648, %v7902_v22  ;;  %v2498_v20 = vand.u32 3, %v2497_v60  ;;  %7084 = vrot.lane.b32.xlu0 %v635_v34, %s8051_s3 }
 0x3b7   : > { %v3960_v0 = vsel %vm3953_vm2, %v3956_v40, %v3959_v15  ;;  %vm4159_vm5 = vcmp.lt.s32.totalorder %v4158_v31, 2  ;;  %v2401_v41 = vsel %vm2399_vm3, %v2400_v63, %v7902_v22  ;;  %v5710_v61 = vsel %vm5708_vm4, %v2400_v63, %v7902_v22  ;;  %v12778_v22 = vld [vmem:[#allocation70_spill] sm:$0xff] }
 0x3b8   : > { %v2298_v26 = vsel %vm2291_vm14, %v2294_v55, %v2297_v43  ;;  %v4166_v1 = vsel %vm4159_vm5, %v4162_v54, %v4165_v24  ;;  %v7904_v7 = vpop.eup %7903  ;;  %v2398_v6 = vsel %vm2396_vm11, %v7900_v8, %v2397_v45  ;;  %v5707_v49 = vsel %vm5705_vm15, %v7900_v8, %v2397_v45  ;;  %v12777_v54 = vld [vmem:[#allocation52_spill] sm:$0xff] }
 0x3b9   : > { %vm5602_vm7 = vcmp.eq.s32.totalorder %v5600_v18, 0  ;;  %vm5605_vm13 = vcmp.eq.s32.totalorder %v5600_v18, 2  ;;  %v7906_v10 = vpop.eup %7905  ;;  %v2402_v25 = vsel %vm2395_vm8, %v2398_v6, %v2401_v41  ;;  %v5711_v17 = vsel %vm5704_vm6, %v5707_v49, %v5710_v61  ;;  %v12784_v49 = vld [vmem:[#allocation58_spill] sm:$0xff] }
 0x3ba   : > { %v2504_v31 = vxor.u32 2147483648, %v7904_v7  ;;  %v5604_v60 = vsel %vm5602_vm7, %v11163_v30, %v2293_v62  ;;  %v2403_v40 = vsel %vm2392_vm0, nan, %v2402_v25  ;;  %v2501_v15 = vxor.u32 2147483648, %v7906_v10  ;;  %v12785_v25 = vld [vmem:[#allocation72_spill] sm:$0xff] }
 0x3bb   : > { %vm5601_vm3 = vcmp.lt.s32.totalorder %v5600_v18, 2  ;;  %v5607_v8 = vsel %vm5605_vm13, %v2296_v58, %v7898_v9  ;;  %7070 = vrot.lane.b32.xlu1 %v2403_v40, %s8051_s3  ;;  %v2299_v34 = vsel %vm2288_vm1, nan, %v2298_v26  ;;  %vm2499_vm4 = vcmp.lt.s32.totalorder %v2498_v20, 2  ;;  %v12773_v18 = vld [vmem:[#allocation40_spill] sm:$0xff] }
 0x3bc   : > { %vm2500_vm11 = vcmp.eq.s32.totalorder %v2498_v20, 0  ;;  %v5608_v6 = vsel %vm5601_vm3, %v5604_v60, %v5607_v8  ;;  %v5712_v16 = vsel %vm2392_vm0, nan, %v5711_v17  ;;  %7100 = vrot.lane.b32.xlu0 %v2299_v34, %s8051_s3  ;;  %vm2503_vm15 = vcmp.eq.s32.totalorder %v2498_v20, 2  ;;  %v12786_v20 = vld [vmem:[#allocation59_spill] sm:$0xff]  ;;  %v12792_v8 = vld [vmem:[#allocation77_spill] sm:$0xff] }
 0x3bd   : > { %v3961_v2 = vsel %vm624_vm9, nan, %v3960_v0  ;;  %vm12772_vm8 = vweird.f32 %v12754_v21  ;;  %vm2496_vm6 = vweird.f32 %v12767_v28  ;;  %v2505_v58 = vsel %vm2503_vm15, %v2504_v31, %v7906_v10 }
 0x3be   : > { %v11235_v30 = vsel %vm12772_vm8, nan, %v4166_v1  ;;  %vm5808_vm14 = vcmp.eq.s32.totalorder %v11195_v3, 0  ;;  %v730_v9 = vand.u32 3, %v729_v52  ;;  %v12774_v62 = vand.u32 2147483647, %v12773_v18  ;;  %v12782_v1 = vld [vmem:[#allocation43_spill] sm:$0xff] }
 0x3bf   : > { %v2502_v43 = vsel %vm2500_vm11, %v7904_v7, %v2501_v15  ;;  %v5609_v46 = vsel %vm2288_vm1, nan, %v5608_v6  ;;  %v930_v21 = vsub.s32 4, %v12777_v54  ;;  %7153 = vrot.lane.b32.xlu1 %v11173_v36, %s8051_s3  ;;  %v5810_v52 = vsel %vm5808_vm14, %v7904_v7, %v2501_v15 }
 0x3c0   : > { %vm11241_vm10 = vcmp.le.f32.partialorder %v12774_v62, 0.7853982  ;;  %vm5811_vm9 = vcmp.eq.s32.totalorder %v11195_v3, 2  ;;  %vm732_vm0 = vcmp.eq.s32.totalorder %v730_v9, 0  ;;  %vm735_vm12 = vcmp.eq.s32.totalorder %v730_v9, 2  ;;  %7183 = vrot.lane.b32.xlu0 %v3961_v2, %s8051_s3 }
 0x3c1   : > { %v932_v63 = vsel %vm11241_vm10, %v12773_v18, %v12778_v22  ;;  %v12779_v38 = vxor.u32 2147483648, %v11039_v57  ;;  %v12780_v24 = vxor.u32 2147483648, %v11035_v37  ;;  %vm12781_vm1 = vcmp.lt.s32.totalorder %v12773_v18, 0 }
 0x3c2   : > { %v931_v0 = vsel %vm12781_vm1, %v930_v21, %v12777_v54  ;;  %7907 = vcosq.f32 %v932_v63  ;;  %v2506_v36 = vsel %vm2499_vm4, %v2502_v43, %v2505_v58  ;;  %v5813_v41 = vsel %vm5811_vm9, %v2504_v31, %v7906_v10  ;;  %v12790_v31 = vld [vmem:[#allocation65_spill] sm:$0xff] }
 0x3c3   : > { %v734_v55 = vsel %vm732_vm0, %v11035_v37, %v12779_v38  ;;  %v737_v45 = vsel %vm735_vm12, %v12780_v24, %v11039_v57  ;;  %v933_v61 = vsel %vm11241_vm10, 0, %v931_v0  ;;  %7909 = vsinq.f32 %v932_v63  ;;  %7169 = vrot.lane.b32.xlu1 %v5712_v16, %s8051_s3  ;;  %v12799_v63 = vld [vmem:[#allocation67_spill] sm:$0xff]  ;;  %v12800_v38 = vld [vmem:[#allocation81_spill] sm:$0xff] }
 0x3c4   : > { %vm731_vm2 = vcmp.lt.s32.totalorder %v730_v9, 2  ;;  %v937_v26 = vadd.s32 3, %v933_v61  ;;  %v12783_v7 = vand.u32 2147483647, %v12782_v1  ;;  %v2594_v37 = vsub.s32 4, %v12784_v49  ;;  %7199 = vrot.lane.b32.xlu0 %v5609_v46, %s8051_s3  ;;  %v12795_v46 = vld [vmem:[#allocation63_spill] sm:$0xff] }
 0x3c5   : > { %v738_v57 = vsel %vm731_vm2, %v734_v55, %v737_v45  ;;  %v12787_v60 = vand.u32 2147483647, %v12786_v20  ;;  %v1138_v40 = vsub.s32 4, %v12790_v31  ;;  %vm5807_vm13 = vcmp.lt.s32.totalorder %v11195_v3, 2 }
 0x3c6   : > { %vm2509_vm5 = vcmp.le.f32.partialorder %v12783_v7, 0.7853982  ;;  %vm12791_vm3 = vcmp.lt.s32.totalorder %v12782_v1, 0  ;;  %v938_v6 = vand.u32 3, %v937_v26  ;;  %vm12793_vm4 = vcmp.lt.s32.totalorder %v12786_v20, 0 }
 0x3c7   : > { %v2596_v17 = vsel %vm2509_vm5, %v12782_v1, %v12785_v25  ;;  %vm11276_vm7 = vcmp.le.f32.partialorder %v12787_v60, 0.7853982  ;;  %v2595_v15 = vsel %vm12791_vm3, %v2594_v37, %v12784_v49  ;;  %v1139_v2 = vsel %vm12793_vm4, %v1138_v40, %v12790_v31  ;;  %7086 = vrot.lane.b32.xlu1 %v11192_v27, %s8051_s3 }
 0x3c8   : > { %7911 = vcosq.f32 %v2596_v17  ;;  %v1140_v34 = vsel %vm11276_vm7, %v12786_v20, %v12792_v8  ;;  %v2597_v16 = vsel %vm2509_vm5, 0, %v2595_v15  ;;  %v2507_v3 = vsel %vm2496_vm6, nan, %v2506_v36 }
 0x3c9   : > { %7913 = vsinq.f32 %v2596_v17  ;;  %v5814_v58 = vsel %vm5807_vm13, %v5810_v52, %v5813_v41  ;;  %vm12794_vm11 = vweird.f32 %v12743_v19  ;;  %v2601_v62 = vadd.s32 3, %v2597_v16 }
 0x3ca   : > { %v739_v9 = vsel %vm12794_vm11, nan, %v738_v57  ;;  %v1141_v5 = vsel %vm11276_vm7, 0, %v1139_v2  ;;  %7915 = vcosq.f32 %v1140_v34  ;;  %v4261_v43 = vand.u32 3, %v933_v61 }
 0x3cb   : > { %v12796_v54 = vand.u32 2147483647, %v12795_v46  ;;  %7054 = vrot.lane.b32.xlu0 %v739_v9, %s8051_s3  ;;  %v2602_v22 = vand.u32 3, %v2601_v62  ;;  %7917 = vsinq.f32 %v1140_v34  ;;  %v1145_v19 = vadd.s32 3, %v1141_v5  ;;  %7102 = vrot.lane.b32.xlu1 %v2507_v3, %s8051_s3 }
 0x3cc   : > { %v2802_v52 = vsub.s32 4, %v12799_v63  ;;  %v5815_v27 = vsel %vm2496_vm6, nan, %v5814_v58  ;;  %vm936_vm8 = vweird.f32 %v12773_v18  ;;  %vm939_vm14 = vcmp.lt.s32.totalorder %v938_v6, 2  ;;  %v7908_v24 = vpop.eup %7907 }
 0x3cd   : > { %vm11303_vm15 = vcmp.le.f32.partialorder %v12796_v54, 0.7853982  ;;  %vm940_vm10 = vcmp.eq.s32.totalorder %v938_v6, 0  ;;  %vm943_vm9 = vcmp.eq.s32.totalorder %v938_v6, 2  ;;  %vm4262_vm0 = vcmp.lt.s32.totalorder %v4261_v43, 2  ;;  %v7910_v45 = vpop.eup %7909 }
 0x3ce   : > { %v2804_v55 = vsel %vm11303_vm15, %v12795_v46, %v12800_v38  ;;  %vm4263_vm12 = vcmp.eq.s32.totalorder %v4261_v43, 0  ;;  %v944_v0 = vxor.u32 2147483648, %v7908_v24  ;;  %vm2600_vm1 = vweird.f32 %v12782_v1 }
 0x3cf   : > { %vm4266_vm6 = vcmp.eq.s32.totalorder %v4261_v43, 2  ;;  %vm12801_vm2 = vcmp.lt.s32.totalorder %v12795_v46, 0  ;;  %7919 = vcosq.f32 %v2804_v55  ;;  %v941_v36 = vxor.u32 2147483648, %v7910_v45  ;;  %7185 = vrot.lane.b32.xlu1 %v11235_v30, %s8051_s3 }
 0x3d0   : > { %v2803_v28 = vsel %vm12801_vm2, %v2802_v52, %v12799_v63  ;;  %vm2603_vm5 = vcmp.lt.s32.totalorder %v2602_v22, 2  ;;  %vm2604_vm7 = vcmp.eq.s32.totalorder %v2602_v22, 0  ;;  %v1146_v41 = vand.u32 3, %v1145_v19 }
 0x3d1   : > { %v945_v61 = vsel %vm943_vm9, %v944_v0, %v7910_v45  ;;  %v4268_v26 = vsel %vm4266_vm6, %v944_v0, %v7910_v45  ;;  %v11323_v7 = vsel %vm11303_vm15, 0, %v2803_v28  ;;  %7921 = vsinq.f32 %v2804_v55  ;;  %v12802_v55 = vld [vmem:[#allocation47_spill] sm:$0xff]  ;;  %v12804_v45 = vld [vmem:[#allocation61_spill] sm:$0xff] }
 0x3d2   : > { %v7912_v49 = vpop.eup %7911  ;;  %v942_v37 = vsel %vm940_vm10, %v7908_v24, %v941_v36  ;;  %v4265_v57 = vsel %vm4263_vm12, %v7908_v24, %v941_v36  ;;  %v2809_v25 = vadd.s32 3, %v11323_v7  ;;  %v5909_v17 = vand.u32 3, %v2597_v16 }
 0x3d3   : > { %v7914_v60 = vpop.eup %7913  ;;  %v946_v10 = vsel %vm939_vm14, %v942_v37, %v945_v61  ;;  %vm2607_vm13 = vcmp.eq.s32.totalorder %v2602_v22, 2  ;;  %v2608_v31 = vxor.u32 2147483648, %v7912_v49  ;;  %v4269_v40 = vsel %vm4262_vm0, %v4265_v57, %v4268_v26  ;;  %7201 = vrot.lane.b32.xlu1 %v5815_v27, %s8051_s3  ;;  %v12805_v26 = vld [vmem:[#allocation73_spill] sm:$0xff] }
 0x3d4   : > { %v2605_v15 = vxor.u32 2147483648, %v7914_v60  ;;  %vm1144_vm3 = vweird.f32 %v12786_v20  ;;  %vm1147_vm4 = vcmp.lt.s32.totalorder %v1146_v41, 2  ;;  %vm1148_vm11 = vcmp.eq.s32.totalorder %v1146_v41, 0  ;;  %v7916_v8 = vpop.eup %7915 }
 0x3d5   : > { %vm1151_vm15 = vcmp.eq.s32.totalorder %v1146_v41, 2  ;;  %v947_v34 = vsel %vm936_vm8, nan, %v946_v10  ;;  %v2609_v16 = vsel %vm2607_vm13, %v2608_v31, %v7914_v60  ;;  %v2810_v2 = vand.u32 3, %v2809_v25  ;;  %v7918_v30 = vpop.eup %7917 }
 0x3d6   : > { %v4467_v3 = vand.u32 3, %v1141_v5  ;;  %v2606_v6 = vsel %vm2604_vm7, %v7912_v49, %v2605_v15  ;;  %v1152_v58 = vxor.u32 2147483648, %v7916_v8  ;;  %v4270_v9 = vsel %vm936_vm8, nan, %v4269_v40 }
 0x3d7   : > { %vm5911_vm14 = vcmp.eq.s32.totalorder %v5909_v17, 0  ;;  %v2610_v62 = vsel %vm2603_vm5, %v2606_v6, %v2609_v16  ;;  %v1149_v43 = vxor.u32 2147483648, %v7918_v30  ;;  %vm5914_vm10 = vcmp.eq.s32.totalorder %v5909_v17, 2  ;;  %7056 = vrot.lane.b32.xlu1 %v947_v34, %s8051_s3  ;;  %v12808_v16 = vld [vmem:[#allocation51_spill] sm:$0xff] }
 0x3d8   : > { %v5913_v54 = vsel %vm5911_vm14, %v7912_v49, %v2605_v15  ;;  %v2611_v21 = vsel %vm2600_vm1, nan, %v2610_v62  ;;  %v1153_v5 = vsel %vm1151_vm15, %v1152_v58, %v7918_v30  ;;  %vm2808_vm9 = vweird.f32 %v12795_v46  ;;  %v12807_v15 = vld [vmem:[#allocation64_spill] sm:$0xff] }
 0x3d9   : > { %vm5910_vm0 = vcmp.lt.s32.totalorder %v5909_v17, 2  ;;  %v5916_v19 = vsel %vm5914_vm10, %v2608_v31, %v7914_v60  ;;  %v7920_v63 = vpop.eup %7919  ;;  %7072 = vrot.lane.b32.xlu0 %v2611_v21, %s8051_s3  ;;  %v1150_v18 = vsel %vm1148_vm11, %v7916_v8, %v1149_v43  ;;  %vm2811_vm8 = vcmp.lt.s32.totalorder %v2810_v2, 2 }
 0x3da   : > { %vm2812_vm12 = vcmp.eq.s32.totalorder %v2810_v2, 0  ;;  %vm2815_vm6 = vcmp.eq.s32.totalorder %v2810_v2, 2  ;;  %v1154_v22 = vsel %vm1147_vm4, %v1150_v18, %v1153_v5  ;;  %v2816_v52 = vxor.u32 2147483648, %v7920_v63 }
 0x3db   : > { %v5917_v27 = vsel %vm5910_vm0, %v5913_v54, %v5916_v19  ;;  %vm4468_vm2 = vcmp.lt.s32.totalorder %v4467_v3, 2  ;;  %v7922_v38 = vpop.eup %7921  ;;  %vm4469_vm5 = vcmp.eq.s32.totalorder %v4467_v3, 0  ;;  %vm4472_vm7 = vcmp.eq.s32.totalorder %v4467_v3, 2  ;;  %v12811_v3 = vld [vmem:[#allocation74_spill] sm:$0xff] }
 0x3dc   : > { %v12803_v24 = vand.u32 2147483647, %v12802_v55  ;;  %v1034_v0 = vsub.s32 4, %v12804_v45  ;;  %v2813_v28 = vxor.u32 2147483648, %v7922_v38  ;;  %v2817_v36 = vsel %vm2815_vm6, %v2816_v52, %v7922_v38 }
 0x3dd   : > { %v4471_v61 = vsel %vm4469_vm5, %v7916_v8, %v1149_v43  ;;  %v1155_v49 = vsel %vm1144_vm3, nan, %v1154_v22  ;;  %7155 = vrot.lane.b32.xlu0 %v4270_v9, %s8051_s3  ;;  %v4474_v37 = vsel %vm4472_vm7, %v1152_v58, %v7918_v30  ;;  %vm12806_vm4 = vcmp.lt.s32.totalorder %v12802_v55, 0 }
 0x3de   : > { %vm949_vm13 = vcmp.le.f32.partialorder %v12803_v24, 0.7853982  ;;  %v1035_v57 = vsel %vm12806_vm4, %v1034_v0, %v12804_v45  ;;  %v2814_v25 = vsel %vm2812_vm12, %v7920_v63, %v2813_v28  ;;  %v6115_v60 = vand.u32 3, %v11323_v7  ;;  %7058 = vrot.lane.b32.xlu1 %v1155_v49, %s8051_s3 }
 0x3df   : > { %v1036_v41 = vsel %vm949_vm13, %v12802_v55, %v12805_v26  ;;  %v1037_v17 = vsel %vm949_vm13, 0, %v1035_v57  ;;  %v2818_v10 = vsel %vm2811_vm8, %v2814_v25, %v2817_v36  ;;  %v5918_v31 = vsel %vm2600_vm1, nan, %v5917_v27  ;;  %v12820_v26 = vld [vmem:[#allocation71_spill] sm:$0xff] }
 0x3e0   : > { %7923 = vcosq.f32 %v1036_v41  ;;  %v1041_v40 = vadd.s32 3, %v1037_v17  ;;  %v2698_v8 = vsub.s32 4, %v12807_v15  ;;  %v4475_v34 = vsel %vm4468_vm2, %v4471_v61, %v4474_v37  ;;  %v12821_v37 = vld [vmem:[#allocation66_spill] sm:$0xff] }
 0x3e1   : > { %7925 = vsinq.f32 %v1036_v41  ;;  %vm6117_vm11 = vcmp.eq.s32.totalorder %v6115_v60, 0  ;;  %vm6120_vm15 = vcmp.eq.s32.totalorder %v6115_v60, 2  ;;  %v12809_v30 = vand.u32 2147483647, %v12808_v16  ;;  %7171 = vrot.lane.b32.xlu0 %v5918_v31, %s8051_s3 }
 0x3e2   : > { %v2819_v7 = vsel %vm2808_vm9, nan, %v2818_v10  ;;  %v6119_v2 = vsel %vm6117_vm11, %v7920_v63, %v2813_v28  ;;  %v6122_v6 = vsel %vm6120_vm15, %v2816_v52, %v7922_v38  ;;  %vm12810_vm1 = vcmp.lt.s32.totalorder %v12808_v16, 0  ;;  %v12815_v52 = vld [vmem:[#allocation68_spill] sm:$0xff] }
 0x3e3   : > { %vm2613_vm14 = vcmp.le.f32.partialorder %v12809_v30, 0.7853982  ;;  %v2699_v1 = vsel %vm12810_vm1, %v2698_v8, %v12807_v15  ;;  %v1042_v58 = vand.u32 3, %v1041_v40  ;;  %vm6116_vm10 = vcmp.lt.s32.totalorder %v6115_v60, 2  ;;  %7074 = vrot.lane.b32.xlu1 %v2819_v7, %s8051_s3 }
 0x3e4   : > { %v2700_v9 = vsel %vm2613_vm14, %v12808_v16, %v12811_v3  ;;  %v2701_v62 = vsel %vm2613_vm14, 0, %v2699_v1  ;;  %v12812_v43 = vshll.u32 %v10839_v44, %v10960_v23  ;;  %v12813_v21 = vshll.u32 %v10989_v48, 23 }
 0x3e5   : > { %v4476_v19 = vsel %vm1144_vm3, nan, %v4475_v34  ;;  %v6123_v63 = vsel %vm6116_vm10, %v6119_v2, %v6122_v6  ;;  %7927 = vcosq.f32 %v2700_v9  ;;  %v2705_v18 = vadd.s32 3, %v2701_v62 }
 0x3e6   : > { %v11381_v54 = vor.u32 %v11011_v39, %v12812_v43  ;;  %v11385_v5 = vor.u32 4788187, %v12813_v21  ;;  %v12814_v22 = vand.u32 2147483647, %v9141_v33  ;;  %v1242_v44 = vsub.s32 4, %v12815_v52 }
 0x3e7   : > { %vm1040_vm8 = vweird.f32 %v12802_v55  ;;  %7929 = vsinq.f32 %v2700_v9  ;;  %v4364_v48 = vand.u32 3, %v1037_v17  ;;  %vm1043_vm12 = vcmp.lt.s32.totalorder %v1042_v58, 2  ;;  %7157 = vrot.lane.b32.xlu1 %v4476_v19, %s8051_s3 }
 0x3e8   : > { %vm1157_vm0 = vcmp.le.f32.partialorder %v12814_v22, 0.7853982  ;;  %vm1044_vm6 = vcmp.eq.s32.totalorder %v1042_v58, 0  ;;  %vm12816_vm3 = vcmp.lt.s32.totalorder %v9141_v33, 0  ;;  %vm1047_vm2 = vcmp.eq.s32.totalorder %v1042_v58, 2  ;;  %v12823_v22 = vld [vmem:[#allocation46_spill] sm:$0xff] }
 0x3e9   : > { %v1244_v23 = vsel %vm1157_vm0, %v9141_v33, %v10075_v42  ;;  %v1243_v39 = vsel %vm12816_vm3, %v1242_v44, %v12815_v52  ;;  %v6124_v27 = vsel %vm2808_vm9, nan, %v6123_v63  ;;  %v2706_v42 = vand.u32 3, %v2705_v18 }
 0x3ea   : > { %7931 = vcosq.f32 %v1244_v23  ;;  %v7924_v20 = vpop.eup %7923  ;;  %v1245_v38 = vsel %vm1157_vm0, 0, %v1243_v39  ;;  %vm4365_vm5 = vcmp.lt.s32.totalorder %v4364_v48, 2  ;;  %v12817_v0 = vand.u32 2147483647, %v12660_v56 }
 0x3eb   : > { %7933 = vsinq.f32 %v1244_v23  ;;  %v7926_v24 = vpop.eup %7925  ;;  %v1048_v45 = vxor.u32 2147483648, %v7924_v20  ;;  %v1249_v61 = vadd.s32 3, %v1245_v38  ;;  %vm4369_vm13 = vcmp.eq.s32.totalorder %v4364_v48, 2  ;;  %7173 = vrot.lane.b32.xlu1 %v6124_v27, %s8051_s3 }
 0x3ec   : > { %vm11404_vm7 = vcmp.le.f32.partialorder %v12817_v0, 0.7853982  ;;  %v1045_v36 = vxor.u32 2147483648, %v7926_v24  ;;  %v2906_v41 = vsub.s32 4, %v12820_v26  ;;  %vm4366_vm4 = vcmp.eq.s32.totalorder %v4364_v48, 0 }
 0x3ed   : > { %v1049_v49 = vsel %vm1047_vm2, %v1048_v45, %v7926_v24  ;;  %v4371_v46 = vsel %vm4369_vm13, %v1048_v45, %v7926_v24  ;;  %v2908_v57 = vsel %vm11404_vm7, %v12660_v56, %v12821_v37  ;;  %vm2704_vm9 = vweird.f32 %v12808_v16  ;;  %v12828_v37 = vld [vmem:[#allocation87_spill] sm:$0xff] }
 0x3ee   : > { %v1046_v25 = vsel %vm1044_vm6, %v7924_v20, %v1045_v36  ;;  %v1250_v17 = vand.u32 3, %v1249_v61  ;;  %v4368_v60 = vsel %vm4366_vm4, %v7924_v20, %v1045_v36  ;;  %vm12822_vm11 = vcmp.lt.s32.totalorder %v12660_v56, 0 }
 0x3ef   : > { %v2907_v10 = vsel %vm12822_vm11, %v2906_v41, %v12820_v26  ;;  %v1050_v31 = vsel %vm1043_vm12, %v1046_v25, %v1049_v49  ;;  %vm2707_vm15 = vcmp.lt.s32.totalorder %v2706_v42, 2  ;;  %7935 = vcosq.f32 %v2908_v57  ;;  %v7928_v34 = vpop.eup %7927  ;;  %v12827_v49 = vld [vmem:[#allocation75_spill] sm:$0xff] }
 0x3f0   : > { %v2909_v40 = vsel %vm11404_vm7, 0, %v2907_v10  ;;  %v1051_v15 = vsel %vm1040_vm8, nan, %v1050_v31  ;;  %vm2708_vm14 = vcmp.eq.s32.totalorder %v2706_v42, 0  ;;  %vm2711_vm1 = vcmp.eq.s32.totalorder %v2706_v42, 2  ;;  %v12830_v10 = vld [vmem:[#allocation48_spill] sm:$0xff] }
 0x3f1   : > { %vm1248_vm10 = vweird.f32 %v9141_v33  ;;  %v4372_v8 = vsel %vm4365_vm5, %v4368_v60, %v4371_v46  ;;  %7088 = vrot.lane.b32.xlu0 %v1051_v15, %s8051_s3  ;;  %vm1251_vm0 = vcmp.lt.s32.totalorder %v1250_v17, 2  ;;  %7937 = vsinq.f32 %v2908_v57  ;;  %v7930_v2 = vpop.eup %7929 }
 0x3f2   : > { %v2913_v30 = vadd.s32 3, %v2909_v40  ;;  %v6012_v7 = vand.u32 3, %v2701_v62  ;;  %v2712_v6 = vxor.u32 2147483648, %v7928_v34  ;;  %vm1252_vm12 = vcmp.eq.s32.totalorder %v1250_v17, 0 }
 0x3f3   : > { %vm1255_vm6 = vcmp.eq.s32.totalorder %v1250_v17, 2  ;;  %v4570_v1 = vand.u32 3, %v1245_v38  ;;  %v2709_v3 = vxor.u32 2147483648, %v7930_v2  ;;  %v4373_v9 = vsel %vm1040_vm8, nan, %v4372_v8 }
 0x3f4   : > { %v7932_v58 = vpop.eup %7931  ;;  %v2914_v43 = vand.u32 3, %v2913_v30  ;;  %v6218_v21 = vand.u32 3, %v2909_v40  ;;  %v2713_v63 = vsel %vm2711_vm1, %v2712_v6, %v7930_v2  ;;  %vm6013_vm3 = vcmp.lt.s32.totalorder %v6012_v7, 2  ;;  %v12832_v40 = vld [vmem:[#allocation78_spill] sm:$0xff] }
 0x3f5   : > { %v7934_v19 = vpop.eup %7933  ;;  %v1256_v18 = vxor.u32 2147483648, %v7932_v58  ;;  %v12824_v52 = vand.u32 2147483647, %v12823_v22  ;;  %v2710_v44 = vsel %vm2708_vm14, %v7928_v34, %v2709_v3  ;;  %vm6014_vm5 = vcmp.eq.s32.totalorder %v6012_v7, 0 }
 0x3f6   : > { %v1253_v23 = vxor.u32 2147483648, %v7934_v19  ;;  %vm6017_vm7 = vcmp.eq.s32.totalorder %v6012_v7, 2  ;;  %v2714_v55 = vsel %vm2707_vm15, %v2710_v44, %v2713_v63  ;;  %v6016_v39 = vsel %vm6014_vm5, %v7928_v34, %v2709_v3  ;;  %v12833_v7 = vld [vmem:[#allocation88_spill] sm:$0xff] }
 0x3f7   : > { %vm11432_vm2 = vcmp.le.f32.partialorder %v12824_v52, 0.7853982  ;;  %v1257_v48 = vsel %vm1255_vm6, %v1256_v18, %v7934_v19  ;;  %vm4571_vm8 = vcmp.lt.s32.totalorder %v4570_v1, 2  ;;  %v2715_v20 = vsel %vm2704_vm9, nan, %v2714_v55 }
 0x3f8   : > { %v1254_v27 = vsel %vm1252_vm12, %v7932_v58, %v1253_v23  ;;  %vm2912_vm13 = vweird.f32 %v12660_v56  ;;  %vm2915_vm4 = vcmp.lt.s32.totalorder %v2914_v43, 2  ;;  %v6019_v38 = vsel %vm6017_vm7, %v2712_v6, %v7930_v2  ;;  %7104 = vrot.lane.b32.xlu0 %v2715_v20, %s8051_s3 }
 0x3f9   : > { %v1258_v24 = vsel %vm1251_vm0, %v1254_v27, %v1257_v48  ;;  %vm2916_vm11 = vcmp.eq.s32.totalorder %v2914_v43, 0  ;;  %v6020_v45 = vsel %vm6013_vm3, %v6016_v39, %v6019_v38  ;;  %vm4572_vm15 = vcmp.eq.s32.totalorder %v4570_v1, 0  ;;  %v7936_v42 = vpop.eup %7935  ;;  %v12838_v38 = vld [vmem:[#allocation98_spill] sm:$0xff] }
 0x3fa   : > { %v1259_v0 = vsel %vm1248_vm10, nan, %v1258_v24  ;;  %vm2919_vm14 = vcmp.eq.s32.totalorder %v2914_v43, 2  ;;  %v4574_v28 = vsel %vm4572_vm15, %v7932_v58, %v1253_v23  ;;  %vm4575_vm1 = vcmp.eq.s32.totalorder %v4570_v1, 2  ;;  %v12836_v23 = vld [vmem:[#allocation84_spill] sm:$0xff] }
 0x3fb   : > { %7090 = vrot.lane.b32.xlu1 %v1259_v0, %s8051_s3  ;;  %v2920_v36 = vxor.u32 2147483648, %v7936_v42  ;;  %v6021_v61 = vsel %vm2704_vm9, nan, %v6020_v45  ;;  %v4577_v26 = vsel %vm4575_vm1, %v1256_v18, %v7934_v19  ;;  %vm6219_vm12 = vcmp.lt.s32.totalorder %v6218_v21, 2  ;;  %v7938_v41 = vpop.eup %7937  ;;  %v12839_v0 = vld [vmem:[#allocation80_spill] sm:$0xff] }
 0x3fc   : > { %vm6220_vm0 = vcmp.eq.s32.totalorder %v6218_v21, 0  ;;  %vm6223_vm6 = vcmp.eq.s32.totalorder %v6218_v21, 2  ;;  %v1346_v46 = vsub.s32 4, %v12827_v49  ;;  %v1348_v57 = vsel %vm11432_vm2, %v12823_v22, %v12828_v37  ;;  %7187 = vrot.lane.b32.xlu0 %v4373_v9, %s8051_s3 }
 0x3fd   : > { %v2917_v25 = vxor.u32 2147483648, %v7938_v41  ;;  %v2921_v17 = vsel %vm2919_vm14, %v2920_v36, %v7938_v41  ;;  %v6225_v60 = vsel %vm6223_vm6, %v2920_v36, %v7938_v41  ;;  %7939 = vcosq.f32 %v1348_v57  ;;  %v12843_v41 = vld [vmem:[#allocation85_spill] sm:$0xff] }
 0x3fe   : > { %vm12829_vm9 = vcmp.lt.s32.totalorder %v12823_v22, 0  ;;  %7941 = vsinq.f32 %v1348_v57  ;;  %v12831_v31 = vand.u32 2147483647, %v12830_v10  ;;  %v3010_v15 = vsub.s32 4, %v12832_v40 }
 0x3ff   : > { %v1347_v16 = vsel %vm12829_vm9, %v1346_v46, %v12827_v49  ;;  %v2918_v8 = vsel %vm2916_vm11, %v7936_v42, %v2917_v25  ;;  %v6222_v34 = vsel %vm6220_vm0, %v7936_v42, %v2917_v25  ;;  %v4578_v58 = vsel %vm4571_vm8, %v4574_v28, %v4577_v26  ;;  %v12844_v46 = vld [vmem:[#allocation99_spill] sm:$0xff] }
 0x400   : > { %vm2925_vm3 = vcmp.le.f32.partialorder %v12831_v31, 0.7853982  ;;  %v1349_v30 = vsel %vm11432_vm2, 0, %v1347_v16  ;;  %v2922_v6 = vsel %vm2915_vm4, %v2918_v8, %v2921_v17  ;;  %vm12834_vm5 = vcmp.lt.s32.totalorder %v12830_v10, 0  ;;  %7203 = vrot.lane.b32.xlu0 %v6021_v61, %s8051_s3 }
 0x401   : > { %v3012_v2 = vsel %vm2925_vm3, %v12830_v10, %v12833_v7  ;;  %v1353_v3 = vadd.s32 3, %v1349_v30  ;;  %v3011_v9 = vsel %vm12834_vm5, %v3010_v15, %v12832_v40  ;;  %v2923_v19 = vsel %vm2912_vm13, nan, %v2922_v6 }
 0x402   : > { %v6226_v63 = vsel %vm6219_vm12, %v6222_v34, %v6225_v60  ;;  %v3013_v18 = vsel %vm2925_vm3, 0, %v3011_v9  ;;  %7943 = vcosq.f32 %v3012_v2  ;;  %v2068_v52 = vand.u32 2147483647, %v10995_v50  ;;  %7106 = vrot.lane.b32.xlu1 %v2923_v19, %s8051_s3 }
 0x403   : > { %v1354_v1 = vand.u32 3, %v1353_v3  ;;  %7945 = vsinq.f32 %v3012_v2  ;;  %v3017_v43 = vadd.s32 3, %v3013_v18  ;;  %v3734_v62 = vcvt.s32.f32 %v11381_v54 }
 0x404   : > { %v12835_v44 = vand.u32 2147483647, %v9737_v13  ;;  %v1554_v55 = vsub.s32 4, %v12836_v23  ;;  %v4673_v48 = vand.u32 3, %v1349_v30  ;;  %v3732_v21 = vand.u32 2147483647, %v11385_v5 }
 0x405   : > { %v4579_v39 = vsel %vm1248_vm10, nan, %v4578_v58  ;;  %v6227_v20 = vsel %vm2912_vm13, nan, %v6226_v63  ;;  %vm1352_vm7 = vweird.f32 %v12823_v22  ;;  %vm1355_vm8 = vcmp.lt.s32.totalorder %v1354_v1, 2 }
 0x406   : > { %vm1469_vm2 = vcmp.le.f32.partialorder %v12835_v44, 0.7853982  ;;  %vm1356_vm4 = vcmp.eq.s32.totalorder %v1354_v1, 0  ;;  %vm12837_vm11 = vcmp.lt.s32.totalorder %v9737_v13, 0  ;;  %7189 = vrot.lane.b32.xlu1 %v4579_v39, %s8051_s3  ;;  %vm1359_vm15 = vcmp.eq.s32.totalorder %v1354_v1, 2 }
 0x407   : > { %v1555_v27 = vsel %vm12837_vm11, %v1554_v55, %v12836_v23  ;;  %v1556_v24 = vsel %vm1469_vm2, %v9737_v13, %v12838_v38  ;;  %v3018_v45 = vand.u32 3, %v3017_v43  ;;  %vm4674_vm10 = vcmp.lt.s32.totalorder %v4673_v48, 2  ;;  %v7940_v42 = vpop.eup %7939  ;;  %v12846_v55 = vld [vmem:[#allocation53_spill] sm:$0xff] }
 0x408   : > { %v1557_v33 = vsel %vm1469_vm2, 0, %v1555_v27  ;;  %7947 = vcosq.f32 %v1556_v24  ;;  %vm4675_vm13 = vcmp.eq.s32.totalorder %v4673_v48, 0  ;;  %v12840_v28 = vand.u32 2147483647, %v12839_v0  ;;  %v7942_v61 = vpop.eup %7941 }
 0x409   : > { %v1561_v56 = vadd.s32 3, %v1557_v33  ;;  %v1360_v26 = vxor.u32 2147483648, %v7940_v42  ;;  %vm3016_vm1 = vweird.f32 %v12830_v10  ;;  %7949 = vsinq.f32 %v1556_v24  ;;  %v12858_v10 = vld [vmem:[#allocation83_spill] sm:$0xff] }
 0x40a   : > { %vm11497_vm14 = vcmp.le.f32.partialorder %v12840_v28, 0.7853982  ;;  %v3218_v49 = vsub.s32 4, %v12843_v41  ;;  %v1357_v57 = vxor.u32 2147483648, %v7942_v61  ;;  %vm4678_vm12 = vcmp.eq.s32.totalorder %v4673_v48, 2  ;;  %7205 = vrot.lane.b32.xlu1 %v6227_v20, %s8051_s3  ;;  %v12850_v20 = vld [vmem:[#allocation79_spill] sm:$0xff] }
 0x40b   : > { %v3220_v37 = vsel %vm11497_vm14, %v12839_v0, %v12844_v46  ;;  %v11507_v25 = vand.u32 3, %v1561_v56  ;;  %v1361_v17 = vsel %vm1359_vm15, %v1360_v26, %v7942_v61  ;;  %v4680_v60 = vsel %vm4678_vm12, %v1360_v26, %v7942_v61 }
 0x40c   : > { %7951 = vcosq.f32 %v3220_v37  ;;  %vm12845_vm0 = vcmp.lt.s32.totalorder %v12839_v0, 0  ;;  %v7944_v31 = vpop.eup %7943  ;;  %v1358_v40 = vsel %vm1356_vm4, %v7940_v42, %v1357_v57  ;;  %vm3019_vm6 = vcmp.lt.s32.totalorder %v3018_v45, 2 }
 0x40d   : > { %v3219_v16 = vsel %vm12845_vm0, %v3218_v49, %v12843_v41  ;;  %7953 = vsinq.f32 %v3220_v37  ;;  %vm3020_vm9 = vcmp.eq.s32.totalorder %v3018_v45, 0  ;;  %vm3023_vm3 = vcmp.eq.s32.totalorder %v3018_v45, 2  ;;  %v7946_v15 = vpop.eup %7945 }
 0x40e   : > { %v1362_v8 = vsel %vm1355_vm8, %v1358_v40, %v1361_v17  ;;  %v3024_v34 = vxor.u32 2147483648, %v7944_v31  ;;  %v4677_v30 = vsel %vm4675_vm13, %v7940_v42, %v1357_v57  ;;  %v3221_v7 = vsel %vm11497_vm14, 0, %v3219_v16  ;;  %v12852_v16 = vld [vmem:[#allocation89_spill] sm:$0xff] }
 0x40f   : > { %v1363_v2 = vsel %vm1352_vm7, nan, %v1362_v8  ;;  %v3021_v6 = vxor.u32 2147483648, %v7946_v15  ;;  %v4681_v58 = vsel %vm4674_vm10, %v4677_v30, %v4680_v60  ;;  %v3225_v3 = vadd.s32 3, %v3221_v7 }
 0x410   : > { %7060 = vrot.lane.b32.xlu0 %v1363_v2, %s8051_s3  ;;  %v3025_v9 = vsel %vm3023_vm3, %v3024_v34, %v7946_v15  ;;  %vm1560_vm5 = vweird.f32 %v9737_v13  ;;  %vm1563_vm2 = vcmp.lt.s32.totalorder %v11507_v25, 2  ;;  %vm1564_vm8 = vcmp.eq.s32.totalorder %v11507_v25, 0 }
 0x411   : > { %v6321_v19 = vand.u32 3, %v3013_v18  ;;  %v3022_v63 = vsel %vm3020_vm9, %v7944_v31, %v3021_v6  ;;  %vm1567_vm4 = vcmp.eq.s32.totalorder %v11507_v25, 2  ;;  %v4682_v1 = vsel %vm1352_vm7, nan, %v4681_v58  ;;  %v12853_v58 = vld [vmem:[#allocation76_spill] sm:$0xff] }
 0x412   : > { %v3226_v43 = vand.u32 3, %v3225_v3  ;;  %v3026_v44 = vsel %vm3019_vm6, %v3022_v63, %v3025_v9  ;;  %v4879_v23 = vand.u32 3, %v1557_v33  ;;  %v12847_v48 = vand.u32 2147483647, %v12846_v55  ;;  %v7948_v18 = vpop.eup %7947 }
 0x413   : > { %v1450_v27 = vsub.s32 4, %v12850_v20  ;;  %v3027_v38 = vsel %vm3016_vm1, nan, %v3026_v44  ;;  %vm6322_vm15 = vcmp.lt.s32.totalorder %v6321_v19, 2  ;;  %vm6323_vm10 = vcmp.eq.s32.totalorder %v6321_v19, 0  ;;  %v7950_v22 = vpop.eup %7949 }
 0x414   : > { %vm11533_vm11 = vcmp.le.f32.partialorder %v12847_v48, 0.7853982  ;;  %vm6326_vm13 = vcmp.eq.s32.totalorder %v6321_v19, 2  ;;  %7076 = vrot.lane.b32.xlu0 %v3027_v38, %s8051_s3  ;;  %v1568_v24 = vxor.u32 2147483648, %v7948_v18  ;;  %vm3227_vm7 = vcmp.lt.s32.totalorder %v3226_v43, 2 }
 0x415   : > { %v6325_v45 = vsel %vm6323_vm10, %v7944_v31, %v3021_v6  ;;  %v6328_v33 = vsel %vm6326_vm13, %v3024_v34, %v7946_v15  ;;  %v1565_v56 = vxor.u32 2147483648, %v7950_v22  ;;  %vm3228_vm14 = vcmp.eq.s32.totalorder %v3226_v43, 0 }
 0x416   : > { %v7952_v42 = vpop.eup %7951  ;;  %vm3231_vm12 = vcmp.eq.s32.totalorder %v3226_v43, 2  ;;  %v6329_v28 = vsel %vm6322_vm15, %v6325_v45, %v6328_v33  ;;  %v1569_v61 = vsel %vm1567_vm4, %v1568_v24, %v7950_v22  ;;  %vm4881_vm0 = vcmp.eq.s32.totalorder %v4879_v23, 0  ;;  %v12859_v43 = vld [vmem:[#allocation95_spill] sm:$0xff]  ;;  %v12867_v45 = vld [vmem:[#allocation90_spill] sm:$0xff] }
 0x417   : > { %v7954_v36 = vpop.eup %7953  ;;  %v3232_v26 = vxor.u32 2147483648, %v7952_v42  ;;  %vm4884_vm6 = vcmp.eq.s32.totalorder %v4879_v23, 2  ;;  %v1566_v41 = vsel %vm1564_vm8, %v7948_v18, %v1565_v56  ;;  %vm12851_vm9 = vcmp.lt.s32.totalorder %v12846_v55, 0 }
 0x418   : > { %v3229_v49 = vxor.u32 2147483648, %v7954_v36  ;;  %v4886_v46 = vsel %vm4884_vm6, %v1568_v24, %v7950_v22  ;;  %v1451_v37 = vsel %vm12851_vm9, %v1450_v27, %v12850_v20  ;;  %v1570_v57 = vsel %vm1563_vm2, %v1566_v41, %v1569_v61  ;;  %7159 = vrot.lane.b32.xlu0 %v4682_v1, %s8051_s3  ;;  %v11620_v61 = vpop.permute.xlu0 %7052 }
 0x419   : > { %v3233_v17 = vsel %vm3231_vm12, %v3232_v26, %v7954_v36  ;;  %v4883_v60 = vsel %vm4881_vm0, %v7948_v18, %v1565_v56  ;;  %v1452_v31 = vsel %vm11533_vm11, %v12846_v55, %v12852_v16  ;;  %v1571_v40 = vsel %vm1560_vm5, nan, %v1570_v57 }
 0x41a   : > { %v3230_v15 = vsel %vm3228_vm14, %v7952_v42, %v3229_v49  ;;  %vm4880_vm3 = vcmp.lt.s32.totalorder %v4879_v23, 2  ;;  %v1453_v8 = vsel %vm11533_vm11, 0, %v1451_v37  ;;  %7062 = vrot.lane.b32.xlu1 %v1571_v40, %s8051_s3  ;;  %v6330_v34 = vsel %vm3016_vm1, nan, %v6329_v28 }
 0x41b   : > { %v3234_v25 = vsel %vm3227_vm7, %v3230_v15, %v3233_v17  ;;  %7955 = vcosq.f32 %v1452_v31  ;;  %v1457_v30 = vadd.s32 3, %v1453_v8  ;;  %v4887_v2 = vsel %vm4880_vm3, %v4883_v60, %v4886_v46 }
 0x41c   : > { %7957 = vsinq.f32 %v1452_v31  ;;  %v6527_v6 = vand.u32 3, %v3221_v7  ;;  %v12854_v3 = vand.u32 2147483647, %v12853_v58  ;;  %v12857_v19 = vcvt.s32.f32 %v10965_v4  ;;  %7175 = vrot.lane.b32.xlu0 %v6330_v34, %s8051_s3  ;;  %v11634_v40 = vpop.permute.xlu0 %7068 }
 0x41d   : > { %vm3224_vm8 = vweird.f32 %v12839_v0  ;;  %v3114_v1 = vsub.s32 4, %v12858_v10  ;;  %v11587_v50 = vmul.f32 %v3734_v62, %v3732_v21  ;;  %v1458_v44 = vand.u32 3, %v1457_v30  ;;  %v12862_v21 = vld [vmem:[#allocation86_spill] sm:$0xff] }
 0x41e   : > { %vm11566_vm2 = vcmp.le.f32.partialorder %v12854_v3, 0.7853982  ;;  %v11574_v63 = vmul.f32 %v12857_v19, %v2068_v52  ;;  %v3235_v4 = vsel %vm3224_vm8, nan, %v3234_v25  ;;  %vm6529_vm1 = vcmp.eq.s32.totalorder %v6527_v6, 0 }
 0x41f   : > { %v3116_v7 = vsel %vm11566_vm2, %v12853_v58, %v12859_v43  ;;  %7078 = vrot.lane.b32.xlu1 %v3235_v4, %s8051_s3  ;;  %v4888_v52 = vsel %vm1560_vm5, nan, %v4887_v2  ;;  %v6531_v23 = vsel %vm6529_vm1, %v7952_v42, %v3229_v49  ;;  %vm6532_vm4 = vcmp.eq.s32.totalorder %v6527_v6, 2 }
 0x420   : > { %7959 = vcosq.f32 %v3116_v7  ;;  %v6534_v48 = vsel %vm6532_vm4, %v3232_v26, %v7954_v36  ;;  %vm12860_vm11 = vcmp.lt.s32.totalorder %v12853_v58, 0  ;;  %v12861_v5 = vand.u32 2147483647, %v12698_v12  ;;  %v11644_v4 = vpop.permute.xlu0 %7151 }
 0x421   : > { %v3115_v54 = vsel %vm12860_vm11, %v3114_v1, %v12858_v10  ;;  %7961 = vsinq.f32 %v3116_v7  ;;  %vm6528_vm10 = vcmp.lt.s32.totalorder %v6527_v6, 2  ;;  %v1658_v39 = vsub.s32 4, %v12862_v21 }
 0x422   : > { %vm1573_vm15 = vcmp.le.f32.partialorder %v12861_v5, 0.7853982  ;;  %v3117_v62 = vsel %vm11566_vm2, 0, %v3115_v54  ;;  %vm1456_vm5 = vweird.f32 %v12846_v55  ;;  %v6535_v20 = vsel %vm6528_vm10, %v6531_v23, %v6534_v48 }
 0x423   : > { %v1660_v13 = vsel %vm1573_vm15, %v12698_v12, %v10613_v47  ;;  %v3121_v27 = vadd.s32 3, %v3117_v62  ;;  %7161 = vrot.lane.b32.xlu1 %v4888_v52, %s8051_s3  ;;  %vm12863_vm13 = vcmp.lt.s32.totalorder %v12698_v12, 0  ;;  %v4776_v38 = vand.u32 3, %v1453_v8 }
 0x424   : > { %7963 = vcosq.f32 %v1660_v13  ;;  %v1659_v18 = vsel %vm12863_vm13, %v1658_v39, %v12862_v21  ;;  %v12864_v22 = vand.u32 2147483647, %v9996_v11  ;;  %vm1459_vm14 = vcmp.lt.s32.totalorder %v1458_v44, 2 }
 0x425   : > { %7965 = vsinq.f32 %v1660_v13  ;;  %v1661_v47 = vsel %vm1573_vm15, 0, %v1659_v18  ;;  %v3322_v33 = vsub.s32 4, %v12867_v45  ;;  %v7956_v56 = vpop.eup %7955  ;;  %vm1460_vm12 = vcmp.eq.s32.totalorder %v1458_v44, 0 }
 0x426   : > { %vm11611_vm7 = vcmp.le.f32.partialorder %v12864_v22, 0.7853982  ;;  %vm1463_vm0 = vcmp.eq.s32.totalorder %v1458_v44, 2  ;;  %v3122_v28 = vand.u32 3, %v3121_v27  ;;  %v1665_v36 = vadd.s32 3, %v1661_v47  ;;  %v7958_v26 = vpop.eup %7957 }
 0x427   : > { %v3324_v42 = vsel %vm11611_vm7, %v9996_v11, %v10692_v14  ;;  %v1464_v41 = vxor.u32 2147483648, %v7956_v56  ;;  %v6536_v49 = vsel %vm3224_vm8, nan, %v6535_v20  ;;  %vm3120_vm6 = vweird.f32 %v12853_v58  ;;  %v12872_v20 = vld [vmem:[#allocation96_spill] sm:$0xff] }
 0x428   : > { %vm4777_vm9 = vcmp.lt.s32.totalorder %v4776_v38, 2  ;;  %vm4778_vm3 = vcmp.eq.s32.totalorder %v4776_v38, 0  ;;  %v1461_v46 = vxor.u32 2147483648, %v7958_v26  ;;  %7177 = vrot.lane.b32.xlu1 %v6536_v49, %s8051_s3  ;;  %vm4781_vm2 = vcmp.eq.s32.totalorder %v4776_v38, 2 }
 0x429   : > { %vm12868_vm1 = vcmp.lt.s32.totalorder %v9996_v11, 0  ;;  %7967 = vcosq.f32 %v3324_v42  ;;  %v1465_v57 = vsel %vm1463_vm0, %v1464_v41, %v7958_v26  ;;  %v1666_v17 = vand.u32 3, %v1665_v36 }
 0x42a   : > { %v3323_v14 = vsel %vm12868_vm1, %v3322_v33, %v12867_v45  ;;  %v7960_v37 = vpop.eup %7959  ;;  %v4783_v60 = vsel %vm4781_vm2, %v1464_v41, %v7958_v26  ;;  %7969 = vsinq.f32 %v3324_v42  ;;  %v1462_v0 = vsel %vm1460_vm12, %v7956_v56, %v1461_v46  ;;  %v11662_v33 = vpop.permute.xlu0 %7167 }
 0x42b   : > { %vm3123_vm8 = vcmp.lt.s32.totalorder %v3122_v28, 2  ;;  %v3128_v16 = vxor.u32 2147483648, %v7960_v37  ;;  %vm1664_vm4 = vweird.f32 %v12698_v12  ;;  %v3325_v31 = vsel %vm11611_vm7, 0, %v3323_v14  ;;  %v7962_v15 = vpop.eup %7961  ;;  %v12873_v14 = vld [vmem:[#allocation92_spill] sm:$0xff]  ;;  %v12878_v12 = vld [vmem:[#allocation94_spill] sm:$0xff] }
 0x42c   : > { %v1466_v8 = vsel %vm1459_vm14, %v1462_v0, %v1465_v57  ;;  %vm3124_vm11 = vcmp.eq.s32.totalorder %v3122_v28, 0  ;;  %vm3127_vm15 = vcmp.eq.s32.totalorder %v3122_v28, 2  ;;  %v4780_v25 = vsel %vm4778_vm3, %v7956_v56, %v1461_v46 }
 0x42d   : > { %v1467_v34 = vsel %vm1456_vm5, nan, %v1466_v8  ;;  %v3125_v30 = vxor.u32 2147483648, %v7962_v15  ;;  %v3129_v2 = vsel %vm3127_vm15, %v3128_v16, %v7962_v15  ;;  %v4784_v6 = vsel %vm4777_vm9, %v4780_v25, %v4783_v60  ;;  %v11689_v8 = vpop.permute.xlu1 %7070 }
 0x42e   : > { %v7964_v3 = vpop.eup %7963  ;;  %7092 = vrot.lane.b32.xlu0 %v1467_v34, %s8051_s3  ;;  %vm1667_vm10 = vcmp.lt.s32.totalorder %v1666_v17, 2  ;;  %vm1668_vm13 = vcmp.eq.s32.totalorder %v1666_v17, 0  ;;  %v3329_v9 = vadd.s32 3, %v3325_v31  ;;  %v6424_v19 = vand.u32 3, %v3117_v62 }
 0x42f   : > { %v7966_v10 = vpop.eup %7965  ;;  %v3126_v1 = vsel %vm3124_vm11, %v7960_v37, %v3125_v30  ;;  %vm1671_vm7 = vcmp.eq.s32.totalorder %v1666_v17, 2  ;;  %v1672_v43 = vxor.u32 2147483648, %v7964_v3  ;;  %v4785_v7 = vsel %vm1456_vm5, nan, %v4784_v6 }
 0x430   : > { %v3130_v52 = vsel %vm3123_vm8, %v3126_v1, %v3129_v2  ;;  %v1669_v44 = vxor.u32 2147483648, %v7966_v10  ;;  %vm3328_vm14 = vweird.f32 %v9996_v11  ;;  %v3330_v23 = vand.u32 3, %v3329_v9  ;;  %v12883_v1 = vld [vmem:[#allocation38_spill] sm:$0xff] }
 0x431   : > { %v4982_v48 = vand.u32 3, %v1661_v47  ;;  %v3131_v54 = vsel %vm3120_vm6, nan, %v3130_v52  ;;  %v1673_v5 = vsel %vm1671_vm7, %v1672_v43, %v7966_v10  ;;  %v6630_v62 = vand.u32 3, %v3325_v31 }
 0x432   : > { %v12869_v21 = vand.u32 2147483647, %v10010_v59  ;;  %7108 = vrot.lane.b32.xlu0 %v3131_v54, %s8051_s3  ;;  %v1670_v55 = vsel %vm1668_vm13, %v7964_v3, %v1669_v44  ;;  %vm6425_vm5 = vcmp.lt.s32.totalorder %v6424_v19, 2  ;;  %vm6426_vm0 = vcmp.eq.s32.totalorder %v6424_v19, 0 }
 0x433   : > { %vm6429_vm9 = vcmp.eq.s32.totalorder %v6424_v19, 2  ;;  %v7968_v13 = vpop.eup %7967  ;;  %vm3550_vm3 = vcmp.lt.s32.totalorder %v12872_v20, 0  ;;  %v1674_v27 = vsel %vm1667_vm10, %v1670_v55, %v1673_v5  ;;  %vm3331_vm2 = vcmp.lt.s32.totalorder %v3330_v23, 2 }
 0x434   : > { %vm11652_vm12 = vcmp.le.f32.partialorder %v12869_v21, 0.7853982  ;;  %v6428_v18 = vsel %vm6426_vm0, %v7960_v37, %v3125_v30  ;;  %v6431_v38 = vsel %vm6429_vm9, %v3128_v16, %v7962_v15  ;;  %v7970_v22 = vpop.eup %7969  ;;  %v1675_v24 = vsel %vm1664_vm4, nan, %v1674_v27 }
 0x435   : > { %v3336_v47 = vxor.u32 2147483648, %v7968_v13  ;;  %v6432_v45 = vsel %vm6425_vm5, %v6428_v18, %v6431_v38  ;;  %vm4984_vm1 = vcmp.eq.s32.totalorder %v4982_v48, 0  ;;  %7094 = vrot.lane.b32.xlu1 %v1675_v24, %s8051_s3  ;;  %v3333_v42 = vxor.u32 2147483648, %v7970_v22 }
 0x436   : > { %vm3335_vm8 = vcmp.eq.s32.totalorder %v3330_v23, 2  ;;  %v4986_v56 = vsel %vm4984_vm1, %v7964_v3, %v1669_v44  ;;  %vm4987_vm11 = vcmp.eq.s32.totalorder %v4982_v48, 2  ;;  %7191 = vrot.lane.b32.xlu0 %v4785_v7, %s8051_s3  ;;  %vm3332_vm15 = vcmp.eq.s32.totalorder %v3330_v23, 0 }
 0x437   : > { %v3337_v28 = vsel %vm3335_vm8, %v3336_v47, %v7970_v22  ;;  %vm4983_vm10 = vcmp.lt.s32.totalorder %v4982_v48, 2  ;;  %v4989_v36 = vsel %vm4987_vm11, %v1672_v43, %v7966_v10  ;;  %v3334_v26 = vsel %vm3332_vm15, %v7968_v13, %v3333_v42  ;;  %v12884_v43 = vld [vmem:[#allocation37_spill] sm:$0xff]  ;;  %v11723_v48 = vpop.permute.xlu1 %7153 }
 0x438   : > { %v6433_v41 = vsel %vm3120_vm6, nan, %v6432_v45  ;;  %v4990_v49 = vsel %vm4983_vm10, %v4986_v56, %v4989_v36  ;;  %vm6631_vm13 = vcmp.lt.s32.totalorder %v6630_v62, 2  ;;  %v3338_v46 = vsel %vm3331_vm2, %v3334_v26, %v3337_v28 }
 0x439   : > { %vm6632_vm7 = vcmp.eq.s32.totalorder %v6630_v62, 0  ;;  %vm6635_vm5 = vcmp.eq.s32.totalorder %v6630_v62, 2  ;;  %v1762_v37 = vsub.s32 4, %v12873_v14  ;;  %v3339_v57 = vsel %vm3328_vm14, nan, %v3338_v46 }
 0x43a   : > { %v6634_v17 = vsel %vm6632_vm7, %v7968_v13, %v3333_v42  ;;  %v6637_v60 = vsel %vm6635_vm5, %v3336_v47, %v7970_v22  ;;  %v1764_v0 = vsel %vm11652_vm12, %v10010_v59, %v10880_v51  ;;  %7110 = vrot.lane.b32.xlu1 %v3339_v57, %s8051_s3  ;;  %7207 = vrot.lane.b32.xlu0 %v6433_v41, %s8051_s3  ;;  %v4991_v58 = vsel %vm1664_vm4, nan, %v4990_v49  ;;  %v11691_v51 = vpop.permute.xlu0 %7084  ;;  %v12890_v22 = vld [vmem:[#allocation102_spill] sm:$0xff] }
 0x43b   : > { %vm12874_vm6 = vcmp.lt.s32.totalorder %v10010_v59, 0  ;;  %7971 = vcosq.f32 %v1764_v0  ;;  %v12875_v31 = vand.u32 2147483647, %v10189_v35  ;;  %v3426_v34 = vsub.s32 4, %v12878_v12  ;;  %v11745_v47 = vpop.permute.xlu1 %7169 }
 0x43c   : > { %v1763_v16 = vsel %vm12874_vm6, %v1762_v37, %v12873_v14  ;;  %7973 = vsinq.f32 %v1764_v0  ;;  %v6638_v2 = vsel %vm6631_vm13, %v6634_v17, %v6637_v60  ;;  %v12879_v3 = vand.u32 2147483647, %v10383_v53 }
 0x43d   : > { %vm11685_vm0 = vcmp.le.f32.partialorder %v12875_v31, 0.7853982  ;;  %v1765_v25 = vsel %vm11652_vm12, 0, %v1763_v16  ;;  %vm12882_vm12 = vcmp.lt.s32.totalorder %v10189_v35, 0  ;;  %v1970_v10 = vsub.s32 4, %v10580_v32 }
 0x43e   : > { %v3428_v30 = vsel %vm11685_vm0, %v10189_v35, %v10885_v29  ;;  %v1769_v6 = vadd.s32 3, %v1765_v25  ;;  %vm11703_vm4 = vcmp.le.f32.partialorder %v12879_v3, 0.7853982  ;;  %v3427_v19 = vsel %vm12882_vm12, %v3426_v34, %v12878_v12  ;;  %7193 = vrot.lane.b32.xlu1 %v4991_v58, %s8051_s3  ;;  %v11734_v27 = vpop.permute.xlu0 %7100 }
 0x43f   : > { %7975 = vcosq.f32 %v3428_v30  ;;  %v1972_v29 = vsel %vm11703_vm4, %v10383_v53, %v12883_v1  ;;  %v12885_v7 = vxor.u32 2147483648, %v12884_v43  ;;  %v3429_v23 = vsel %vm11685_vm0, 0, %v3427_v19  ;;  %v11761_v57 = vpop.permute.xlu1 %7086 }
 0x440   : > { %7977 = vsinq.f32 %v3428_v30  ;;  %v1770_v44 = vand.u32 3, %v1769_v6  ;;  %v3433_v54 = vadd.s32 3, %v3429_v23  ;;  %vm12886_vm9 = vcmp.lt.s32.totalorder %v10383_v53, 0 }
 0x441   : > { %v3633_v52 = vsel %vm3550_vm3, %v12885_v7, %v12884_v43  ;;  %7979 = vcosq.f32 %v1972_v29  ;;  %v1971_v5 = vsel %vm12886_vm9, %v1970_v10, %v10580_v32  ;;  %v5085_v62 = vand.u32 3, %v1765_v25 }
 0x442   : > { %7981 = vsinq.f32 %v1972_v29  ;;  %v2072_v21 = vxor.u32 2147483648, %v11574_v63  ;;  %v3736_v39 = vxor.u32 2147483648, %v11587_v50  ;;  %v6639_v55 = vsel %vm3328_vm14, nan, %v6638_v2  ;;  %v11763_v17 = vpop.permute.xlu0 %7183 }
 0x443   : > { %v1973_v13 = vsel %vm11703_vm4, 0, %v1971_v5  ;;  %vm1768_vm2 = vweird.f32 %v10010_v59  ;;  %vm1771_vm1 = vcmp.lt.s32.totalorder %v1770_v44, 2  ;;  %vm1772_vm8 = vcmp.eq.s32.totalorder %v1770_v44, 0  ;;  %7209 = vrot.lane.b32.xlu1 %v6639_v55, %s8051_s3  ;;  %v11776_v29 = vpop.permute.xlu1 %7102 }
 0x444   : > { %v3434_v18 = vand.u32 3, %v3433_v54  ;;  %v1977_v32 = vadd.s32 3, %v1973_v13  ;;  %vm1775_vm11 = vcmp.eq.s32.totalorder %v1770_v44, 2  ;;  %vm5086_vm15 = vcmp.lt.s32.totalorder %v5085_v62, 2  ;;  %v12891_v44 = vld [vmem:[#allocation101_spill] sm:$0xff] }
 0x445   : > { %v12887_v38 = vand.u32 2147483647, %v12872_v20  ;;  %v3634_v24 = vsub.s32 4, %v12890_v22  ;;  %vm5087_vm13 = vcmp.eq.s32.totalorder %v5085_v62, 0  ;;  %vm5090_vm7 = vcmp.eq.s32.totalorder %v5085_v62, 2  ;;  %v7972_v42 = vpop.eup %7971  ;;  %v12892_v62 = vld [vmem:[#allocation82_spill] sm:$0xff] }
 0x446   : > { %vm3435_vm14 = vcmp.lt.s32.totalorder %v3434_v18, 2  ;;  %v1978_v45 = vand.u32 3, %v1977_v32  ;;  %vm3432_vm5 = vweird.f32 %v10189_v35  ;;  %vm3436_vm6 = vcmp.eq.s32.totalorder %v3434_v18, 0  ;;  %v7974_v36 = vpop.eup %7973  ;;  %v11782_v5 = vpop.permute.xlu0 %7199 }
 0x447   : > { %vm11740_vm10 = vcmp.le.f32.partialorder %v12887_v38, 0.7853982  ;;  %vm3439_vm0 = vcmp.eq.s32.totalorder %v3434_v18, 2  ;;  %v3635_v56 = vsel %vm3550_vm3, %v3634_v24, %v12890_v22  ;;  %v1776_v26 = vxor.u32 2147483648, %v7972_v42  ;;  %v11795_v11 = vpop.permute.xlu1 %7185  ;;  %v12893_v24 = vld [vmem:[#allocation91_spill] sm:$0xff] }
 0x448   : > { %v3636_v28 = vsel %vm11740_vm10, %v12872_v20, %v3633_v52  ;;  %vm1976_vm4 = vweird.f32 %v10383_v53  ;;  %vm1979_vm12 = vcmp.lt.s32.totalorder %v1978_v45, 2  ;;  %v6733_v41 = vand.u32 3, %v3429_v23 }
 0x449   : > { %v11755_v49 = vand.u32 3, %v1973_v13  ;;  %v7976_v46 = vpop.eup %7975  ;;  %v1773_v14 = vxor.u32 2147483648, %v7974_v36  ;;  %vm1983_vm9 = vcmp.eq.s32.totalorder %v1978_v45, 2  ;;  %v11759_v37 = vsel %vm11740_vm10, 0, %v3635_v56 }
 0x44a   : > { %7983 = vcosq.f32 %v3636_v28  ;;  %v7978_v60 = vpop.eup %7977  ;;  %v1777_v0 = vsel %vm1775_vm11, %v1776_v26, %v7974_v36  ;;  %v3440_v58 = vxor.u32 2147483648, %v7976_v46  ;;  %v5092_v16 = vsel %vm5090_vm7, %v1776_v26, %v7974_v36  ;;  %v12897_v36 = vld [vmem:[#allocation97_spill] sm:$0xff] }
 0x44b   : > { %7985 = vsinq.f32 %v3636_v28  ;;  %v7980_v31 = vpop.eup %7979  ;;  %v1774_v15 = vsel %vm1772_vm8, %v7972_v42, %v1773_v14  ;;  %v3437_v25 = vxor.u32 2147483648, %v7978_v60  ;;  %v5089_v12 = vsel %vm5087_vm13, %v7972_v42, %v1773_v14 }
 0x44c   : > { %v3641_v34 = vadd.s32 3, %v11759_v37  ;;  %v7982_v30 = vpop.eup %7981  ;;  %v1778_v2 = vsel %vm1771_vm1, %v1774_v15, %v1777_v0  ;;  %v3441_v6 = vsel %vm3439_vm0, %v3440_v58, %v7978_v60  ;;  %vm1980_vm3 = vcmp.eq.s32.totalorder %v1978_v45, 0  ;;  %v11819_v15 = vpop.permute.xlu1 %7201 }
 0x44d   : > { %v1984_v3 = vxor.u32 2147483648, %v7980_v31  ;;  %v1779_v9 = vsel %vm1768_vm2, nan, %v1778_v2  ;;  %v3438_v19 = vsel %vm3436_vm6, %v7976_v46, %v3437_v25  ;;  %v1981_v10 = vxor.u32 2147483648, %v7982_v30 }
 0x44e   : > { %v5093_v1 = vsel %vm5086_vm15, %v5089_v12, %v5092_v16  ;;  %7064 = vrot.lane.b32.xlu0 %v1779_v9, %s8051_s3  ;;  %v3442_v43 = vsel %vm3435_vm14, %v3438_v19, %v3441_v6  ;;  %v3642_v52 = vand.u32 3, %v3641_v34  ;;  %vm6735_vm1 = vcmp.eq.s32.totalorder %v6733_v41, 0  ;;  %v12904_v9 = vld [vmem:[#allocation100_spill] sm:$0xff] }
 0x44f   : > { %v1985_v7 = vsel %vm1983_vm9, %v1984_v3, %v7982_v30  ;;  %vm1990_vm8 = vcmp.lt.s32.totalorder %v12891_v44, 0  ;;  %v1982_v23 = vsel %vm1980_vm3, %v7980_v31, %v1981_v10  ;;  %vm6734_vm11 = vcmp.lt.s32.totalorder %v6733_v41, 2 }
 0x450   : > { %v6737_v54 = vsel %vm6735_vm1, %v7976_v46, %v3437_v25  ;;  %vm6738_vm10 = vcmp.eq.s32.totalorder %v6733_v41, 2  ;;  %vm3654_vm15 = vcmp.lt.s32.totalorder %v12892_v62, 0  ;;  %v3443_v55 = vsel %vm3432_vm5, nan, %v3442_v43  ;;  %v12898_v46 = vld [vmem:[#allocation31_spill] sm:$0xff]  ;;  %v11821_v25 = vpop.permute.xlu0 %7054 }
 0x451   : > { %v1986_v13 = vsel %vm1979_vm12, %v1982_v23, %v1985_v7  ;;  %v5094_v18 = vsel %vm1768_vm2, nan, %v5093_v1  ;;  %vm3640_vm14 = vweird.f32 %v12872_v20  ;;  %vm3643_vm13 = vcmp.lt.s32.totalorder %v3642_v52, 2 }
 0x452   : > { %v1987_v32 = vsel %vm1976_vm4, nan, %v1986_v13  ;;  %v6740_v38 = vsel %vm6738_vm10, %v3440_v58, %v7978_v60  ;;  %vm5292_vm7 = vcmp.lt.s32.totalorder %v11755_v49, 2  ;;  %vm5293_vm6 = vcmp.eq.s32.totalorder %v11755_v49, 0  ;;  %7080 = vrot.lane.b32.xlu0 %v3443_v55, %s8051_s3  ;;  %v11842_v55 = vpop.permute.xlu1 %7056 }
 0x453   : > { %7066 = vrot.lane.b32.xlu1 %v1987_v32, %s8051_s3  ;;  %v6741_v59 = vsel %vm6734_vm11, %v6737_v54, %v6740_v38  ;;  %v5295_v22 = vsel %vm5293_vm6, %v7980_v31, %v1981_v10  ;;  %vm5296_vm2 = vcmp.eq.s32.totalorder %v11755_v49, 2  ;;  %v12894_v45 = vand.u32 2147483647, %v12893_v24  ;;  %v12900_v49 = vld [vmem:[#allocation93_spill] sm:$0xff] }
 0x454   : > { %v7984_v56 = vpop.eup %7983  ;;  %vm3647_vm12 = vcmp.eq.s32.totalorder %v3642_v52, 2  ;;  %v5298_v28 = vsel %vm5296_vm2, %v1984_v3, %v7982_v30  ;;  %v1866_v26 = vsub.s32 4, %v12897_v36  ;;  %vm3644_vm9 = vcmp.eq.s32.totalorder %v3642_v52, 0  ;;  %v12905_v10 = vld [vmem:[#allocation33_spill] sm:$0xff] }
 0x455   : > { %vm11803_vm0 = vcmp.le.f32.partialorder %v12894_v45, 0.7853982  ;;  %v7986_v14 = vpop.eup %7985  ;;  %v3648_v60 = vxor.u32 2147483648, %v7984_v56  ;;  %v6742_v0 = vsel %vm3432_vm5, nan, %v6741_v59  ;;  %v5299_v16 = vsel %vm5292_vm7, %v5295_v22, %v5298_v28  ;;  %v12908_v22 = vld [vmem:[#allocation26_spill] sm:$0xff] }
 0x456   : > { %v1868_v41 = vsel %vm11803_vm0, %v12893_v24, %v12898_v46  ;;  %v3645_v58 = vxor.u32 2147483648, %v7986_v14  ;;  %vm12899_vm3 = vcmp.lt.s32.totalorder %v12893_v24, 0  ;;  %7163 = vrot.lane.b32.xlu0 %v5094_v18, %s8051_s3  ;;  %v6939_v34 = vand.u32 3, %v11759_v37  ;;  %v11873_v28 = vpop.permute.xlu1 %7058 }
 0x457   : > { %7987 = vcosq.f32 %v1868_v41  ;;  %v1867_v31 = vsel %vm12899_vm3, %v1866_v26, %v12897_v36  ;;  %v3649_v12 = vsel %vm3647_vm12, %v3648_v60, %v7986_v14  ;;  %v12901_v30 = vand.u32 2147483647, %v12900_v49 }
 0x458   : > { %7989 = vsinq.f32 %v1868_v41  ;;  %v1869_v35 = vsel %vm11803_vm0, 0, %v1867_v31  ;;  %v3646_v6 = vsel %vm3644_vm9, %v7984_v56, %v3645_v58  ;;  %v3530_v19 = vsub.s32 4, %v12904_v9  ;;  %v12909_v41 = vld [vmem:[#allocation30_spill] sm:$0xff] }
 0x459   : > { %vm11830_vm5 = vcmp.le.f32.partialorder %v12901_v30, 0.7853982  ;;  %v1873_v3 = vadd.s32 3, %v1869_v35  ;;  %v3650_v43 = vsel %vm3643_vm13, %v3646_v6, %v3649_v12  ;;  %vm6940_vm1 = vcmp.lt.s32.totalorder %v6939_v34, 2 }
 0x45a   : > { %v3532_v1 = vsel %vm11830_vm5, %v12900_v49, %v12905_v10  ;;  %vm6941_vm11 = vcmp.eq.s32.totalorder %v6939_v34, 0  ;;  %vm6944_vm10 = vcmp.eq.s32.totalorder %v6939_v34, 2  ;;  %v3651_v37 = vsel %vm3640_vm14, nan, %v3650_v43  ;;  %7179 = vrot.lane.b32.xlu0 %v6742_v0, %s8051_s3 }
 0x45b   : > { %v1874_v7 = vand.u32 3, %v1873_v3  ;;  %v6943_v23 = vsel %vm6941_vm11, %v7984_v56, %v3645_v58  ;;  %v6946_v54 = vsel %vm6944_vm10, %v3648_v60, %v7986_v14  ;;  %v2073_v13 = vsel %vm1990_vm8, %v2072_v21, %v11574_v63  ;;  %7082 = vrot.lane.b32.xlu1 %v3651_v37, %s8051_s3  ;;  %v11861_v63 = vpop.permute.xlu0 %7072 }
 0x45c   : > { %vm12906_vm13 = vcmp.lt.s32.totalorder %v12900_v49, 0  ;;  %7991 = vcosq.f32 %v3532_v1  ;;  %v3737_v18 = vsel %vm3654_vm15, %v3736_v39, %v11587_v50  ;;  %v5300_v32 = vsel %vm1976_vm4, nan, %v5299_v16 }
 0x45d   : > { %v3531_v52 = vsel %vm12906_vm13, %v3530_v19, %v12904_v9  ;;  %v6947_v38 = vsel %vm6940_vm1, %v6943_v23, %v6946_v54  ;;  %7993 = vsinq.f32 %v3532_v1  ;;  %v12907_v59 = vand.u32 2147483647, %v12891_v44  ;;  %v11899_v1 = vpop.permute.xlu1 %7074 }
 0x45e   : > { %v3533_v21 = vsel %vm11830_vm5, 0, %v3531_v52  ;;  %v2074_v45 = vsub.s32 4, %v12908_v22  ;;  %vm1875_vm6 = vcmp.lt.s32.totalorder %v1874_v7, 2  ;;  %v5188_v50 = vand.u32 3, %v1869_v35 }
 0x45f   : > { %vm1989_vm7 = vcmp.le.f32.partialorder %v12907_v59, 0.7853982  ;;  %v3537_v42 = vadd.s32 3, %v3533_v21  ;;  %7165 = vrot.lane.b32.xlu1 %v5300_v32, %s8051_s3  ;;  %vm1876_vm4 = vcmp.eq.s32.totalorder %v1874_v7, 0  ;;  %vm1879_vm2 = vcmp.eq.s32.totalorder %v1874_v7, 2  ;;  %v11884_v34 = vpop.permute.xlu0 %7155 }
 0x460   : > { %v2076_v56 = vsel %vm1989_vm7, %v12891_v44, %v2073_v13  ;;  %v2075_v53 = vsel %vm1990_vm8, %v2074_v45, %v12908_v22  ;;  %v3738_v14 = vsub.s32 4, %v12909_v41  ;;  %v12910_v16 = vand.u32 2147483647, %v12892_v62 }
 0x461   : > { %v7988_v39 = vpop.eup %7987  ;;  %7995 = vcosq.f32 %v2076_v56  ;;  %v2077_v46 = vsel %vm1989_vm7, 0, %v2075_v53  ;;  %v3538_v0 = vand.u32 3, %v3537_v42  ;;  %v6948_v35 = vsel %vm3640_vm14, nan, %v6947_v38 }
 0x462   : > { %v7990_v36 = vpop.eup %7989  ;;  %v1880_v26 = vxor.u32 2147483648, %v7988_v39  ;;  %7997 = vsinq.f32 %v2076_v56  ;;  %v2081_v58 = vadd.s32 3, %v2077_v46  ;;  %vm11878_vm0 = vcmp.le.f32.partialorder %v12910_v16, 0.7853982 }
 0x463   : > { %v1877_v60 = vxor.u32 2147483648, %v7990_v36  ;;  %vm5190_vm8 = vcmp.eq.s32.totalorder %v5188_v50, 0  ;;  %vm1872_vm12 = vweird.f32 %v12893_v24  ;;  %7181 = vrot.lane.b32.xlu1 %v6948_v35, %s8051_s3  ;;  %vm3536_vm9 = vweird.f32 %v12900_v49  ;;  %v11906_v32 = vpop.permute.xlu0 %7171 }
 0x464   : > { %v1881_v12 = vsel %vm1879_vm2, %v1880_v26, %v7990_v36  ;;  %vm5193_vm3 = vcmp.eq.s32.totalorder %v5188_v50, 2  ;;  %v2082_v6 = vand.u32 3, %v2081_v58  ;;  %v3739_v20 = vsel %vm3654_vm15, %v3738_v14, %v12909_v41  ;;  %v11912_v41 = vpop.permute.xlu1 %7157 }
 0x465   : > { %v1878_v30 = vsel %vm1876_vm4, %v7988_v39, %v1877_v60  ;;  %v3740_v3 = vsel %vm11878_vm0, %v12892_v62, %v3737_v18  ;;  %vm3543_vm14 = vcmp.eq.s32.totalorder %v3538_v0, 2  ;;  %vm5189_vm5 = vcmp.lt.s32.totalorder %v5188_v50, 2 }
 0x466   : > { %v1882_v2 = vsel %vm1875_vm6, %v1878_v30, %v1881_v12  ;;  %v7992_v9 = vpop.eup %7991  ;;  %v5192_v10 = vsel %vm5190_vm8, %v7988_v39, %v1877_v60  ;;  %vm2080_vm1 = vweird.f32 %v12891_v44  ;;  %v5195_v37 = vsel %vm5193_vm3, %v1880_v26, %v7990_v36 }
 0x467   : > { %v1883_v19 = vsel %vm1872_vm12, nan, %v1882_v2  ;;  %v3544_v43 = vxor.u32 2147483648, %v7992_v9  ;;  %v3741_v7 = vsel %vm11878_vm0, 0, %v3739_v20  ;;  %7999 = vcosq.f32 %v3740_v3  ;;  %v7994_v23 = vpop.eup %7993  ;;  %v11920_v31 = vpop.permute.xlu0 %7088 }
 0x468   : > { %7096 = vrot.lane.b32.xlu0 %v1883_v19, %s8051_s3  ;;  %vm3539_vm15 = vcmp.lt.s32.totalorder %v3538_v0, 2  ;;  %vm3540_vm11 = vcmp.eq.s32.totalorder %v3538_v0, 0  ;;  %8001 = vsinq.f32 %v3740_v3  ;;  %v3745_v54 = vadd.s32 3, %v3741_v7 }
 0x469   : > { %v3541_v13 = vxor.u32 2147483648, %v7994_v23  ;;  %v3545_v52 = vsel %vm3543_vm14, %v3544_v43, %v7994_v23  ;;  %vm2083_vm10 = vcmp.lt.s32.totalorder %v2082_v6, 2  ;;  %v6836_v18 = vand.u32 3, %v3533_v21 }
 0x46a   : > { %vm2084_vm13 = vcmp.eq.s32.totalorder %v2082_v6, 0  ;;  %vm2087_vm7 = vcmp.eq.s32.totalorder %v2082_v6, 2  ;;  %v5196_v59 = vsel %vm5189_vm5, %v5192_v10, %v5195_v37  ;;  %v5394_v22 = vand.u32 3, %v2077_v46  ;;  %v11933_v10 = vpop.permute.xlu1 %7173 }
 0x46b   : > { %v7996_v38 = vpop.eup %7995  ;;  %v3542_v42 = vsel %vm3540_vm11, %v7992_v9, %v3541_v13  ;;  %v3746_v39 = vand.u32 3, %v3745_v54  ;;  %vm6838_vm6 = vcmp.eq.s32.totalorder %v6836_v18, 0  ;;  %v11910_v26 = vand.u32 3, %v3741_v7 }
 0x46c   : > { %v7998_v45 = vpop.eup %7997  ;;  %v2088_v56 = vxor.u32 2147483648, %v7996_v38  ;;  %v3546_v53 = vsel %vm3539_vm15, %v3542_v42, %v3545_v52  ;;  %v7116_v21 = vlaneseq  ;;  %vm6837_vm4 = vcmp.lt.s32.totalorder %v6836_v18, 2 }
 0x46d   : > { %v2085_v36 = vxor.u32 2147483648, %v7998_v45  ;;  %v3547_v14 = vsel %vm3536_vm9, nan, %v3546_v53  ;;  %v6840_v46 = vsel %vm6838_vm6, %v7992_v9, %v3541_v13  ;;  %vm6841_vm2 = vcmp.eq.s32.totalorder %v6836_v18, 2  ;;  %v7105_v13 = vpop.permute.xlu0 %7104 }
 0x46e   : > { %v2089_v50 = vsel %vm2087_vm7, %v2088_v56, %v7998_v45  ;;  %7112 = vrot.lane.b32.xlu0 %v3547_v14, %s8051_s3  ;;  %vm5395_vm0 = vcmp.lt.s32.totalorder %v5394_v22, 2  ;;  %vm5396_vm8 = vcmp.eq.s32.totalorder %v5394_v22, 0  ;;  %v6843_v58 = vsel %vm6841_vm2, %v3544_v43, %v7994_v23  ;;  %v12927_v14 = vld [vmem:[#allocation7_spill] sm:$0xff] }
 0x46f   : > { %v2086_v60 = vsel %vm2084_vm13, %v7996_v38, %v2085_v36  ;;  %v5398_v16 = vsel %vm5396_vm8, %v7996_v38, %v2085_v36  ;;  %vm5399_vm3 = vcmp.eq.s32.totalorder %v5394_v22, 2  ;;  %v5197_v2 = vsel %vm1872_vm12, nan, %v5196_v59  ;;  %v12913_v59 = vld [vmem:[#allocation5_spill] sm:$0xff] }
 0x470   : > { %v2090_v0 = vsel %vm2083_vm10, %v2086_v60, %v2089_v50  ;;  %v5401_v35 = vsel %vm5399_vm3, %v2088_v56, %v7998_v45  ;;  %vm3744_vm14 = vweird.f32 %v12892_v62  ;;  %vm3751_vm5 = vcmp.eq.s32.totalorder %v3746_v39, 2  ;;  %v7091_v56 = vpop.permute.xlu1 %7090  ;;  %v12931_v50 = vld [vmem:[#allocation10_spill] sm:$0xff]  ;;  %v12939_v62 = vld [vmem:[#allocation12_spill] sm:$0xff] }
 0x471   : > { %v2091_v12 = vsel %vm2080_vm1, nan, %v2090_v0  ;;  %v8000_v30 = vpop.eup %7999  ;;  %v6844_v6 = vsel %vm6837_vm4, %v6840_v46, %v6843_v58  ;;  %vm3748_vm15 = vcmp.eq.s32.totalorder %v3746_v39, 0  ;;  %v5402_v9 = vsel %vm5395_vm0, %v5398_v16, %v5401_v35  ;;  %v7188_v53 = vpop.permute.xlu0 %7187  ;;  %v12933_v46 = vld [vmem:[#allocation11_spill] sm:$0xff] }
 0x472   : > { %7098 = vrot.lane.b32.xlu1 %v2091_v12, %s8051_s3  ;;  %v8002_v20 = vpop.eup %8001  ;;  %7195 = vrot.lane.b32.xlu0 %v5197_v2, %s8051_s3  ;;  %v3752_v3 = vxor.u32 2147483648, %v8000_v30  ;;  %v11931_v19 = vand.u32 127, %v7116_v21  ;;  %vm3747_vm12 = vcmp.lt.s32.totalorder %v3746_v39, 2  ;;  %vm7043_vm11 = vcmp.lt.s32.totalorder %v11910_v26, 2  ;;  %v12917_v39 = vld [vmem:[#allocation8_spill] sm:$0xff] }
 0x473   : > { %v3749_v24 = vxor.u32 2147483648, %v8002_v20  ;;  %vm7047_vm10 = vcmp.eq.s32.totalorder %v11910_v26, 2  ;;  %v6845_v37 = vsel %vm3536_vm9, nan, %v6844_v6  ;;  %vm7044_vm13 = vcmp.eq.s32.totalorder %v11910_v26, 0 }
 0x474   : > { %v3753_v43 = vsel %vm3751_vm5, %v3752_v3, %v8002_v20  ;;  %vm7118_vm7 = vcmp.lt.s32.totalorder %v11931_v19, 4  ;;  %v5403_v23 = vsel %vm2080_vm1, nan, %v5402_v9  ;;  %v7049_v44 = vsel %vm7047_vm10, %v3752_v3, %v8002_v20  ;;  %v7107_v0 = vpop.permute.xlu1 %7106 }
 0x475   : > { %v3750_v7 = vsel %vm3748_vm15, %v8000_v30, %v3749_v24  ;;  %v7119_v54 = vsel %vm7118_vm7, %v11620_v61, %v11691_v51  ;;  %v7135_v49 = vsel %vm7118_vm7, %v11691_v51, %v11620_v61  ;;  %v7127_v18 = vsel %vm7118_vm7, %v11634_v40, %v11734_v27  ;;  %v7204_v60 = vpop.permute.xlu0 %7203 }
 0x476   : > { %v3754_v52 = vsel %vm3747_vm12, %v3750_v7, %v3753_v43  ;;  %7211 = vrot.lane.b32.xlu0 %v6845_v37, %s8051_s3  ;;  %7247 = vst [vmem:[%s11938_s7] sm:$0xff] %v7135_v49  ;;  %7248 = vst [vmem:[%s11938_s7 + $0x8] sm:$0xff] %v7119_v54  ;;  %v7143_v61 = vsel %vm7118_vm7, %v11734_v27, %v11634_v40  ;;  %v7046_v38 = vsel %vm7044_vm13, %v8000_v30, %v3749_v24  ;;  %vm12914_vm9 = vcmask 31744   ;;  %v12915_v27 = vld [vmem:[#allocation6_spill] sm:$0xff] }
 0x477   : > { %v3755_v51 = vsel %vm3744_vm14, nan, %v3754_v52  ;;  %7311 = vst.msk [vmem:[%s11938_s7] sm:$0xff] %vm12914_vm9, %v12913_v59  ;;  %7263 = vst [vmem:[%s11938_s7 + $0x140] sm:$0xff] %v7143_v61  ;;  %v7128_v22 = vsel %vm7118_vm7, %v11689_v8, %v11776_v29  ;;  %v7144_v40 = vsel %vm7118_vm7, %v11776_v29, %v11689_v8  ;;  %v7215_v45 = vsel %vm7118_vm7, %v11644_v4, %v11763_v17 }
 0x478   : > { %7264 = vst [vmem:[%s11938_s7 + $0x148] sm:$0xff] %v7127_v18  ;;  %7114 = vrot.lane.b32.xlu1 %v3755_v51, %s8051_s3  ;;  %vm12916_vm1 = vmmov %vm12914_vm9  ;;  %v7231_v42 = vsel %vm7118_vm7, %v11763_v17, %v11644_v4  ;;  %v7216_v8 = vsel %vm7118_vm7, %v11723_v48, %v11795_v11  ;;  %v7232_v29 = vsel %vm7118_vm7, %v11795_v11, %v11723_v48  ;;  %v12946_v18 = vld [vmem:[#allocation14_spill] sm:$0xff] }
 0x479   : > { %7319 = vst.msk [vmem:[%s11938_s7 + $0x140] sm:$0xff] %vm12916_vm1, %v12915_v27  ;;  %7265 = vst [vmem:[%s11938_s7 + $0x168] sm:$0xff] %v7144_v40  ;;  %v7223_v4 = vsel %vm7118_vm7, %v11662_v33, %v11782_v5  ;;  %v7239_v48 = vsel %vm7118_vm7, %v11782_v5, %v11662_v33  ;;  %v7224_v17 = vsel %vm7118_vm7, %v11745_v47, %v11819_v15  ;;  %v12948_v27 = vld [vmem:[#allocation15_spill] sm:$0xff] }
 0x47a   : > { %7266 = vst [vmem:[%s11938_s7 + $0x170] sm:$0xff] %v7128_v22  ;;  %vm12918_vm6 = vmmov %vm12916_vm1  ;;  %v7240_v11 = vsel %vm7118_vm7, %v11819_v15, %v11745_v47  ;;  %v7120_v33 = vsel %vm7118_vm7, %v11821_v25, %v11761_v57  ;;  %v7136_v47 = vsel %vm7118_vm7, %v11761_v57, %v11821_v25  ;;  %v7121_v5 = vsel %vm7118_vm7, %v11842_v55, %v11920_v31 }
 0x47b   : > { %7320 = vst.msk [vmem:[%s11938_s7 + $0x168] sm:$0xff] %vm12918_vm6, %v12917_v39  ;;  %7279 = vst [vmem:[%s11938_s7 + $0x10] sm:$0xff] %v7231_v42  ;;  %v7137_v15 = vsel %vm7118_vm7, %v11920_v31, %v11842_v55  ;;  %v7129_v57 = vsel %vm7118_vm7, %v11861_v63, %v7105_v13  ;;  %v7145_v25 = vsel %vm7118_vm7, %v7105_v13, %v11861_v63  ;;  %v12929_v63 = vld [vmem:[#allocation9_spill] sm:$0xff] }
 0x47c   : > { %7280 = vst [vmem:[%s11938_s7 + $0x18] sm:$0xff] %v7215_v45  ;;  %vm12919_vm4 = vmmov %vm12916_vm1  ;;  %v7122_v55 = vsel %vm7118_vm7, %v11873_v28, %v7091_v56  ;;  %v7138_v36 = vsel %vm7118_vm7, %v7091_v56, %v11873_v28  ;;  %7197 = vrot.lane.b32.xlu1 %v5403_v23, %s8051_s3  ;;  %v7050_v21 = vsel %vm7043_vm11, %v7046_v38, %v7049_v44 }
 0x47d   : > { %7343 = vst.msk [vmem:[%s11938_s7 + $0x20] sm:$0xff] %vm12919_vm4, %v7231_v42  ;;  %7281 = vst [vmem:[%s11938_s7 + $0x38] sm:$0xff] %v7232_v29  ;;  %v7217_v28 = vsel %vm7118_vm7, %v11884_v34, %v7188_v53  ;;  %v7233_v26 = vsel %vm7118_vm7, %v7188_v53, %v11884_v34  ;;  %v7225_v34 = vsel %vm7118_vm7, %v11906_v32, %v7204_v60  ;;  %v7051_v16 = vsel %vm3744_vm14, nan, %v7050_v21 }
 0x47e   : > { %7282 = vst [vmem:[%s11938_s7 + $0x40] sm:$0xff] %v7216_v8  ;;  %vm12920_vm2 = vmmov %vm12916_vm1  ;;  %v7241_v58 = vsel %vm7118_vm7, %v7204_v60, %v11906_v32  ;;  %v7130_v31 = vsel %vm7118_vm7, %v11899_v1, %v7107_v0  ;;  %v7146_v12 = vsel %vm7118_vm7, %v7107_v0, %v11899_v1  ;;  %v7190_v32 = vpop.permute.xlu1 %7189 }
 0x47f   : > { %7344 = vst.msk [vmem:[%s11938_s7 + $0x48] sm:$0xff] %vm12920_vm2, %v7232_v29  ;;  %vm12921_vm0 = vmmov %vm12916_vm1  ;;  %v7218_v1 = vsel %vm7118_vm7, %v11912_v41, %v7190_v32  ;;  %v7234_v35 = vsel %vm7118_vm7, %v7190_v32, %v11912_v41 }
 0x480   : > { %7327 = vst.msk [vmem:[%s11938_s7 + $0x10] sm:$0xff] %vm12921_vm0, %v7135_v49  ;;  %7295 = vst [vmem:[%s11938_s7 + $0x150] sm:$0xff] %v7239_v48  ;;  %7213 = vrot.lane.b32.xlu1 %v7051_v16, %s8051_s3  ;;  %v12944_v49 = vld [vmem:[#allocation13_spill] sm:$0xff] }
 0x481   : > { %7296 = vst [vmem:[%s11938_s7 + $0x158] sm:$0xff] %v7223_v4  ;;  %vm12922_vm8 = vmmov %vm12921_vm0  ;;  %v12953_v4 = vld [vmem:[#allocation16_spill] sm:$0xff] }
 0x482   : > { %7351 = vst.msk [vmem:[%s11938_s7 + $0x160] sm:$0xff] %vm12922_vm8, %v7239_v48  ;;  %7297 = vst [vmem:[%s11938_s7 + $0x178] sm:$0xff] %v7240_v11  ;;  %v7206_v30 = vpop.permute.xlu1 %7205  ;;  %v7061_v41 = vpop.permute.xlu0 %7060 }
 0x483   : > { %7298 = vst [vmem:[%s11938_s7 + $0x180] sm:$0xff] %v7224_v17  ;;  %vm12923_vm3 = vmmov %vm12921_vm0  ;;  %v7226_v2 = vsel %vm7118_vm7, %v11933_v10, %v7206_v30  ;;  %v7242_v6 = vsel %vm7118_vm7, %v7206_v30, %v11933_v10 }
 0x484   : > { %7352 = vst.msk [vmem:[%s11938_s7 + $0x188] sm:$0xff] %vm12923_vm3, %v7240_v11  ;;  %vm12924_vm5 = vmmov %vm12921_vm0 }
 0x485   : > { %7335 = vst.msk [vmem:[%s11938_s7 + $0x150] sm:$0xff] %vm12924_vm5, %v7143_v61  ;;  %vm12925_vm15 = vmmov %vm12921_vm0 }
 0x486   : > { %7336 = vst.msk [vmem:[%s11938_s7 + $0x178] sm:$0xff] %vm12925_vm15, %v7144_v40  ;;  %7249 = vst [vmem:[%s11938_s7 + $0x28] sm:$0xff] %v7136_v47  ;;  %v7077_v20 = vpop.permute.xlu0 %7076 }
 0x487   : > { %7250 = vst [vmem:[%s11938_s7 + $0x30] sm:$0xff] %v7120_v33  ;;  %vm12926_vm12 = vmmov %vm12921_vm0 }
 0x488   : > { %7328 = vst.msk [vmem:[%s11938_s7 + $0x38] sm:$0xff] %vm12926_vm12, %v7136_v47  ;;  %7251 = vst [vmem:[%s11938_s7 + $0x50] sm:$0xff] %v7137_v15 }
 0x489   : > { %7252 = vst [vmem:[%s11938_s7 + $0x58] sm:$0xff] %v7121_v5  ;;  %vm12928_vm10 = vmmov %vm12921_vm0 }
 0x48a   : > { %7312 = vst.msk [vmem:[%s11938_s7 + $0x28] sm:$0xff] %vm12928_vm10, %v12927_v14  ;;  %vm12930_vm13 = vmmov %vm12921_vm0  ;;  %v7160_v9 = vpop.permute.xlu0 %7159 }
 0x48b   : > { %7313 = vst.msk [vmem:[%s11938_s7 + $0x50] sm:$0xff] %vm12930_vm13, %v12929_v63  ;;  %7267 = vst [vmem:[%s11938_s7 + $0x190] sm:$0xff] %v7145_v25 }
 0x48c   : > { %7268 = vst [vmem:[%s11938_s7 + $0x198] sm:$0xff] %v7129_v57  ;;  %7253 = vst [vmem:[%s11938_s7 + $0x78] sm:$0xff] %v7138_v36  ;;  %v7063_v3 = vpop.permute.xlu1 %7062 }
 0x48d   : > { %7254 = vst [vmem:[%s11938_s7 + $0x80] sm:$0xff] %v7122_v55  ;;  %vm12932_vm11 = vmmov %vm12921_vm0 }
 0x48e   : > { %7321 = vst.msk [vmem:[%s11938_s7 + $0x190] sm:$0xff] %vm12932_vm11, %v12931_v50  ;;  %vm12934_vm9 = vmmov %vm12921_vm0  ;;  %v7176_v43 = vpop.permute.xlu0 %7175 }
 0x48f   : > { %7314 = vst.msk [vmem:[%s11938_s7 + $0x78] sm:$0xff] %vm12934_vm9, %v12933_v46  ;;  %7283 = vst [vmem:[%s11938_s7 + $0x60] sm:$0xff] %v7233_v26 }
 0x490   : > { %7284 = vst [vmem:[%s11938_s7 + $0x68] sm:$0xff] %v7217_v28  ;;  %vm12935_vm1 = vmmov %vm12921_vm0 }
 0x491   : > { %7345 = vst.msk [vmem:[%s11938_s7 + $0x70] sm:$0xff] %vm12935_vm1, %v7233_v26  ;;  %vm12936_vm6 = vmmov %vm12921_vm0  ;;  %v7079_v24 = vpop.permute.xlu1 %7078  ;;  %v12959_v26 = vld [vmem:[#allocation17_spill] sm:$0xff] }
 0x492   : > { %7329 = vst.msk [vmem:[%s11938_s7 + $0x60] sm:$0xff] %vm12936_vm6, %v7137_v15  ;;  %7299 = vst [vmem:[%s11938_s7 + $0x1a0] sm:$0xff] %v7241_v58 }
 0x493   : > { %7300 = vst [vmem:[%s11938_s7 + $0x1a8] sm:$0xff] %v7225_v34  ;;  %vm12937_vm4 = vmmov %vm12921_vm0  ;;  %v12961_v34 = vld [vmem:[#allocation18_spill] sm:$0xff] }
 0x494   : > { %7353 = vst.msk [vmem:[%s11938_s7 + $0x1b0] sm:$0xff] %vm12937_vm4, %v7241_v58  ;;  %7269 = vst [vmem:[%s11938_s7 + $0x1b8] sm:$0xff] %v7146_v12 }
 0x495   : > { %7270 = vst [vmem:[%s11938_s7 + $0x1c0] sm:$0xff] %v7130_v31  ;;  %vm12938_vm14 = vmmov %vm12921_vm0  ;;  %v7162_v37 = vpop.permute.xlu1 %7161 }
 0x496   : > { %7337 = vst.msk [vmem:[%s11938_s7 + $0x1a0] sm:$0xff] %vm12938_vm14, %v7145_v25  ;;  %vm12940_vm2 = vmmov %vm12921_vm0 }
 0x497   : > { %7322 = vst.msk [vmem:[%s11938_s7 + $0x1b8] sm:$0xff] %vm12940_vm2, %v12939_v62  ;;  %7285 = vst [vmem:[%s11938_s7 + $0x88] sm:$0xff] %v7234_v35 }
 0x498   : > { %7286 = vst [vmem:[%s11938_s7 + $0x90] sm:$0xff] %v7218_v1  ;;  %7346 = vst.msk [vmem:[%s11938_s7 + $0x98] sm:$0xff] %vm12921_vm0, %v7234_v35  ;;  %v12963_v1 = vld [vmem:[#allocation19_spill] sm:$0xff] }
 0x499   : > { %vm12941_vm8 = vmmov %vm12921_vm0  ;;  %7301 = vst [vmem:[%s11938_s7 + $0x1c8] sm:$0xff] %v7242_v6 }
 0x49a   : > { %7330 = vst.msk [vmem:[%s11938_s7 + $0x88] sm:$0xff] %vm12941_vm8, %v7138_v36  ;;  %7302 = vst [vmem:[%s11938_s7 + $0x1d0] sm:$0xff] %v7226_v2  ;;  %v7178_v54 = vpop.permute.xlu1 %7177 }
 0x49b   : > { %vm12942_vm3 = vmmov %vm12921_vm0 }
 0x49c   : > { %7354 = vst.msk [vmem:[%s11938_s7 + $0x1d8] sm:$0xff] %vm12942_vm3, %v7242_v6  ;;  %vm12943_vm5 = vmmov %vm12921_vm0 }
 0x49d   : > { %7338 = vst.msk [vmem:[%s11938_s7 + $0x1c8] sm:$0xff] %vm12943_vm5, %v7146_v12  ;;  %vm12945_vm15 = vmmov %vm12921_vm0 }
 0x49e   : > { %vm12947_vm12 = vmmov %vm12921_vm0 }
 0x49f   : > { %vm12949_vm10 = vmmov %vm12921_vm0 }
 0x4a0   : > { %v7093_v10 = vpop.permute.xlu0 %7092  ;;  %vm12950_vm13 = vmmov %vm12921_vm0 }
 0x4a1   : > { %v7123_v7 = vsel %vm7118_vm7, %v7061_v41, %v7093_v10  ;;  %v7139_v23 = vsel %vm7118_vm7, %v7093_v10, %v7061_v41  ;;  %vm12951_vm11 = vmmov %vm12921_vm0 }
 0x4a2   : > { %7255 = vst [vmem:[%s11938_s7 + $0xa0] sm:$0xff] %v7139_v23  ;;  %7256 = vst [vmem:[%s11938_s7 + $0xa8] sm:$0xff] %v7123_v7 }
 0x4a3   : > { %7315 = vst.msk [vmem:[%s11938_s7 + $0xa0] sm:$0xff] %vm12945_vm15, %v12944_v49  ;;  %vm12952_vm9 = vmmov %vm12921_vm0 }
 0x4a4   : > { %v7109_v13 = vpop.permute.xlu0 %7108  ;;  %vm12954_vm1 = vmmov %vm12921_vm0 }
 0x4a5   : > { %v7131_v52 = vsel %vm7118_vm7, %v7077_v20, %v7109_v13  ;;  %v7147_v44 = vsel %vm7118_vm7, %v7109_v13, %v7077_v20  ;;  %vm12955_vm6 = vmmov %vm12921_vm0 }
 0x4a6   : > { %7271 = vst [vmem:[%s11938_s7 + $0x1e0] sm:$0xff] %v7147_v44  ;;  %7272 = vst [vmem:[%s11938_s7 + $0x1e8] sm:$0xff] %v7131_v52 }
 0x4a7   : > { %7323 = vst.msk [vmem:[%s11938_s7 + $0x1e0] sm:$0xff] %vm12947_vm12, %v12946_v18  ;;  %v7095_v61 = vpop.permute.xlu1 %7094  ;;  %vm12956_vm4 = vmmov %vm12921_vm0 }
 0x4a8   : > { %v7124_v51 = vsel %vm7118_vm7, %v7063_v3, %v7095_v61  ;;  %v7140_v38 = vsel %vm7118_vm7, %v7095_v61, %v7063_v3  ;;  %v7192_v59 = vpop.permute.xlu0 %7191  ;;  %vm12957_vm14 = vmmov %vm12921_vm0  ;;  %v12969_v3 = vld [vmem:[#allocation20_spill] sm:$0xff] }
 0x4a9   : > { %7257 = vst [vmem:[%s11938_s7 + $0xc8] sm:$0xff] %v7140_v38  ;;  %7258 = vst [vmem:[%s11938_s7 + $0xd0] sm:$0xff] %v7124_v51  ;;  %v7219_v22 = vsel %vm7118_vm7, %v7160_v9, %v7192_v59  ;;  %v7235_v40 = vsel %vm7118_vm7, %v7192_v59, %v7160_v9 }
 0x4aa   : > { %7316 = vst.msk [vmem:[%s11938_s7 + $0xc8] sm:$0xff] %vm12949_vm10, %v12948_v27  ;;  %7287 = vst [vmem:[%s11938_s7 + $0xb0] sm:$0xff] %v7235_v40 }
 0x4ab   : > { %7288 = vst [vmem:[%s11938_s7 + $0xb8] sm:$0xff] %v7219_v22  ;;  %7347 = vst.msk [vmem:[%s11938_s7 + $0xc0] sm:$0xff] %vm12950_vm13, %v7235_v40 }
 0x4ac   : > { %7331 = vst.msk [vmem:[%s11938_s7 + $0xb0] sm:$0xff] %vm12951_vm11, %v7139_v23  ;;  %v7111_v45 = vpop.permute.xlu1 %7110  ;;  %v7208_v42 = vpop.permute.xlu0 %7207  ;;  %vm12958_vm2 = vmmov %vm12921_vm0 }
 0x4ad   : > { %v7132_v8 = vsel %vm7118_vm7, %v7079_v24, %v7111_v45  ;;  %v7148_v29 = vsel %vm7118_vm7, %v7111_v45, %v7079_v24  ;;  %v7227_v56 = vsel %vm7118_vm7, %v7176_v43, %v7208_v42  ;;  %v7243_v39 = vsel %vm7118_vm7, %v7208_v42, %v7176_v43  ;;  %vm12960_vm8 = vmmov %vm12921_vm0 }
 0x4ae   : > { %7273 = vst [vmem:[%s11938_s7 + $0x208] sm:$0xff] %v7148_v29  ;;  %7274 = vst [vmem:[%s11938_s7 + $0x210] sm:$0xff] %v7132_v8 }
 0x4af   : > { %7303 = vst [vmem:[%s11938_s7 + $0x1f0] sm:$0xff] %v7243_v39  ;;  %7304 = vst [vmem:[%s11938_s7 + $0x1f8] sm:$0xff] %v7227_v56 }
 0x4b0   : > { %7355 = vst.msk [vmem:[%s11938_s7 + $0x200] sm:$0xff] %vm12952_vm9, %v7243_v39  ;;  %v7194_v48 = vpop.permute.xlu1 %7193  ;;  %vm12962_vm3 = vmmov %vm12921_vm0 }
 0x4b1   : > { %7324 = vst.msk [vmem:[%s11938_s7 + $0x208] sm:$0xff] %vm12954_vm1, %v12953_v4  ;;  %v7220_v17 = vsel %vm7118_vm7, %v7162_v37, %v7194_v48  ;;  %v7236_v11 = vsel %vm7118_vm7, %v7194_v48, %v7162_v37  ;;  %vm12964_vm5 = vmmov %vm12921_vm0 }
 0x4b2   : > { %7339 = vst.msk [vmem:[%s11938_s7 + $0x1f0] sm:$0xff] %vm12955_vm6, %v7147_v44  ;;  %7289 = vst [vmem:[%s11938_s7 + $0xd8] sm:$0xff] %v7236_v11 }
 0x4b3   : > { %7290 = vst [vmem:[%s11938_s7 + $0xe0] sm:$0xff] %v7220_v17  ;;  %7348 = vst.msk [vmem:[%s11938_s7 + $0xe8] sm:$0xff] %vm12956_vm4, %v7236_v11 }
 0x4b4   : > { %7332 = vst.msk [vmem:[%s11938_s7 + $0xd8] sm:$0xff] %vm12957_vm14, %v7140_v38  ;;  %vm12965_vm15 = vmmov %vm12921_vm0 }
 0x4b5   : > { %v7210_v53 = vpop.permute.xlu1 %7209  ;;  %vm12966_vm12 = vmmov %vm12921_vm0 }
 0x4b6   : > { %v7228_v33 = vsel %vm7118_vm7, %v7178_v54, %v7210_v53  ;;  %v7244_v47 = vsel %vm7118_vm7, %v7210_v53, %v7178_v54  ;;  %vm12967_vm10 = vmmov %vm12921_vm0 }
 0x4b7   : > { %7305 = vst [vmem:[%s11938_s7 + $0x218] sm:$0xff] %v7244_v47  ;;  %7306 = vst [vmem:[%s11938_s7 + $0x220] sm:$0xff] %v7228_v33 }
 0x4b8   : > { %7356 = vst.msk [vmem:[%s11938_s7 + $0x228] sm:$0xff] %vm12958_vm2, %v7244_v47  ;;  %vm12968_vm13 = vmmov %vm12921_vm0 }
 0x4b9   : > { %7340 = vst.msk [vmem:[%s11938_s7 + $0x218] sm:$0xff] %vm12921_vm0, %v7148_v29  ;;  %vm12970_vm11 = vmmov %vm12921_vm0 }
 0x4ba   : > { %vm12971_vm9 = vmmov %vm12921_vm0 }
 0x4bb   : > { %vm12972_vm1 = vmmov %vm12921_vm0 }
 0x4bc   : > { %vm12973_vm6 = vmmov %vm12921_vm0 }
 0x4bd   : > { %vm12974_vm4 = vmmov %vm12921_vm0 }
 0x4c0   : > { %v7065_v5 = vpop.permute.xlu0 %7064 }
 0x4c4   : > { %v7081_v15 = vpop.permute.xlu0 %7080 }
 0x4c5   : > { %v7067_v57 = vpop.permute.xlu1 %7066 }
 0x4c8   : > { %v7164_v25 = vpop.permute.xlu0 %7163 }
 0x4cc   : > { %v7180_v36 = vpop.permute.xlu0 %7179 }
 0x4cd   : > { %v7083_v55 = vpop.permute.xlu1 %7082 }
 0x4d1   : > { %v7166_v21 = vpop.permute.xlu1 %7165 }
 0x4d5   : > { %v7182_v50 = vpop.permute.xlu1 %7181 }
 0x4da   : > { %v7097_v14 = vpop.permute.xlu0 %7096 }
 0x4db   : > { %v7125_v63 = vsel %vm7118_vm7, %v7065_v5, %v7097_v14  ;;  %v7141_v28 = vsel %vm7118_vm7, %v7097_v14, %v7065_v5 }
 0x4dc   : > { %7259 = vst [vmem:[%s11938_s7 + $0xf0] sm:$0xff] %v7141_v28  ;;  %7260 = vst [vmem:[%s11938_s7 + $0xf8] sm:$0xff] %v7125_v63 }
 0x4dd   : > { %7317 = vst.msk [vmem:[%s11938_s7 + $0xf0] sm:$0xff] %vm12960_vm8, %v12959_v26 }
 0x4e0   : > { %v7113_v46 = vpop.permute.xlu0 %7112 }
 0x4e1   : > { %v7133_v60 = vsel %vm7118_vm7, %v7081_v15, %v7113_v46  ;;  %v7149_v0 = vsel %vm7118_vm7, %v7113_v46, %v7081_v15 }
 0x4e2   : > { %7275 = vst [vmem:[%s11938_s7 + $0x230] sm:$0xff] %v7149_v0  ;;  %7276 = vst [vmem:[%s11938_s7 + $0x238] sm:$0xff] %v7133_v60 }
 0x4e3   : > { %7325 = vst.msk [vmem:[%s11938_s7 + $0x230] sm:$0xff] %vm12962_vm3, %v12961_v34 }
 0x4e4   : > { %v7099_v58 = vpop.permute.xlu1 %7098  ;;  %v7196_v12 = vpop.permute.xlu0 %7195 }
 0x4e5   : > { %v7126_v16 = vsel %vm7118_vm7, %v7067_v57, %v7099_v58  ;;  %v7142_v31 = vsel %vm7118_vm7, %v7099_v58, %v7067_v57  ;;  %v7221_v62 = vsel %vm7118_vm7, %v7164_v25, %v7196_v12  ;;  %v7237_v32 = vsel %vm7118_vm7, %v7196_v12, %v7164_v25 }
 0x4e6   : > { %7261 = vst [vmem:[%s11938_s7 + $0x118] sm:$0xff] %v7142_v31  ;;  %7262 = vst [vmem:[%s11938_s7 + $0x120] sm:$0xff] %v7126_v16 }
 0x4e7   : > { %7318 = vst.msk [vmem:[%s11938_s7 + $0x118] sm:$0xff] %vm12964_vm5, %v12963_v1  ;;  %7291 = vst [vmem:[%s11938_s7 + $0x100] sm:$0xff] %v7237_v32 }
 0x4e8   : > { %7292 = vst [vmem:[%s11938_s7 + $0x108] sm:$0xff] %v7221_v62  ;;  %7349 = vst.msk [vmem:[%s11938_s7 + $0x110] sm:$0xff] %vm12965_vm15, %v7237_v32  ;;  %v7212_v35 = vpop.permute.xlu0 %7211 }
 0x4e9   : > { %7333 = vst.msk [vmem:[%s11938_s7 + $0x100] sm:$0xff] %vm12966_vm12, %v7141_v28  ;;  %v7229_v30 = vsel %vm7118_vm7, %v7180_v36, %v7212_v35  ;;  %v7245_v2 = vsel %vm7118_vm7, %v7212_v35, %v7180_v36 }
 0x4ea   : > { %v7115_v6 = vpop.permute.xlu1 %7114  ;;  %7307 = vst [vmem:[%s11938_s7 + $0x240] sm:$0xff] %v7245_v2  ;;  %7308 = vst [vmem:[%s11938_s7 + $0x248] sm:$0xff] %v7229_v30 }
 0x4eb   : > { %7357 = vst.msk [vmem:[%s11938_s7 + $0x250] sm:$0xff] %vm12967_vm10, %v7245_v2  ;;  %v7134_v41 = vsel %vm7118_vm7, %v7083_v55, %v7115_v6  ;;  %v7150_v20 = vsel %vm7118_vm7, %v7115_v6, %v7083_v55 }
 0x4ec   : > { %7341 = vst.msk [vmem:[%s11938_s7 + $0x240] sm:$0xff] %vm12968_vm13, %v7149_v0  ;;  %7277 = vst [vmem:[%s11938_s7 + $0x258] sm:$0xff] %v7150_v20 }
 0x4ed   : > { %7278 = vst [vmem:[%s11938_s7 + $0x260] sm:$0xff] %v7134_v41  ;;  %7326 = vst.msk [vmem:[%s11938_s7 + $0x258] sm:$0xff] %vm12970_vm11, %v12969_v3 }
 0x4ee   : > { %v7198_v9 = vpop.permute.xlu1 %7197 }
 0x4ef   : > { %v7222_v24 = vsel %vm7118_vm7, %v7166_v21, %v7198_v9  ;;  %v7238_v43 = vsel %vm7118_vm7, %v7198_v9, %v7166_v21 }
 0x4f0   : > { %7293 = vst [vmem:[%s11938_s7 + $0x128] sm:$0xff] %v7238_v43  ;;  %7294 = vst [vmem:[%s11938_s7 + $0x130] sm:$0xff] %v7222_v24 }
 0x4f1   : > { %7350 = vst.msk [vmem:[%s11938_s7 + $0x138] sm:$0xff] %vm12971_vm9, %v7238_v43 }
 0x4f2   : > { %7334 = vst.msk [vmem:[%s11938_s7 + $0x128] sm:$0xff] %vm12972_vm1, %v7142_v31  ;;  %v7214_v37 = vpop.permute.xlu1 %7213 }
 0x4f3   : > { %v7230_v10 = vsel %vm7118_vm7, %v7182_v50, %v7214_v37  ;;  %v7246_v7 = vsel %vm7118_vm7, %v7214_v37, %v7182_v50 }
 0x4f4   : > { %7309 = vst [vmem:[%s11938_s7 + $0x268] sm:$0xff] %v7246_v7  ;;  %7310 = vst [vmem:[%s11938_s7 + $0x270] sm:$0xff] %v7230_v10 }
 0x4f5   : > { %7358 = vst.msk [vmem:[%s11938_s7 + $0x278] sm:$0xff] %vm12973_vm6, %v7246_v7 }
 0x4f6   : > { %7342 = vst.msk [vmem:[%s11938_s7 + $0x268] sm:$0xff] %vm12974_vm4, %v7150_v20 }
 0x4f7 PF: > { %s13_s9 = sadd.s32 1, %s8041_s9  }
 0x4f8   : > { %p10_p3 = scmp.ge.s32.totalorder %s13_s9, 6  }
 0x4fa   :  { %12 = sbr.rel (!%p10_p3) target bundleno = 1 (0x1), region = 63 }
 0x501   :  { %7383 = vsyncpa [#allocation3], 1 }
 0x502   :  { %7385 = vsyncpa [#allocation3 + $0x1], 1 }

</bundles_post_ra>
